<compile_context>
chip_gen: v5e
topology: v5e:2x2
jax: 0.10.0
libtpu: 0.0.40
codegen_flags: <defaults>
</compile_context>

<pallas_src>
import functools

import jax
import jax.numpy as jnp
from jax.experimental import pallas as pl
from jax.experimental.pallas import tpu as pltpu

EPS = 1e-5


def _silu(x):
    return x * jax.nn.sigmoid(x)


def _round_up(x, m):
    return (x + m - 1) // m * m


# ---------------------------------------------------------------------------
# Fused MBConv kernel: one grid step == one image.
# ---------------------------------------------------------------------------
def _mbconv_kernel(*refs, k, stride, h, w, ho, wo, pad, woff, expand, use_residual):
    if expand:
        (x_ref, w_exp_ref, b_exp_ref,
         w_dw_ref, b_dw_ref,
         w_se1_ref, b_se1_ref, w_se2_ref, b_se2_ref,
         w_prT_ref, b_pr_ref, o_ref, fp_ref) = refs
    else:
        (x_ref,
         w_dw_ref, b_dw_ref,
         w_se1_ref, b_se1_ref, w_se2_ref, b_se2_ref,
         w_prT_ref, b_pr_ref, o_ref, fp_ref) = refs

    cin = x_ref.shape[-1]
    x2d = x_ref[0].reshape(h * w, cin).astype(jnp.float32)        # (h*w, cin)

    # --- 1) expansion 1x1 conv on MXU (bf16 operands, f32 acc).  BN scale is
    #        folded into the weight in the wrapper; only bias + SiLU here. ---
    if expand:
        a = jnp.dot(x2d.astype(jnp.bfloat16), w_exp_ref[...],
                    preferred_element_type=jnp.float32)           # (h*w, hidden)
        a = _silu(a + b_exp_ref[...])
    else:
        a = x2d
    hidden = a.shape[-1]

    # --- 2) depthwise kxk conv + BN bias + SiLU.  Padded feature lives in a
    #        VMEM scratch whose interior starts at a sublane-aligned column
    #        (woff % 8 == 0), so the big interior store is unmasked.  Only the
    #        thin border strips are zeroed each step. ---
    sdt = fp_ref.dtype
    wtot = woff + w + pad
    if pad > 0:
        fp_ref[:, :woff, :] = jnp.zeros((h + 2 * pad, woff, hidden), sdt)
        fp_ref[:, woff + w:, :] = jnp.zeros((h + 2 * pad, pad, hidden), sdt)
        fp_ref[:pad, :, :] = jnp.zeros((pad, wtot, hidden), sdt)
        fp_ref[pad + h:, :, :] = jnp.zeros((pad, wtot, hidden), sdt)
    fp_ref[pad:pad + h, woff:woff + w, :] = a.reshape(h, w, hidden).astype(sdt)

    wdw = w_dw_ref[...]                          # (k*k, hidden), BN scale folded
    wspan = (wo - 1) * stride + 1
    hspan = (ho - 1) * stride + 1
    acc = jnp.zeros((ho, wo, hidden), jnp.float32)
    for kw in range(k):                          # taps sliced straight from the ref
        cs = woff - pad + kw
        xw = fp_ref[:, cs:cs + wspan, :].astype(jnp.float32)      # (h+2p, wspan, hidden)
        if stride > 1:
            xw = xw[:, ::stride, :]
        for kh in range(k):
            patch = xw[kh:kh + hspan]            # cheap major-axis slice
            if stride > 1:
                patch = patch[::stride]
            acc = acc + patch * wdw[kh * k + kw]
    dw = _silu(acc + b_dw_ref[...])              # (ho, wo, hidden)
    dw2d = dw.reshape(ho * wo, hidden)

    # --- 3) squeeze-excitation gate: tiny MXU matmuls, once per image. ---
    pooled = jnp.mean(dw2d, axis=0, keepdims=True)                 # (1, hidden)
    h1 = _silu(jnp.dot(pooled, w_se1_ref[...],
                       preferred_element_type=jnp.float32) + b_se1_ref[...])
    gate = jax.nn.sigmoid(
        jnp.dot(h1, w_se2_ref[...],
                preferred_element_type=jnp.float32) + b_se2_ref[...])   # (1, hidden)

    # --- 4) projection 1x1 conv.  The projection weight is TRANSPOSED
    #        (cout_p, hidden) and f32 so the SE gate (and folded BN scale) scale
    #        the weight instead of the full feature map; the matmul is a
    #        standard NT contraction on the MXU (bf16 operands, f32 acc). ---
    wpt = (w_prT_ref[...] * gate).astype(jnp.bfloat16)             # (cout_p, hidden)
    y = jax.lax.dot_general(dw2d.astype(jnp.bfloat16), wpt,
                            (((1,), (1,)), ((), ())),
                            preferred_element_type=jnp.float32)    # (ho*wo, cout_p)
    y = y + b_pr_ref[...]
    if use_residual:
        y = y + x2d
    o_ref[0] = y.astype(o_ref.dtype)


# ---------------------------------------------------------------------------
# Wrapper.
# ---------------------------------------------------------------------------
def _fold_bn(gamma, beta, mean, var):
    s = (gamma / jnp.sqrt(var + EPS)).astype(jnp.float32)
    b = (beta - mean * s).astype(jnp.float32)
    return s, b


def _const_spec(shape):
    """Whole-array operand with a constant index_map; single-buffer it when the
    installed JAX supports per-BlockSpec pipeline_mode (saves VMEM headroom)."""
    nd = len(shape)
    index_map = lambda i, _nd=nd: (0,) * _nd
    buffered = getattr(pl, "Buffered", None)
    if buffered is not None:
        try:
            return pl.BlockSpec(shape, index_map, pipeline_mode=buffered(1))
        except TypeError:  # older BlockSpec signature without pipeline_mode
            pass
    return pl.BlockSpec(shape, index_map)


def mbconv_forward_nhwc(x, p, *, in_channels, out_channels, expand_ratio,
                        kernel_size, stride, dw_scratch_dtype=jnp.float32):
    """NHWC in / NHWC out fused MBConv forward (inference BatchNorm)."""
    use_residual = (in_channels == out_channels) and (stride == 1)
    expand = expand_ratio != 1
    n, h, w, cin = x.shape
    hidden = in_channels * expand_ratio
    reduced = p["w_se1"].shape[1]
    cout = out_channels

    k = kernel_size
    pad = (k - 1) // 2
    ho = (h + 2 * pad - k) // stride + 1
    wo = (w + 2 * pad - k) // stride + 1
    # Sublane-aligned column offset of the interior in the padded scratch.
    woff = 0 if pad == 0 else _round_up(pad, 8)

    # --- lane-density padding of channel dims (sliced off after the call) ---
    cout_p = _round_up(cout, 128)
    if (not expand) and use_residual:
        # TODO(synk): lane-pad the expand_ratio==1 residual path too (needs the
        # depthwise/SE params padded along the channel axis as well).
        cout_p = cout
    cin_p = cout_p if use_residual else cin
    red_p = _round_up(reduced, 8)

    x = x.astype(jnp.float32)
    if cin_p != cin:
        x = jnp.pad(x, ((0, 0), (0, 0), (0, 0), (0, cin_p - cin)))

    # --- fold BN scales into the conv weights (f32); keep only biases. ---
    s_dw, b_dw = _fold_bn(p["g_dw"], p["b_dw"], p["m_dw"], p["v_dw"])
    s_pr, b_pr = _fold_bn(p["g_pr"], p["b_pr"], p["m_pr"], p["v_pr"])

    w_dw = p["w_dw"].astype(jnp.float32) * s_dw[None, :]               # (k*k, hidden)
    w_prT = (p["w_proj"].astype(jnp.float32) * s_pr[None, :]).T        # (cout, hidden)
    w_prT = jnp.pad(w_prT, ((0, cout_p - cout), (0, 0)))               # (cout_p, hidden)
    b_prp = jnp.pad(b_pr, (0, cout_p - cout)).reshape(1, cout_p)

    w_se1 = jnp.pad(p["w_se1"].astype(jnp.float32), ((0, 0), (0, red_p - reduced)))
    b_se1 = jnp.pad(p["b_se1"].astype(jnp.float32), (0, red_p - reduced)).reshape(1, red_p)
    w_se2 = jnp.pad(p["w_se2"].astype(jnp.float32), ((0, red_p - reduced), (0, 0)))
    b_se2 = p["b_se2"].astype(jnp.float32).reshape(1, hidden)

    args = [x]
    in_specs = [pl.BlockSpec((1, h, w, cin_p), lambda i: (i, 0, 0, 0))]

    if expand:
        s_ex, b_ex = _fold_bn(p["g_exp"], p["b_exp"], p["m_exp"], p["v_exp"])
        w_ex = p["w_exp"].astype(jnp.float32) * s_ex[None, :]          # (cin, hidden)
        if cin_p != cin:
            w_ex = jnp.pad(w_ex, ((0, cin_p - cin), (0, 0)))
        args += [w_ex.astype(jnp.bfloat16), b_ex.reshape(1, hidden)]
        in_specs += [_const_spec((cin_p, hidden)), _const_spec((1, hidden))]

    args += [
        w_dw, b_dw.reshape(1, hidden),
        w_se1, b_se1, w_se2, b_se2,
        w_prT, b_prp,
    ]
    in_specs += [
        _const_spec((k * k, hidden)), _const_spec((1, hidden)),
        _const_spec((hidden, red_p)), _const_spec((1, red_p)),
        _const_spec((red_p, hidden)), _const_spec((1, hidden)),
        _const_spec((cout_p, hidden)), _const_spec((1, cout_p)),
    ]

    kernel = functools.partial(
        _mbconv_kernel, k=k, stride=stride, h=h, w=w, ho=ho, wo=wo,
        pad=pad, woff=woff, expand=expand, use_residual=use_residual)

    y = pl.pallas_call(
        kernel,
        out_shape=jax.ShapeDtypeStruct((n, ho * wo, cout_p), jnp.float32),
        grid=(n,),
        in_specs=in_specs,
        out_specs=pl.BlockSpec((1, ho * wo, cout_p), lambda i: (i, 0, 0)),
        scratch_shapes=[pltpu.VMEM((h + 2 * pad, woff + w + pad, hidden),
                                   dw_scratch_dtype)],
        compiler_params=pltpu.CompilerParams(
            dimension_semantics=("parallel",),
            # Explicit scoped-VMEM cap: above v5e's 16 MiB default, below v7x's
            # 64 MiB physical VMEM.
            vmem_limit_bytes=48 * 1024 * 1024),
    )(*args)

    y = y[:, :, :cout].reshape(n, ho, wo, cout)
    return y


def mbconv_forward(x_nchw, p, **kwargs):
    # TODO(synk): in a stacked network keep activations NHWC end-to-end; this
    # NCHW<->NHWC adapter only exists to match the PyTorch module's layout.
    x = jnp.transpose(x_nchw, (0, 2, 3, 1))
    y = mbconv_forward_nhwc(x, p, **kwargs)
    return jnp.transpose(y, (0, 3, 1, 2))


# ---------------------------------------------------------------------------
# Pure-JAX reference (module semantics).  matmul_dtype=bfloat16 mirrors the
# kernel's MXU operand precision (f32 accumulation) for a tight check.
# ---------------------------------------------------------------------------
def mbconv_reference(x_nchw, p, *, in_channels, out_channels, expand_ratio,
                     kernel_size, stride, matmul_dtype=jnp.float32):
    use_residual = (in_channels == out_channels) and (stride == 1)
    x = jnp.transpose(x_nchw, (0, 2, 3, 1)).astype(jnp.float32)
    n, h, w, _ = x.shape

    def bn(y, g, b, m, v):
        return (y - m) / jnp.sqrt(v + EPS) * g + b

    def mm(a, wgt):
        n_, h_, w_, c_ = a.shape
        o = jnp.dot(a.reshape(-1, c_).astype(matmul_dtype),
                    wgt.astype(matmul_dtype),
                    preferred_element_type=jnp.float32)
        return o.reshape(n_, h_, w_, -1)

    feat = x
    if expand_ratio != 1:
        feat = mm(feat, p["w_exp"])
        feat = _silu(bn(feat, p["g_exp"], p["b_exp"], p["m_exp"], p["v_exp"]))
    hidden = feat.shape[-1]

    k = kernel_size
    pad = (k - 1) // 2
    ho = (h + 2 * pad - k) // stride + 1
    wo = (w + 2 * pad - k) // stride + 1
    fp = jnp.pad(feat, ((0, 0), (pad, pad), (pad, pad), (0, 0)))
    acc = jnp.zeros((n, ho, wo, hidden), jnp.float32)
    for kw in range(k):                 # same accumulation order as the kernel
        for kh in range(k):
            patch = fp[:, kh:kh + (ho - 1) * stride + 1:stride,
                          kw:kw + (wo - 1) * stride + 1:stride, :]
            acc = acc + patch * p["w_dw"][kh * k + kw]
    feat = _silu(bn(acc, p["g_dw"], p["b_dw"], p["m_dw"], p["v_dw"]))

    pooled = jnp.mean(feat, axis=(1, 2))
    se = _silu(pooled @ p["w_se1"] + p["b_se1"])
    gate = jax.nn.sigmoid(se @ p["w_se2"] + p["b_se2"])
    feat = feat * gate[:, None, None, :]

    y = mm(feat, p["w_proj"])
    y = bn(y, p["g_pr"], p["b_pr"], p["m_pr"], p["v_pr"])
    if use_residual:
        y = y + x
    return jnp.transpose(y, (0, 3, 1, 2))


# ---------------------------------------------------------------------------
def init_params(key, in_channels, out_channels, expand_ratio, kernel_size,
                reduction_ratio=4):
    hidden = in_channels * expand_ratio
    reduced = max(1, int(in_channels / reduction_ratio))
    ks = list(jax.random.split(key, 20))

    def nrm(k, shape, s=0.1):
        return (s * jax.random.normal(k, shape)).astype(jnp.float32)

    return {
        "w_exp": nrm(ks[0], (in_channels, hidden)),
        "g_exp": 1.0 + nrm(ks[1], (hidden,)),
        "b_exp": nrm(ks[2], (hidden,)),
        "m_exp": nrm(ks[3], (hidden,), 0.05),
        "v_exp": 1.0 + jnp.abs(nrm(ks[4], (hidden,))),
        "w_dw": nrm(ks[5], (kernel_size * kernel_size, hidden)),
        "g_dw": 1.0 + nrm(ks[6], (hidden,)),
        "b_dw": nrm(ks[7], (hidden,)),
        "m_dw": nrm(ks[8], (hidden,), 0.05),
        "v_dw": 1.0 + jnp.abs(nrm(ks[9], (hidden,))),
        "w_se1": nrm(ks[10], (hidden, reduced)),
        "b_se1": nrm(ks[11], (reduced,)),
        "w_se2": nrm(ks[12], (reduced, hidden)),
        "b_se2": nrm(ks[13], (hidden,)),
        "w_proj": nrm(ks[14], (hidden, out_channels)),
        "g_pr": 1.0 + nrm(ks[15], (out_channels,)),
        "b_pr": nrm(ks[16], (out_channels,)),
        "m_pr": nrm(ks[17], (out_channels,), 0.05),
        "v_pr": 1.0 + jnp.abs(nrm(ks[18], (out_channels,))),
    }


if __name__ == "__main__":
    # MBConvBlock(in_channels=8, out_channels=8, expand_ratio=4, kernel_size=3, stride=1)
    in_ch, out_ch, expand_ratio, ksize, stride = 8, 8, 4, 3, 1
    N, H, W = 2, 16, 16

    key = jax.random.PRNGKey(0)
    kx, kp = jax.random.split(key)
    x = jax.random.normal(kx, (N, in_ch, H, W), dtype=jnp.float32)
    params = init_params(kp, in_ch, out_ch, expand_ratio, ksize)

    y = mbconv_forward(x, params, in_channels=in_ch, out_channels=out_ch,
                       expand_ratio=expand_ratio, kernel_size=ksize, stride=stride)
    y = jax.block_until_ready(y)

    y_ref = mbconv_reference(x, params, in_channels=in_ch, out_channels=out_ch,
                             expand_ratio=expand_ratio, kernel_size=ksize,
                             stride=stride, matmul_dtype=jnp.bfloat16)
    y_ref = jax.block_until_ready(y_ref)

    assert y.shape == (N, out_ch, H, W), y.shape
    max_err = float(jnp.max(jnp.abs(y - y_ref)))
    assert max_err < 2e-2, max_err
    print("KERNEL_OK")
</pallas_src>

<mosaic_0001>
module attributes {stable_mosaic.version = 11 : i64} {
  func.func @_mbconv_kernel(%arg0: i32, %arg1: memref<1x16x16x128xf32, #tpu.memory_space<vmem>>, %arg2: memref<128x32xbf16, #tpu.memory_space<vmem>>, %arg3: memref<1x32xf32, #tpu.memory_space<vmem>>, %arg4: memref<9x32xf32, #tpu.memory_space<vmem>>, %arg5: memref<1x32xf32, #tpu.memory_space<vmem>>, %arg6: memref<32x8xf32, #tpu.memory_space<vmem>>, %arg7: memref<1x8xf32, #tpu.memory_space<vmem>>, %arg8: memref<8x32xf32, #tpu.memory_space<vmem>>, %arg9: memref<1x32xf32, #tpu.memory_space<vmem>>, %arg10: memref<128x32xf32, #tpu.memory_space<vmem>>, %arg11: memref<1x128xf32, #tpu.memory_space<vmem>>, %arg12: memref<1x256x128xf32, #tpu.memory_space<vmem>>, %arg13: memref<18x25x32xf32, #tpu.memory_space<vmem>>) attributes {dimension_semantics = [#tpu.dimension_semantics<parallel>], iteration_bounds = array<i64: 2>, scalar_prefetch = 0 : i64, scratch_operands = 1 : i64, tpu.core_type = #tpu.core_type<tc>, window_params = [{transform_indices = @transform_0, window_bounds = array<i64: 1, 16, 16, 128>}, {pipeline_mode = #tpu.pipeline_mode<synchronous>, transform_indices = @transform_1, window_bounds = array<i64: 128, 32>}, {pipeline_mode = #tpu.pipeline_mode<synchronous>, transform_indices = @transform_2, window_bounds = array<i64: 1, 32>}, {pipeline_mode = #tpu.pipeline_mode<synchronous>, transform_indices = @transform_3, window_bounds = array<i64: 9, 32>}, {pipeline_mode = #tpu.pipeline_mode<synchronous>, transform_indices = @transform_4, window_bounds = array<i64: 1, 32>}, {pipeline_mode = #tpu.pipeline_mode<synchronous>, transform_indices = @transform_5, window_bounds = array<i64: 32, 8>}, {pipeline_mode = #tpu.pipeline_mode<synchronous>, transform_indices = @transform_6, window_bounds = array<i64: 1, 8>}, {pipeline_mode = #tpu.pipeline_mode<synchronous>, transform_indices = @transform_7, window_bounds = array<i64: 8, 32>}, {pipeline_mode = #tpu.pipeline_mode<synchronous>, transform_indices = @transform_8, window_bounds = array<i64: 1, 32>}, {pipeline_mode = #tpu.pipeline_mode<synchronous>, transform_indices = @transform_9, window_bounds = array<i64: 128, 32>}, {pipeline_mode = #tpu.pipeline_mode<synchronous>, transform_indices = @transform_10, window_bounds = array<i64: 1, 128>}, {transform_indices = @transform_11, window_bounds = array<i64: 1, 256, 128>}]} {
    %c0 = arith.constant 0 : index
    %c0_0 = arith.constant 0 : index
    %c0_1 = arith.constant 0 : index
    %c0_2 = arith.constant 0 : index
    %0 = vector.load %arg1[%c0, %c0_0, %c0_1, %c0_2] : memref<1x16x16x128xf32, #tpu.memory_space<vmem>>, vector<1x16x16x128xf32>
    %1 = vector.shape_cast %0 : vector<1x16x16x128xf32> to vector<16x16x128xf32>
    %2 = vector.shape_cast %1 : vector<16x16x128xf32> to vector<256x128xf32>
    %3 = arith.truncf %2 : vector<256x128xf32> to vector<256x128xbf16>
    %c0_3 = arith.constant 0 : index
    %c0_4 = arith.constant 0 : index
    %4 = vector.load %arg2[%c0_3, %c0_4] : memref<128x32xbf16, #tpu.memory_space<vmem>>, vector<128x32xbf16>
    %cst = arith.constant dense<0.000000e+00> : vector<256x32xf32>
    %5 = tpu.matmul %3, %4, %cst {dimension_numbers = #tpu.dot_dimension_numbers<[1], [0], [0], [1], [0, 0, 1, 1], [], []>} : vector<256x128xbf16>, vector<128x32xbf16>, vector<256x32xf32> -> vector<256x32xf32>
    %c0_5 = arith.constant 0 : index
    %c0_6 = arith.constant 0 : index
    %6 = vector.load %arg3[%c0_5, %c0_6] : memref<1x32xf32, #tpu.memory_space<vmem>>, vector<1x32xf32>
    %7 = vector.broadcast %6 : vector<1x32xf32> to vector<256x32xf32>
    %8 = arith.addf %5, %7 : vector<256x32xf32>
    %9 = arith.negf %8 : vector<256x32xf32>
    %10 = math.exp %9 : vector<256x32xf32>
    %cst_7 = arith.constant 1.000000e+00 : f32
    %11 = vector.broadcast %cst_7 : f32 to vector<256x32xf32>
    %12 = arith.addf %11, %10 : vector<256x32xf32>
    %13 = arith.divf %11, %12 : vector<256x32xf32>
    %14 = arith.mulf %8, %13 : vector<256x32xf32>
    %cst_8 = arith.constant 0.000000e+00 : f32
    %15 = vector.broadcast %cst_8 : f32 to vector<18x8x32xf32>
    %c0_9 = arith.constant 0 : index
    %c0_10 = arith.constant 0 : index
    %c0_11 = arith.constant 0 : index
    %16 = vector.load %arg13[%c0_9, %c0_10, %c0_11] : memref<18x25x32xf32, #tpu.memory_space<vmem>>, vector<18x8x32xf32>
    tpu.vector_store %arg13[%c0_9, %c0_10, %c0_11], %15 {strides = array<i32>} : memref<18x25x32xf32, #tpu.memory_space<vmem>>, vector<18x8x32xf32>,
    %cst_12 = arith.constant 0.000000e+00 : f32
    %17 = vector.broadcast %cst_12 : f32 to vector<18x1x32xf32>
    %c0_13 = arith.constant 0 : index
    %c24 = arith.constant 24 : index
    %c0_14 = arith.constant 0 : index
    %18 = vector.load %arg13[%c0_13, %c24, %c0_14] : memref<18x25x32xf32, #tpu.memory_space<vmem>>, vector<18x1x32xf32>
    tpu.vector_store %arg13[%c0_13, %c24, %c0_14], %17 {strides = array<i32>} : memref<18x25x32xf32, #tpu.memory_space<vmem>>, vector<18x1x32xf32>,
    %cst_15 = arith.constant 0.000000e+00 : f32
    %19 = vector.broadcast %cst_15 : f32 to vector<1x25x32xf32>
    %c0_16 = arith.constant 0 : index
    %c0_17 = arith.constant 0 : index
    %c0_18 = arith.constant 0 : index
    %20 = vector.load %arg13[%c0_16, %c0_17, %c0_18] : memref<18x25x32xf32, #tpu.memory_space<vmem>>, vector<1x25x32xf32>
    tpu.vector_store %arg13[%c0_16, %c0_17, %c0_18], %19 {strides = array<i32>} : memref<18x25x32xf32, #tpu.memory_space<vmem>>, vector<1x25x32xf32>,
    %cst_19 = arith.constant 0.000000e+00 : f32
    %21 = vector.broadcast %cst_19 : f32 to vector<1x25x32xf32>
    %c17 = arith.constant 17 : index
    %c0_20 = arith.constant 0 : index
    %c0_21 = arith.constant 0 : index
    %22 = vector.load %arg13[%c17, %c0_20, %c0_21] : memref<18x25x32xf32, #tpu.memory_space<vmem>>, vector<1x25x32xf32>
    tpu.vector_store %arg13[%c17, %c0_20, %c0_21], %21 {strides = array<i32>} : memref<18x25x32xf32, #tpu.memory_space<vmem>>, vector<1x25x32xf32>,
    %23 = vector.shape_cast %14 : vector<256x32xf32> to vector<16x16x32xf32>
    %c1 = arith.constant 1 : index
    %c8 = arith.constant 8 : index
    %c0_22 = arith.constant 0 : index
    %24 = vector.load %arg13[%c1, %c8, %c0_22] : memref<18x25x32xf32, #tpu.memory_space<vmem>>, vector<16x16x32xf32>
    tpu.vector_store %arg13[%c1, %c8, %c0_22], %23 {strides = array<i32>} : memref<18x25x32xf32, #tpu.memory_space<vmem>>, vector<16x16x32xf32>,
    %c0_23 = arith.constant 0 : index
    %c0_24 = arith.constant 0 : index
    %25 = vector.load %arg4[%c0_23, %c0_24] : memref<9x32xf32, #tpu.memory_space<vmem>>, vector<9x32xf32>
    %cst_25 = arith.constant 0.000000e+00 : f32
    %26 = vector.broadcast %cst_25 : f32 to vector<16x16x32xf32>
    %c0_26 = arith.constant 0 : index
    %c7 = arith.constant 7 : index
    %c0_27 = arith.constant 0 : index
    %27 = vector.load %arg13[%c0_26, %c7, %c0_27] : memref<18x25x32xf32, #tpu.memory_space<vmem>>, vector<18x16x32xf32>
    %28 = vector.extract_strided_slice %27 {offsets = [0, 0, 0], sizes = [16, 16, 32], strides = [1, 1, 1]} : vector<18x16x32xf32> to vector<16x16x32xf32>
    %29 = vector.extract_strided_slice %25 {offsets = [0, 0], sizes = [1, 32], strides = [1, 1]} : vector<9x32xf32> to vector<1x32xf32>
    %30 = vector.shape_cast %29 : vector<1x32xf32> to vector<32xf32>
    %31 = vector.shape_cast %30 : vector<32xf32> to vector<1x1x32xf32>
    %32 = vector.broadcast %31 : vector<1x1x32xf32> to vector<16x16x32xf32>
    %33 = arith.mulf %28, %32 : vector<16x16x32xf32>
    %34 = arith.addf %26, %33 : vector<16x16x32xf32>
    %35 = vector.extract_strided_slice %27 {offsets = [1, 0, 0], sizes = [16, 16, 32], strides = [1, 1, 1]} : vector<18x16x32xf32> to vector<16x16x32xf32>
    %36 = vector.extract_strided_slice %25 {offsets = [3, 0], sizes = [1, 32], strides = [1, 1]} : vector<9x32xf32> to vector<1x32xf32>
    %37 = vector.shape_cast %36 : vector<1x32xf32> to vector<32xf32>
    %38 = vector.shape_cast %37 : vector<32xf32> to vector<1x1x32xf32>
    %39 = vector.broadcast %38 : vector<1x1x32xf32> to vector<16x16x32xf32>
    %40 = arith.mulf %35, %39 : vector<16x16x32xf32>
    %41 = arith.addf %34, %40 : vector<16x16x32xf32>
    %42 = vector.extract_strided_slice %27 {offsets = [2, 0, 0], sizes = [16, 16, 32], strides = [1, 1, 1]} : vector<18x16x32xf32> to vector<16x16x32xf32>
    %43 = vector.extract_strided_slice %25 {offsets = [6, 0], sizes = [1, 32], strides = [1, 1]} : vector<9x32xf32> to vector<1x32xf32>
    %44 = vector.shape_cast %43 : vector<1x32xf32> to vector<32xf32>
    %45 = vector.shape_cast %44 : vector<32xf32> to vector<1x1x32xf32>
    %46 = vector.broadcast %45 : vector<1x1x32xf32> to vector<16x16x32xf32>
    %47 = arith.mulf %42, %46 : vector<16x16x32xf32>
    %48 = arith.addf %41, %47 : vector<16x16x32xf32>
    %c0_28 = arith.constant 0 : index
    %c8_29 = arith.constant 8 : index
    %c0_30 = arith.constant 0 : index
    %49 = vector.load %arg13[%c0_28, %c8_29, %c0_30] : memref<18x25x32xf32, #tpu.memory_space<vmem>>, vector<18x16x32xf32>
    %50 = vector.extract_strided_slice %49 {offsets = [0, 0, 0], sizes = [16, 16, 32], strides = [1, 1, 1]} : vector<18x16x32xf32> to vector<16x16x32xf32>
    %51 = vector.extract_strided_slice %25 {offsets = [1, 0], sizes = [1, 32], strides = [1, 1]} : vector<9x32xf32> to vector<1x32xf32>
    %52 = vector.shape_cast %51 : vector<1x32xf32> to vector<32xf32>
    %53 = vector.shape_cast %52 : vector<32xf32> to vector<1x1x32xf32>
    %54 = vector.broadcast %53 : vector<1x1x32xf32> to vector<16x16x32xf32>
    %55 = arith.mulf %50, %54 : vector<16x16x32xf32>
    %56 = arith.addf %48, %55 : vector<16x16x32xf32>
    %57 = vector.extract_strided_slice %49 {offsets = [1, 0, 0], sizes = [16, 16, 32], strides = [1, 1, 1]} : vector<18x16x32xf32> to vector<16x16x32xf32>
    %58 = vector.extract_strided_slice %25 {offsets = [4, 0], sizes = [1, 32], strides = [1, 1]} : vector<9x32xf32> to vector<1x32xf32>
    %59 = vector.shape_cast %58 : vector<1x32xf32> to vector<32xf32>
    %60 = vector.shape_cast %59 : vector<32xf32> to vector<1x1x32xf32>
    %61 = vector.broadcast %60 : vector<1x1x32xf32> to vector<16x16x32xf32>
    %62 = arith.mulf %57, %61 : vector<16x16x32xf32>
    %63 = arith.addf %56, %62 : vector<16x16x32xf32>
    %64 = vector.extract_strided_slice %49 {offsets = [2, 0, 0], sizes = [16, 16, 32], strides = [1, 1, 1]} : vector<18x16x32xf32> to vector<16x16x32xf32>
    %65 = vector.extract_strided_slice %25 {offsets = [7, 0], sizes = [1, 32], strides = [1, 1]} : vector<9x32xf32> to vector<1x32xf32>
    %66 = vector.shape_cast %65 : vector<1x32xf32> to vector<32xf32>
    %67 = vector.shape_cast %66 : vector<32xf32> to vector<1x1x32xf32>
    %68 = vector.broadcast %67 : vector<1x1x32xf32> to vector<16x16x32xf32>
    %69 = arith.mulf %64, %68 : vector<16x16x32xf32>
    %70 = arith.addf %63, %69 : vector<16x16x32xf32>
    %c0_31 = arith.constant 0 : index
    %c9 = arith.constant 9 : index
    %c0_32 = arith.constant 0 : index
    %71 = vector.load %arg13[%c0_31, %c9, %c0_32] : memref<18x25x32xf32, #tpu.memory_space<vmem>>, vector<18x16x32xf32>
    %72 = vector.extract_strided_slice %71 {offsets = [0, 0, 0], sizes = [16, 16, 32], strides = [1, 1, 1]} : vector<18x16x32xf32> to vector<16x16x32xf32>
    %73 = vector.extract_strided_slice %25 {offsets = [2, 0], sizes = [1, 32], strides = [1, 1]} : vector<9x32xf32> to vector<1x32xf32>
    %74 = vector.shape_cast %73 : vector<1x32xf32> to vector<32xf32>
    %75 = vector.shape_cast %74 : vector<32xf32> to vector<1x1x32xf32>
    %76 = vector.broadcast %75 : vector<1x1x32xf32> to vector<16x16x32xf32>
    %77 = arith.mulf %72, %76 : vector<16x16x32xf32>
    %78 = arith.addf %70, %77 : vector<16x16x32xf32>
    %79 = vector.extract_strided_slice %71 {offsets = [1, 0, 0], sizes = [16, 16, 32], strides = [1, 1, 1]} : vector<18x16x32xf32> to vector<16x16x32xf32>
    %80 = vector.extract_strided_slice %25 {offsets = [5, 0], sizes = [1, 32], strides = [1, 1]} : vector<9x32xf32> to vector<1x32xf32>
    %81 = vector.shape_cast %80 : vector<1x32xf32> to vector<32xf32>
    %82 = vector.shape_cast %81 : vector<32xf32> to vector<1x1x32xf32>
    %83 = vector.broadcast %82 : vector<1x1x32xf32> to vector<16x16x32xf32>
    %84 = arith.mulf %79, %83 : vector<16x16x32xf32>
    %85 = arith.addf %78, %84 : vector<16x16x32xf32>
    %86 = vector.extract_strided_slice %71 {offsets = [2, 0, 0], sizes = [16, 16, 32], strides = [1, 1, 1]} : vector<18x16x32xf32> to vector<16x16x32xf32>
    %87 = vector.extract_strided_slice %25 {offsets = [8, 0], sizes = [1, 32], strides = [1, 1]} : vector<9x32xf32> to vector<1x32xf32>
    %88 = vector.shape_cast %87 : vector<1x32xf32> to vector<32xf32>
    %89 = vector.shape_cast %88 : vector<32xf32> to vector<1x1x32xf32>
    %90 = vector.broadcast %89 : vector<1x1x32xf32> to vector<16x16x32xf32>
    %91 = arith.mulf %86, %90 : vector<16x16x32xf32>
    %92 = arith.addf %85, %91 : vector<16x16x32xf32>
    %c0_33 = arith.constant 0 : index
    %c0_34 = arith.constant 0 : index
    %93 = vector.load %arg5[%c0_33, %c0_34] : memref<1x32xf32, #tpu.memory_space<vmem>>, vector<1x32xf32>
    %94 = vector.shape_cast %93 : vector<1x32xf32> to vector<1x1x32xf32>
    %95 = vector.broadcast %94 : vector<1x1x32xf32> to vector<16x16x32xf32>
    %96 = arith.addf %92, %95 : vector<16x16x32xf32>
    %97 = arith.negf %96 : vector<16x16x32xf32>
    %98 = math.exp %97 : vector<16x16x32xf32>
    %cst_35 = arith.constant 1.000000e+00 : f32
    %99 = vector.broadcast %cst_35 : f32 to vector<16x16x32xf32>
    %100 = arith.addf %99, %98 : vector<16x16x32xf32>
    %101 = arith.divf %99, %100 : vector<16x16x32xf32>
    %102 = arith.mulf %96, %101 : vector<16x16x32xf32>
    %103 = vector.shape_cast %102 : vector<16x16x32xf32> to vector<256x32xf32>
    %cst_36 = arith.constant dense<0.000000e+00> : vector<32xf32>
    %104 = vector.multi_reduction <add>, %103, %cst_36 [0] : vector<256x32xf32> to vector<32xf32>
    %105 = vector.shape_cast %104 : vector<32xf32> to vector<1x32xf32>
    %cst_37 = arith.constant 2.560000e+02 : f32
    %106 = vector.broadcast %cst_37 : f32 to vector<1x32xf32>
    %107 = arith.divf %105, %106 : vector<1x32xf32>
    %c0_38 = arith.constant 0 : index
    %c0_39 = arith.constant 0 : index
    %108 = vector.load %arg6[%c0_38, %c0_39] : memref<32x8xf32, #tpu.memory_space<vmem>>, vector<32x8xf32>
    %cst_40 = arith.constant dense<0.000000e+00> : vector<1x8xf32>
    %109 = tpu.matmul %107, %108, %cst_40 {dimension_numbers = #tpu.dot_dimension_numbers<[1], [0], [0], [1], [0, 0, 1, 1], [], []>} : vector<1x32xf32>, vector<32x8xf32>, vector<1x8xf32> -> vector<1x8xf32>
    %c0_41 = arith.constant 0 : index
    %c0_42 = arith.constant 0 : index
    %110 = vector.load %arg7[%c0_41, %c0_42] : memref<1x8xf32, #tpu.memory_space<vmem>>, vector<1x8xf32>
    %111 = arith.addf %109, %110 : vector<1x8xf32>
    %112 = arith.negf %111 : vector<1x8xf32>
    %113 = math.exp %112 : vector<1x8xf32>
    %cst_43 = arith.constant 1.000000e+00 : f32
    %114 = vector.broadcast %cst_43 : f32 to vector<1x8xf32>
    %115 = arith.addf %114, %113 : vector<1x8xf32>
    %116 = arith.divf %114, %115 : vector<1x8xf32>
    %117 = arith.mulf %111, %116 : vector<1x8xf32>
    %c0_44 = arith.constant 0 : index
    %c0_45 = arith.constant 0 : index
    %118 = vector.load %arg8[%c0_44, %c0_45] : memref<8x32xf32, #tpu.memory_space<vmem>>, vector<8x32xf32>
    %cst_46 = arith.constant dense<0.000000e+00> : vector<1x32xf32>
    %119 = tpu.matmul %117, %118, %cst_46 {dimension_numbers = #tpu.dot_dimension_numbers<[1], [0], [0], [1], [0, 0, 1, 1], [], []>} : vector<1x8xf32>, vector<8x32xf32>, vector<1x32xf32> -> vector<1x32xf32>
    %c0_47 = arith.constant 0 : index
    %c0_48 = arith.constant 0 : index
    %120 = vector.load %arg9[%c0_47, %c0_48] : memref<1x32xf32, #tpu.memory_space<vmem>>, vector<1x32xf32>
    %121 = arith.addf %119, %120 : vector<1x32xf32>
    %122 = arith.negf %121 : vector<1x32xf32>
    %123 = math.exp %122 : vector<1x32xf32>
    %cst_49 = arith.constant 1.000000e+00 : f32
    %124 = vector.broadcast %cst_49 : f32 to vector<1x32xf32>
    %125 = arith.addf %124, %123 : vector<1x32xf32>
    %126 = arith.divf %124, %125 : vector<1x32xf32>
    %c0_50 = arith.constant 0 : index
    %c0_51 = arith.constant 0 : index
    %127 = vector.load %arg10[%c0_50, %c0_51] : memref<128x32xf32, #tpu.memory_space<vmem>>, vector<128x32xf32>
    %128 = vector.broadcast %126 : vector<1x32xf32> to vector<128x32xf32>
    %129 = arith.mulf %127, %128 : vector<128x32xf32>
    %130 = arith.truncf %129 : vector<128x32xf32> to vector<128x32xbf16>
    %131 = arith.truncf %103 : vector<256x32xf32> to vector<256x32xbf16>
    %cst_52 = arith.constant dense<0.000000e+00> : vector<256x128xf32>
    %132 = tpu.matmul %131, %130, %cst_52 {dimension_numbers = #tpu.dot_dimension_numbers<[1], [1], [0], [0], [0, 0, 1, 0], [], []>} : vector<256x32xbf16>, vector<128x32xbf16>, vector<256x128xf32> -> vector<256x128xf32>
    %c0_53 = arith.constant 0 : index
    %c0_54 = arith.constant 0 : index
    %133 = vector.load %arg11[%c0_53, %c0_54] : memref<1x128xf32, #tpu.memory_space<vmem>>, vector<1x128xf32>
    %134 = vector.broadcast %133 : vector<1x128xf32> to vector<256x128xf32>
    %135 = arith.addf %132, %134 : vector<256x128xf32>
    %136 = arith.addf %135, %2 : vector<256x128xf32>
    %c0_55 = arith.constant 0 : index
    %c0_56 = arith.constant 0 : index
    %c0_57 = arith.constant 0 : index
    %137 = vector.load %arg12[%c0_55, %c0_56, %c0_57] : memref<1x256x128xf32, #tpu.memory_space<vmem>>, vector<1x256x128xf32>
    %138 = vector.shape_cast %137 : vector<1x256x128xf32> to vector<256x128xf32>
    %139 = vector.shape_cast %136 : vector<256x128xf32> to vector<1x256x128xf32>
    tpu.vector_store %arg12[%c0_55, %c0_56, %c0_57], %139 {strides = array<i32>} : memref<1x256x128xf32, #tpu.memory_space<vmem>>, vector<1x256x128xf32>,
    return
  }
  func.func @transform_0(%arg0: i32) -> (i32, i32, i32, i32) {
    %c0_i32 = arith.constant 0 : i32
    %c0_i32_0 = arith.constant 0 : i32
    %c0_i32_1 = arith.constant 0 : i32
    %c0_i32_2 = arith.constant 0 : i32
    return %arg0, %c0_i32, %c0_i32_0, %c0_i32_1 : i32, i32, i32, i32
  }
  func.func @transform_1(%arg0: i32) -> (i32, i32) {
    %c0_i32 = arith.constant 0 : i32
    %c0_i32_0 = arith.constant 0 : i32
    %c0_i32_1 = arith.constant 0 : i32
    return %c0_i32, %c0_i32_0 : i32, i32
  }
  func.func @transform_2(%arg0: i32) -> (i32, i32) {
    %c0_i32 = arith.constant 0 : i32
    %c0_i32_0 = arith.constant 0 : i32
    %c0_i32_1 = arith.constant 0 : i32
    return %c0_i32, %c0_i32_0 : i32, i32
  }
  func.func @transform_3(%arg0: i32) -> (i32, i32) {
    %c0_i32 = arith.constant 0 : i32
    %c0_i32_0 = arith.constant 0 : i32
    %c0_i32_1 = arith.constant 0 : i32
    return %c0_i32, %c0_i32_0 : i32, i32
  }
  func.func @transform_4(%arg0: i32) -> (i32, i32) {
    %c0_i32 = arith.constant 0 : i32
    %c0_i32_0 = arith.constant 0 : i32
    %c0_i32_1 = arith.constant 0 : i32
    return %c0_i32, %c0_i32_0 : i32, i32
  }
  func.func @transform_5(%arg0: i32) -> (i32, i32) {
    %c0_i32 = arith.constant 0 : i32
    %c0_i32_0 = arith.constant 0 : i32
    %c0_i32_1 = arith.constant 0 : i32
    return %c0_i32, %c0_i32_0 : i32, i32
  }
  func.func @transform_6(%arg0: i32) -> (i32, i32) {
    %c0_i32 = arith.constant 0 : i32
    %c0_i32_0 = arith.constant 0 : i32
    %c0_i32_1 = arith.constant 0 : i32
    return %c0_i32, %c0_i32_0 : i32, i32
  }
  func.func @transform_7(%arg0: i32) -> (i32, i32) {
    %c0_i32 = arith.constant 0 : i32
    %c0_i32_0 = arith.constant 0 : i32
    %c0_i32_1 = arith.constant 0 : i32
    return %c0_i32, %c0_i32_0 : i32, i32
  }
  func.func @transform_8(%arg0: i32) -> (i32, i32) {
    %c0_i32 = arith.constant 0 : i32
    %c0_i32_0 = arith.constant 0 : i32
    %c0_i32_1 = arith.constant 0 : i32
    return %c0_i32, %c0_i32_0 : i32, i32
  }
  func.func @transform_9(%arg0: i32) -> (i32, i32) {
    %c0_i32 = arith.constant 0 : i32
    %c0_i32_0 = arith.constant 0 : i32
    %c0_i32_1 = arith.constant 0 : i32
    return %c0_i32, %c0_i32_0 : i32, i32
  }
  func.func @transform_10(%arg0: i32) -> (i32, i32) {
    %c0_i32 = arith.constant 0 : i32
    %c0_i32_0 = arith.constant 0 : i32
    %c0_i32_1 = arith.constant 0 : i32
    return %c0_i32, %c0_i32_0 : i32, i32
  }
  func.func @transform_11(%arg0: i32) -> (i32, i32, i32) {
    %c0_i32 = arith.constant 0 : i32
    %c0_i32_0 = arith.constant 0 : i32
    %c0_i32_1 = arith.constant 0 : i32
    return %arg0, %c0_i32, %c0_i32_0 : i32, i32, i32
  }
}

</mosaic_0001>

<bundles_post_ra>
// kernel: tpu_custom_call.1
= control target key start
LH: loop header
LB: loop body
LE: loop exit
PB: predicated region body
PF: predicated region fallthrough
CT: control target
= control target key end

     0   :  { %16 = vsyncpa [#allocation4], 0  ;;  %s7478_s0 = inlined_call_operand.hbm [shape: f32[2,16,16,128], index: 0, kind: input, shape index: {}]   ;;  %s7479_s1 = inlined_call_operand.vmem [shape: bf16[128,32], index: 1, kind: input, shape index: {}]   ;;  %s7480_s2 = inlined_call_operand.vmem [shape: f32[1,32], index: 2, kind: input, shape index: {}]   ;;  %s7481_s3 = inlined_call_operand.vmem [shape: f32[9,32], index: 3, kind: input, shape index: {}]   ;;  %s7482_s4 = inlined_call_operand.vmem [shape: f32[1,32], index: 4, kind: input, shape index: {}]   ;;  %s7483_s5 = inlined_call_operand.vmem [shape: f32[32,8], index: 5, kind: input, shape index: {}]   ;;  %s7484_s6 = inlined_call_operand.vmem [shape: f32[1,8], index: 6, kind: input, shape index: {}]   ;;  %s7485_s7 = inlined_call_operand.vmem [shape: f32[8,32], index: 7, kind: input, shape index: {}]   ;;  %s7486_s8 = inlined_call_operand.vmem [shape: f32[1,32], index: 8, kind: input, shape index: {}]   ;;  %s7487_s9 = inlined_call_operand.vmem [shape: f32[128,32], index: 9, kind: input, shape index: {}]   ;;  %s7488_s10 = inlined_call_operand.vmem [shape: f32[1,128], index: 10, kind: input, shape index: {}]   ;;  %s7489_s11 = inlined_call_operand.hbm [shape: f32[2,256,128], index: 11, kind: output, shape index: {}]  }
   0x1   :  { %18 = vsyncpa [#allocation4 + $0x1], 0 }
   0x2   :  { %19 = vsyncpa [#allocation5], 0 }
   0x3   :  { %21 = vsyncpa [#allocation5 + $0x1], 0  ;;  %s3932_s17 = smov 0   ;;  %s3934_s18 = smov 0  }
   0x4   :  { %s3936_s19 = smov 0   ;;  %s3938_s20 = smov 0  }
   0x5 LB: > { %7523 = sst [smem:[#allocation9_spill]] %s3852_s17  ;;  %s3953_s21 = sadd.s32 4294967295, %s3864_s20   ;;  %s3864_s20 = sphi %s3938_s20, %s7883_s20   ;;  %s3860_s19 = sphi %s3936_s19, %s7885_s19   ;;  %s3856_s18 = sphi %s3934_s18, %s7887_s18   ;;  %s3852_s17 = sphi %s3932_s17, %s7886_s17  }
   0x6   : > { %7524 = sst [smem:[#allocation10_spill]] %s3860_s19  ;;  %s3248_s22 = sadd.s32 4294967294, %s3864_s20  }
   0x7   : > { %s3957_s23 = sadd.s32 1, %s3864_s20   ;;  %s34_s24 = sadd.s32 1, %s3860_s19 }
   0x8   : > { %7525 = sst [smem:[#allocation11_spill]] %s3957_s23  ;;  %s31_s25 = ssub.s32 %s3864_s20, %s3957_s23 }
   0x9   : > { %p41_p0 = scmp.ne.s32.totalorder %s3860_s19, %s3856_s18  ;;  %p32_p1 = scmp.eq.s32.totalorder %s31_s25, 0 }
   0xa   : > { %p42_p2 = scmp.eq.s32.totalorder %s3864_s20, 0  ;;  %p47_p3 = scmp.ne.s32.totalorder %s3856_s18, %s3852_s17 }
   0xb   : > { %p48_p4 = scmp.eq.s32.totalorder %s3953_s21, 0  ;;  %p281_p7 = scmp.eq.s32.totalorder %s3953_s21, 1 }
   0xc   : > { %s3969_s26 = scalar_select %p32_p1, %s3860_s19, %s34_s24  }
   0xd   : > { %p3971_p5 = por %p42_p2, %p41_p0  ;;  %p3975_p6 = por %p48_p4, %p47_p3 }
   0xe   : > { %7526 = sst [smem:[#allocation12_spill]] %s3969_s26  ;;  %p287_p8 = scmp.eq.s32.totalorder %s3248_s22, 1 }
   0xf   : > { %p3416_p10 = scmp.lt.s32.totalorder %s3864_s20, 2  ;;  %p3982_p11 = por %p281_p7, %p41_p0 }
  0x10   : > { %p3986_p12 = por %p287_p8, %p47_p3  ;;  %s337_s12 = sand.u32 1, %s3860_s19  }
  0x11   : > { %s3378_s13 = sshll.u32 %s3864_s20, 8  ;;  %s3251_s14 = sshll.u32 %s337_s12, 8 }
  0x12   : > { %s7530_s30 = scalar_select %p3986_p12, 1, 0 }
  0x13   : > { %s346_s24 = scalar_lea.hbm %s7478_s0, %s3378_s13  ;;  %s341_s22 = scalar_lea.vmem [#allocation3], %s3251_s14 }
  0x14   : > { %7531 = sst [smem:[#allocation13_spill]] %s7530_s30  ;;  %s347_s25 = sshll.u32 %s346_s24, 4  ;;  %s348_s25 = int_to_ptr.hbm [resolvable:$true] %s347_s25 }
  0x15   : > { %s349_s26 = sshll.u32 %s341_s22, 4  ;;  %p3997_p13 = pnand %p3416_p10, %p3971_p5  ;;  %s350_s26 = int_to_ptr.vmem [resolvable:$true] %s349_s26 }
  0x16   : > { %p3254_p0 = scmp.ge.s32.totalorder %s3864_s20, 1  ;;  %p357_p1 = scmp.lt.s32.totalorder %s3864_s20, 3 }
  0x17   : > { %s338_s19 = scalar_lea.sflag [#allocation4], %s337_s12  ;;  %s3768_s30 = sshra.s32 %s348_s25, 4  ;;  %s3769_s30 = int_to_ptr.hbm [resolvable:$true] %s3768_s30 }
  0x18   : > { %s3770_s17 = scalar_lea.hbm %s3769_s30, 256  ;;  %p3772_p3 = pneg %p3997_p13 }
  0x19   : > { %p3771_p2 = scmp.ne.s32.totalorder %s3769_s30, %s3770_s17  ;;  %s3775_s27 = scalar_lea.hbm %s7478_s0, 512 }
  0x1a   : > { %p3776_p5 = scmp.lt.s32.totalorder %s3769_s30, %s7478_s0  ;;  %p3777_p8 = scmp.lt.s32.totalorder %s3775_s27, %s3770_s17 }
  0x1b   : > { %p3773_p4 = pnand %p3772_p3, %p3771_p2 }
  0x1c   : > { %p3778_p10 = por %p3777_p8, %p3776_p5 }
  0x1d   : > { %p3774_p7 = pneg %p3773_p4 }
  0x1f   : > { %p3779_p9 = pnand %p3778_p10, %p3774_p7 }
  0x21   : > { %3782 = shalt.err (!%p3779_p9)
}
  0x22   : > { %s3866_s12 = smov 128   ;;  %s3867_s24 = smov 8  }
  0x23   : > { %3411 = dma.hbm_to_vmem [thread:$0]  (!%p3997_p13), %s348_s25, 4096, %s350_s26, %s338_s19, %s3866_s12, %s3866_s12, %s3867_s24  }
  0x24   : > { %p358_p2 = pnand %p3254_p0, %p357_p1 }
  0x26   : > { %361 = sbr.rel (%p358_p2) target bundleno = 1344 (0x540), region = 64 }
  0x2b   : > { %s4018_s22 = sand.u32 1, %s3856_s18  }
  0x2c   : > { %s3255_s17 = sshll.u32 %s4018_s22, 8  ;;  %s364_s30 = scalar_lea.sflag [#allocation4], %s4018_s22 }
  0x2d   : > { %s4024_s13 = scalar_lea.vmem [#allocation3], %s3255_s17 }
  0x2e   : > { %3843 = dma.done.wait (%p3975_p6), %s364_s30, 4096  }
  0x2f   : > { %3845 = vsyncadd (%p3975_p6), %s364_s30, 4294963200  ;;  %v3386_v0 = vld [vmem:[%s7479_s1 + $0x38] sm:$0xff]  ;;  %v3385_v1 = vld [vmem:[%s7479_s1 + $0x30] sm:$0xff]  ;;  %vm7522_vm0 = vcmask 261120   ;;  %v3868_v55 = vmov 0.0   ;;  %vm1271_vm1 = vcmask 253952  }
  0x30   : > { %523 = vmatpush.bf16.msra.mxu0 %v3386_v0  ;;  %3388 = vmatpush.bf16.msra.mxu1 %v3386_v0  ;;  %v3384_v2 = vld [vmem:[%s7479_s1 + $0x28] sm:$0xff]  ;;  %v3383_v3 = vld [vmem:[%s7479_s1 + $0x20] sm:$0xff]  ;;  %v3382_v4 = vld [vmem:[%s7479_s1 + $0x18] sm:$0xff]  ;;  %1253 = vst.msk [vmem:[#allocation2] sm:$0xff] %vm7522_vm0, %v3868_v55  ;;  %s7350_s19 = scalar_lea.vmem [#allocation6], %s3255_s17  ;;  %s3387_s17 = sshll.u32 %s3953_s21, 8 }
  0x31   : > { %v3381_v5 = vld [vmem:[%s7479_s1 + $0x10] sm:$0xff]  ;;  %v3380_v6 = vld [vmem:[%s7479_s1 + $0x8] sm:$0xff]  ;;  %v3379_v7 = vld [vmem:[%s7479_s1] sm:$0xff]  ;;  %1254 = vst.msk [vmem:[#allocation2 + $0x20] sm:$0xff] %vm7522_vm0, %v3868_v55  ;;  %s3171_s25 = scalar_lea.hbm %s7489_s11, %s3387_s17  ;;  %s3172_s14 = sshll.u32 %s7350_s19, 4  ;;  %s3173_s14 = int_to_ptr.vmem [resolvable:$true] %s3172_s14 }
  0x32   : > { %v407_v8 = vld [vmem:[%s4024_s13] sm:$0xff]  ;;  %v408_v9 = vld [vmem:[%s4024_s13 + $0x8] sm:$0xff]  ;;  %v409_v14 = vld [vmem:[%s4024_s13 + $0x10] sm:$0xff]  ;;  %1290 = vst.msk [vmem:[#allocation2] sm:$0xff] %vm7522_vm0, %v3868_v55  ;;  %s3174_s27 = sshll.u32 %s3171_s25, 4  ;;  %s3160_s28 = scalar_lea.sflag [#allocation5], %s4018_s22  ;;  %s3175_s27 = int_to_ptr.hbm [resolvable:$true] %s3174_s27 }
  0x33   : > { %v427_v10 = vld [vmem:[%s4024_s13 + $0xa0] sm:$0xff]  ;;  %v428_v11 = vld [vmem:[%s4024_s13 + $0xa8] sm:$0xff]  ;;  %v439_v12 = vpack.c.bf16 %v408_v9, %v407_v8  ;;  %v410_v15 = vld [vmem:[%s4024_s13 + $0x18] sm:$0xff]  ;;  %1291 = vst.msk [vmem:[#allocation2 + $0x8] sm:$0xff] %vm7522_vm0, %v3868_v55  ;;  %s3812_s21 = sshra.s32 %s3175_s27, 4  ;;  %s3818_s24 = scalar_lea.hbm %s7489_s11, 512  ;;  %s3813_s21 = int_to_ptr.hbm [resolvable:$true] %s3812_s21 }
  0x34   : > { %524 = vmatpush.bf16.msra.mxu0 %v3385_v1  ;;  %3389 = vmatpush.bf16.msra.mxu1 %v3385_v1  ;;  %v449_v13 = vpack.c.bf16 %v428_v11, %v427_v10  ;;  %v429_v16 = vld [vmem:[%s4024_s13 + $0xb0] sm:$0xff]  ;;  %v430_v17 = vld [vmem:[%s4024_s13 + $0xb8] sm:$0xff]  ;;  %v440_v18 = vpack.c.bf16 %v410_v15, %v409_v14  ;;  %v411_v20 = vld [vmem:[%s4024_s13 + $0x20] sm:$0xff]  ;;  %1255 = vst.msk [vmem:[#allocation2 + $0x40] sm:$0xff] %vm7522_vm0, %v3868_v55  ;;  %s3814_s15 = scalar_lea.hbm %s3813_s21, 256  ;;  %p3819_p0 = scmp.lt.s32.totalorder %s3813_s21, %s7489_s11 }
  0x35   : > { %v450_v19 = vpack.c.bf16 %v430_v17, %v429_v16  ;;  %v412_v21 = vld [vmem:[%s4024_s13 + $0x28] sm:$0xff]  ;;  %v431_v22 = vld [vmem:[%s4024_s13 + $0xc0] sm:$0xff]  ;;  %v413_v26 = vld [vmem:[%s4024_s13 + $0x30] sm:$0xff]  ;;  %1256 = vst.msk [vmem:[#allocation2 + $0x60] sm:$0xff] %vm7522_vm0, %v3868_v55  ;;  %p3815_p6 = scmp.ne.s32.totalorder %s3813_s21, %s3814_s15  ;;  %p3820_p1 = scmp.lt.s32.totalorder %s3818_s24, %s3814_s15 }
  0x36   : > { %v432_v23 = vld [vmem:[%s4024_s13 + $0xc8] sm:$0xff]  ;;  %v441_v24 = vpack.c.bf16 %v412_v21, %v411_v20  ;;  %v414_v27 = vld [vmem:[%s4024_s13 + $0x38] sm:$0xff]  ;;  %v433_v28 = vld [vmem:[%s4024_s13 + $0xd0] sm:$0xff]  ;;  %1257 = vst.msk [vmem:[#allocation2 + $0x80] sm:$0xff] %vm7522_vm0, %v3868_v55 }
  0x37   : > { %v451_v25 = vpack.c.bf16 %v432_v23, %v431_v22  ;;  %v434_v29 = vld [vmem:[%s4024_s13 + $0xd8] sm:$0xff]  ;;  %v442_v30 = vpack.c.bf16 %v414_v27, %v413_v26  ;;  %v415_v32 = vld [vmem:[%s4024_s13 + $0x40] sm:$0xff]  ;;  %v416_v33 = vld [vmem:[%s4024_s13 + $0x48] sm:$0xff]  ;;  %1258 = vst.msk [vmem:[#allocation2 + $0xa0] sm:$0xff] %vm7522_vm0, %v3868_v55  ;;  %p3816_p9 = pnand %p3815_p6, %p3982_p11  ;;  %p3821_p3 = por %p3820_p1, %p3819_p0 }
  0x38   : > { %525 = vmatpush.bf16.msra.mxu0 %v3384_v2  ;;  %3390 = vmatpush.bf16.msra.mxu1 %v3384_v2  ;;  %v452_v31 = vpack.c.bf16 %v434_v29, %v433_v28  ;;  %v435_v34 = vld [vmem:[%s4024_s13 + $0xe0] sm:$0xff]  ;;  %v436_v35 = vld [vmem:[%s4024_s13 + $0xe8] sm:$0xff]  ;;  %v443_v36 = vpack.c.bf16 %v416_v33, %v415_v32  ;;  %v417_v38 = vld [vmem:[%s4024_s13 + $0x50] sm:$0xff]  ;;  %1259 = vst.msk [vmem:[#allocation2 + $0xc0] sm:$0xff] %vm7522_vm0, %v3868_v55 }
  0x39   : > { %v453_v37 = vpack.c.bf16 %v436_v35, %v435_v34  ;;  %v418_v39 = vld [vmem:[%s4024_s13 + $0x58] sm:$0xff]  ;;  %v437_v40 = vld [vmem:[%s4024_s13 + $0xf0] sm:$0xff]  ;;  %v419_v44 = vld [vmem:[%s4024_s13 + $0x60] sm:$0xff]  ;;  %1260 = vst.msk [vmem:[#allocation2 + $0xe0] sm:$0xff] %vm7522_vm0, %v3868_v55  ;;  %p3817_p13 = pneg %p3816_p9 }
  0x3a   : > { %v438_v41 = vld [vmem:[%s4024_s13 + $0xf8] sm:$0xff]  ;;  %v444_v42 = vpack.c.bf16 %v418_v39, %v417_v38  ;;  %v420_v45 = vld [vmem:[%s4024_s13 + $0x68] sm:$0xff]  ;;  %v421_v47 = vld [vmem:[%s4024_s13 + $0x70] sm:$0xff]  ;;  %1261 = vst.msk [vmem:[#allocation2 + $0x100] sm:$0xff] %vm7522_vm0, %v3868_v55 }
  0x3b   : > { %v454_v43 = vpack.c.bf16 %v438_v41, %v437_v40  ;;  %v445_v46 = vpack.c.bf16 %v420_v45, %v419_v44  ;;  %v422_v48 = vld [vmem:[%s4024_s13 + $0x78] sm:$0xff]  ;;  %v423_v50 = vld [vmem:[%s4024_s13 + $0x80] sm:$0xff]  ;;  %v424_v51 = vld [vmem:[%s4024_s13 + $0x88] sm:$0xff]  ;;  %1262 = vst.msk [vmem:[#allocation2 + $0x120] sm:$0xff] %vm7522_vm0, %v3868_v55  ;;  %p3822_p4 = pnand %p3821_p3, %p3817_p13 }
  0x3c   : > { %526 = vmatpush.bf16.msra.mxu0 %v3383_v3  ;;  %3391 = vmatpush.bf16.msra.mxu1 %v3383_v3  ;;  %v446_v49 = vpack.c.bf16 %v422_v48, %v421_v47  ;;  %v4087_v52 = vld [vmem:[%s7480_s2] ss:$0 sm:$0xff]  ;;  %v447_v53 = vpack.c.bf16 %v424_v51, %v423_v50  ;;  %1263 = vst.msk [vmem:[#allocation2 + $0x140] sm:$0xff] %vm7522_vm0, %v3868_v55 }
  0x3d   : > { %1264 = vst.msk [vmem:[#allocation2 + $0x160] sm:$0xff] %vm7522_vm0, %v3868_v55 }
  0x3e   : > { %1265 = vst.msk [vmem:[#allocation2 + $0x180] sm:$0xff] %vm7522_vm0, %v3868_v55 }
  0x3f   : > { %1266 = vst.msk [vmem:[#allocation2 + $0x1a0] sm:$0xff] %vm7522_vm0, %v3868_v55 }
  0x40   : > { %527 = vmatpush.bf16.msra.mxu0 %v3382_v4  ;;  %3392 = vmatpush.bf16.msra.mxu1 %v3382_v4  ;;  %1267 = vst.msk [vmem:[#allocation2 + $0x1c0] sm:$0xff] %vm7522_vm0, %v3868_v55 }
  0x41   : > { %1268 = vst.msk [vmem:[#allocation2 + $0x1e0] sm:$0xff] %vm7522_vm0, %v3868_v55 }
  0x42   : > { %1269 = vst.msk [vmem:[#allocation2 + $0x200] sm:$0xff] %vm7522_vm0, %v3868_v55 }
  0x43   : > { %1270 = vst.msk [vmem:[#allocation2 + $0x220] sm:$0xff] %vm7522_vm0, %v3868_v55 }
  0x44   : > { %528 = vmatpush.bf16.msra.mxu0 %v3381_v5  ;;  %3393 = vmatpush.bf16.msra.mxu1 %v3381_v5  ;;  %v425_v5 = vld [vmem:[%s4024_s13 + $0x90] sm:$0xff]  ;;  %1292 = vst.msk [vmem:[#allocation2 + $0x10] sm:$0xff] %vm7522_vm0, %v3868_v55 }
  0x45   : > { %1296 = vst.msk [vmem:[#allocation2 + $0x228] sm:$0xff] %vm7522_vm0, %v3868_v55 }
  0x46   : > { %1297 = vst.msk [vmem:[#allocation2 + $0x230] sm:$0xff] %vm7522_vm0, %v3868_v55 }
  0x47   : > { %1295 = vst.msk [vmem:[#allocation2 + $0x220] sm:$0xff] %vm7522_vm0, %v3868_v55 }
  0x48   : > { %529 = vmatpush.bf16.msra.mxu0 %v3380_v6  ;;  %3394 = vmatpush.bf16.msra.mxu1 %v3380_v6  ;;  %v426_v6 = vld [vmem:[%s4024_s13 + $0x98] sm:$0xff]  ;;  %1273 = vst.msk [vmem:[#allocation2 + $0x38] sm:$0x1] %vm1271_vm1, %v3868_v55 }
  0x49   : > { %v448_v9 = vpack.c.bf16 %v426_v6, %v425_v5  ;;  %1272 = vst.msk [vmem:[#allocation2 + $0x18] sm:$0x1] %vm1271_vm1, %v3868_v55 }
  0x4a   : > { %1274 = vst.msk [vmem:[#allocation2 + $0x58] sm:$0x1] %vm1271_vm1, %v3868_v55 }
  0x4b   : > { %1275 = vst.msk [vmem:[#allocation2 + $0x78] sm:$0x1] %vm1271_vm1, %v3868_v55 }
  0x4c   : > { %530 = vmatpush.bf16.msra.mxu0 %v3379_v7  ;;  %3395 = vmatpush.bf16.msra.mxu1 %v3379_v7  ;;  %1276 = vst.msk [vmem:[#allocation2 + $0x98] sm:$0x1] %vm1271_vm1, %v3868_v55 }
  0x4d   : > { %1277 = vst.msk [vmem:[#allocation2 + $0xb8] sm:$0x1] %vm1271_vm1, %v3868_v55 }
  0x4e   : > { %1278 = vst.msk [vmem:[#allocation2 + $0xd8] sm:$0x1] %vm1271_vm1, %v3868_v55 }
  0x4f   : > { %531 = vmatmul.bf16.vlgmr.msra.gmra.mxu0 %v439_v12  ;;  %581 = vmatmul.bf16.vlgmr.msra.gmra.mxu1 %v449_v13  ;;  %1279 = vst.msk [vmem:[#allocation2 + $0xf8] sm:$0x1] %vm1271_vm1, %v3868_v55 }
  0x50   : > { %1280 = vst.msk [vmem:[#allocation2 + $0x118] sm:$0x1] %vm1271_vm1, %v3868_v55 }
  0x51   : > { %1281 = vst.msk [vmem:[#allocation2 + $0x138] sm:$0x1] %vm1271_vm1, %v3868_v55 }
  0x52   : > { %1282 = vst.msk [vmem:[#allocation2 + $0x158] sm:$0x1] %vm1271_vm1, %v3868_v55 }
  0x53   : > { %1283 = vst.msk [vmem:[#allocation2 + $0x178] sm:$0x1] %vm1271_vm1, %v3868_v55 }
  0x54   : > { %1284 = vst.msk [vmem:[#allocation2 + $0x198] sm:$0x1] %vm1271_vm1, %v3868_v55 }
  0x55   : > { %1285 = vst.msk [vmem:[#allocation2 + $0x1b8] sm:$0x1] %vm1271_vm1, %v3868_v55 }
  0x56   : > { %1286 = vst.msk [vmem:[#allocation2 + $0x1d8] sm:$0x1] %vm1271_vm1, %v3868_v55 }
  0x57   : > { %1287 = vst.msk [vmem:[#allocation2 + $0x1f8] sm:$0x1] %vm1271_vm1, %v3868_v55 }
  0x58   : > { %1288 = vst.msk [vmem:[#allocation2 + $0x218] sm:$0x1] %vm1271_vm1, %v3868_v55 }
  0x59   : > { %1289 = vst.msk [vmem:[#allocation2 + $0x238] sm:$0x1] %vm1271_vm1, %v3868_v55 }
  0x5a   : > { %1293 = vst.msk [vmem:[#allocation2 + $0x18] sm:$0x1] %vm1271_vm1, %v3868_v55 }
  0x5b   : > { %1298 = vst.msk [vmem:[#allocation2 + $0x238] sm:$0x1] %vm1271_vm1, %v3868_v55 }
  0x5f   : > { %536 = vmatmul.bf16.gmra.mxu0 %v440_v18  ;;  %586 = vmatmul.bf16.gmra.mxu1 %v450_v19 }
  0x6f   : > { %541 = vmatmul.bf16.gmra.mxu0 %v441_v24  ;;  %591 = vmatmul.bf16.gmra.mxu1 %v451_v25 }
  0x7f   : > { %546 = vmatmul.bf16.gmra.mxu0 %v442_v30  ;;  %596 = vmatmul.bf16.gmra.mxu1 %v452_v31 }
  0x8f   : > { %551 = vmatmul.bf16.gmra.mxu0 %v443_v36  ;;  %601 = vmatmul.bf16.gmra.mxu1 %v453_v37 }
  0x9f   : > { %556 = vmatmul.bf16.gmra.mxu0 %v444_v42  ;;  %606 = vmatmul.bf16.gmra.mxu1 %v454_v43 }
  0xaf   : > { %561 = vmatmul.bf16.gmra.mxu0 %v445_v46 }
  0xbf   : > { %566 = vmatmul.bf16.gmra.mxu0 %v446_v49 }
  0xcc   : > { %v532_v54 = vpop.f32.mrf.mxu0  ;;  %v582_v56 = vpop.f32.mrf.mxu1 }
  0xcd   : > { %v4092_v57 = vadd.f32 %v4087_v52, %v532_v54  ;;  %v4097_v58 = vadd.f32 %v4087_v52, %v582_v56 }
  0xcf   : > { %v3289_v59 = vmul.f32 -1.442695, %v4092_v57  ;;  %v3309_v60 = vmul.f32 -1.442695, %v4097_v58  ;;  %571 = vmatmul.bf16.gmra.mxu0 %v447_v53 }
  0xd1   : > { %3460 = vpow2.f32 %v3289_v59 }
  0xd2   : > { %3462 = vpow2.f32 %v3309_v60 }
  0xd4   : > { %v534_v61 = vpop.f32.mrf.mxu0  ;;  %v584_v62 = vpop.f32.mrf.mxu1 }
  0xd5   : > { %v4118_v63 = vadd.f32 %v4087_v52, %v534_v61  ;;  %v4121_v0 = vadd.f32 %v4087_v52, %v584_v62 }
  0xd7   : > { %v3461_v1 = vpop.eup %3460  ;;  %v3290_v2 = vmul.f32 -1.442695, %v4118_v63  ;;  %v3310_v8 = vmul.f32 -1.442695, %v4121_v0 }
  0xd8   : > { %v3463_v3 = vpop.eup %3462  ;;  %v4128_v4 = vadd.f32 1.0, %v3461_v1 }
  0xd9   : > { %v4136_v7 = vadd.f32 1.0, %v3463_v3  ;;  %3464 = vpow2.f32 %v3290_v2 }
  0xda   : > { %3466 = vrcp.f32 %v4128_v4  ;;  %v751_v21 = vand.u32 2147483648, %v4128_v4  ;;  %v749_v30 = vand.u32 2147483647, %v4128_v4  ;;  %vm745_vm5 = vweird.f32 %v4128_v4 }
  0xdb   : > { %3468 = vrcp.f32 %v4136_v7  ;;  %vm1045_vm2 = vweird.f32 %v4136_v7  ;;  %v1051_v25 = vand.u32 2147483648, %v4136_v7  ;;  %v1049_v27 = vand.u32 2147483647, %v4136_v7 }
  0xdc   : > { %v537_v10 = vpop.f32.mrf.mxu0  ;;  %3470 = vpow2.f32 %v3310_v8  ;;  %v587_v12 = vpop.f32.mrf.mxu1  ;;  %v752_v35 = vor.u32 1.1754944e-38, %v751_v21  ;;  %vm750_vm9 = vcmp.eq.f32.partialorder %v749_v30, 8.507059e+37 }
  0xdd   : > { %v4150_v11 = vadd.f32 %v4087_v52, %v537_v10  ;;  %v4155_v13 = vadd.f32 %v4087_v52, %v587_v12  ;;  %v1052_v37 = vor.u32 1.1754944e-38, %v1051_v25  ;;  %vm4199_vm8 = vcmp.eq.f32.partialorder %v1049_v27, 8.507059e+37 }
  0xdf   : > { %v3465_v14 = vpop.eup %3464  ;;  %v3291_v15 = vmul.f32 -1.442695, %v4150_v11  ;;  %576 = vmatmul.bf16.gmra.mxu0 %v448_v9  ;;  %v3311_v18 = vmul.f32 -1.442695, %v4155_v13 }
  0xe0   : > { %v3467_v16 = vpop.eup %3466  ;;  %v4162_v17 = vadd.f32 1.0, %v3465_v14 }
  0xe1   : > { %v3469_v19 = vpop.eup %3468  ;;  %v741_v20 = vmul.f32 %v3467_v16, %v4128_v4  ;;  %3472 = vpow2.f32 %v3291_v15  ;;  %vm746_vm4 = vweird.f32 %v3467_v16 }
  0xe2   : > { %v1041_v22 = vmul.f32 %v3469_v19, %v4136_v7  ;;  %3474 = vrcp.f32 %v4162_v17  ;;  %v3471_v23 = vpop.eup %3470  ;;  %vm1046_vm3 = vweird.f32 %v3469_v19  ;;  %vm747_vm7 = vmor %vm745_vm5, %vm746_vm4  ;;  %v764_v47 = vand.u32 2147483647, %v4162_v17 }
  0xe3   : > { %v742_v24 = vsub.f32 1.0, %v741_v20  ;;  %3476 = vpow2.f32 %v3311_v18  ;;  %v4180_v28 = vadd.f32 1.0, %v3471_v23  ;;  %vm4192_vm6 = vmor %vm1045_vm2, %vm1046_vm3  ;;  %v766_v50 = vand.u32 2147483648, %v4162_v17 }
  0xe4   : > { %v1042_v26 = vsub.f32 1.0, %v1041_v22  ;;  %v539_v31 = vpop.f32.mrf.mxu0  ;;  %v589_v38 = vpop.f32.mrf.mxu1  ;;  %vm760_vm11 = vweird.f32 %v4162_v17  ;;  %vm4238_vm12 = vcmp.eq.f32.partialorder %v764_v47, 8.507059e+37 }
  0xe5   : > { %v743_v29 = vmul.f32 %v3467_v16, %v742_v24  ;;  %3478 = vrcp.f32 %v4180_v28  ;;  %v4208_v43 = vadd.f32 %v4087_v52, %v539_v31  ;;  %v4232_v62 = vadd.f32 %v4087_v52, %v589_v38 }
  0xe6   : > { %v1043_v32 = vmul.f32 %v3469_v19, %v1042_v26  ;;  %v767_v2 = vor.u32 1.1754944e-38, %v766_v50  ;;  %v1064_v5 = vand.u32 2147483647, %v4180_v28  ;;  %vm1060_vm14 = vweird.f32 %v4180_v28 }
  0xe7   : > { %v3473_v33 = vpop.eup %3472  ;;  %v744_v34 = vadd.f32 %v3467_v16, %v743_v29  ;;  %v3292_v61 = vmul.f32 -1.442695, %v4208_v43  ;;  %v1066_v8 = vand.u32 2147483648, %v4180_v28  ;;  %v3312_v9 = vmul.f32 -1.442695, %v4232_v62 }
  0xe8   : > { %v3475_v39 = vpop.eup %3474  ;;  %v1044_v40 = vadd.f32 %v3469_v19, %v1043_v32  ;;  %v4205_v42 = vadd.f32 1.0, %v3473_v33  ;;  %vm1065_vm3 = vcmp.eq.f32.partialorder %v1064_v5, 8.507059e+37 }
  0xe9   : > { %v3477_v44 = vpop.eup %3476  ;;  %v748_v45 = vsel %vm747_vm7, %v3467_v16, %v744_v34  ;;  %v756_v46 = vmul.f32 %v3475_v39, %v4162_v17  ;;  %vm761_vm10 = vweird.f32 %v3475_v39  ;;  %v1067_v21 = vor.u32 1.1754944e-38, %v1066_v8 }
  0xea   : > { %v753_v48 = vsel %vm750_vm9, %v752_v35, %v748_v45  ;;  %v1048_v49 = vsel %vm4192_vm6, %v3469_v19, %v1044_v40  ;;  %3480 = vrcp.f32 %v4205_v42  ;;  %v4228_v60 = vadd.f32 1.0, %v3477_v44  ;;  %vm762_vm13 = vmor %vm760_vm11, %vm761_vm10 }
  0xeb   : > { %v1220_v51 = vmul.f32 %v753_v48, %v4092_v57  ;;  %v1053_v53 = vsel %vm4199_vm8, %v1052_v37, %v1048_v49  ;;  %v757_v54 = vsub.f32 1.0, %v756_v46  ;;  %v3479_v56 = vpop.eup %3478  ;;  %vm775_vm4 = vweird.f32 %v4205_v42 }
  0xec   : > { %v1240_v59 = vmul.f32 %v1053_v53, %v4097_v58  ;;  %v1056_v1 = vmul.f32 %v3479_v56, %v4180_v28  ;;  %3482 = vrcp.f32 %v4228_v60  ;;  %v542_v6 = vpop.f32.mrf.mxu0  ;;  %vm1061_vm15 = vweird.f32 %v3479_v56  ;;  %v592_v15 = vpop.f32.mrf.mxu1 }
  0xed   : > { %1300 = vst.msk [vmem:[#allocation2 + $0x28] sm:$0xff] %vm7522_vm0, %v1220_v51  ;;  %v758_v57 = vmul.f32 %v3475_v39, %v757_v54  ;;  %3484 = vpow2.f32 %v3292_v61  ;;  %v4262_v17 = vadd.f32 %v4087_v52, %v542_v6  ;;  %vm4271_vm2 = vmor %vm1060_vm14, %vm1061_vm15  ;;  %v4276_v23 = vadd.f32 %v4087_v52, %v592_v15 }
  0xee   : > { %1320 = vst.msk [vmem:[#allocation2 + $0x168] sm:$0xff] %vm7522_vm0, %v1240_v59  ;;  %v1057_v4 = vsub.f32 1.0, %v1056_v1  ;;  %3486 = vpow2.f32 %v3312_v9  ;;  %v781_v33 = vand.u32 2147483648, %v4205_v42  ;;  %v779_v37 = vand.u32 2147483647, %v4205_v42 }
  0xef   : > { %v759_v3 = vadd.f32 %v3475_v39, %v758_v57  ;;  %v3293_v25 = vmul.f32 -1.442695, %v4262_v17  ;;  %v3313_v31 = vmul.f32 -1.442695, %v4276_v23  ;;  %vm1075_vm7 = vweird.f32 %v4228_v60 }
  0xf0   : > { %v4246_v7 = vpop.eup %3480  ;;  %v1058_v12 = vmul.f32 %v3479_v56, %v1057_v4  ;;  %v1079_v40 = vand.u32 2147483647, %v4228_v60  ;;  %v782_v41 = vor.u32 1.1754944e-38, %v781_v33  ;;  %vm780_vm1 = vcmp.eq.f32.partialorder %v779_v37, 8.507059e+37 }
  0xf1   : > { %v763_v10 = vsel %vm762_vm13, %v3475_v39, %v759_v3  ;;  %v771_v14 = vmul.f32 %v4246_v7, %v4205_v42  ;;  %vm776_vm5 = vweird.f32 %v4246_v7  ;;  %3488 = vpow2.f32 %v3293_v25 }
  0xf2   : > { %v768_v16 = vsel %vm4238_vm12, %v767_v2, %v763_v10  ;;  %v1059_v19 = vadd.f32 %v3479_v56, %v1058_v12  ;;  %v3483_v24 = vpop.eup %3482  ;;  %vm777_vm6 = vmor %vm775_vm4, %vm776_vm5  ;;  %vm1080_vm10 = vcmp.eq.f32.partialorder %v1079_v40, 8.507059e+37  ;;  %v4336_v10 = vld [vmem:[%s7481_s3] sm:$0xff] }
  0xf3   : > { %v1221_v18 = vmul.f32 %v768_v16, %v4118_v63  ;;  %v772_v22 = vsub.f32 1.0, %v771_v14  ;;  %v3485_v63 = vpop.eup %3484  ;;  %v1071_v30 = vmul.f32 %v3483_v24, %v4228_v60  ;;  %vm1076_vm8 = vweird.f32 %v3483_v24 }
  0xf4   : > { %v1063_v26 = vsel %vm4271_vm2, %v3479_v56, %v1059_v19  ;;  %v3487_v27 = vpop.eup %3486  ;;  %v711_v34 = vadd.f32 1.0, %v3485_v63  ;;  %vm1077_vm9 = vmor %vm1075_vm7, %vm1076_vm8  ;;  %v4352_v63 = vperm.slane %v4336_v10, 3  ;;  %v594_v25 = vpop.f32.mrf.mxu1 }
  0xf5   : > { %1301 = vst.msk [vmem:[#allocation2 + $0x30] sm:$0xff] %vm7522_vm0, %v1221_v18  ;;  %v1068_v28 = vsel %vm1065_vm3, %v1067_v21, %v1063_v26  ;;  %v773_v29 = vmul.f32 %v4246_v7, %v772_v22  ;;  %v4297_v35 = vadd.f32 1.0, %v3487_v27  ;;  %v1072_v38 = vsub.f32 1.0, %v1071_v30  ;;  %v1334_v26 = vld [vmem:[#allocation2 + $0x7] sm:$0xff] }
  0xf6   : > { %v1241_v32 = vmul.f32 %v1068_v28, %v4121_v0  ;;  %v1081_v0 = vand.u32 2147483648, %v4228_v60  ;;  %3490 = vrcp.f32 %v711_v34  ;;  %v796_v58 = vand.u32 2147483648, %v711_v34  ;;  %v4354_v27 = vld [vmem:[#allocation2 + $0x27] sm:$0xff] }
  0xf7   : > { %v774_v36 = vadd.f32 %v4246_v7, %v773_v29  ;;  %v1073_v39 = vmul.f32 %v3483_v24, %v1072_v38  ;;  %3492 = vpow2.f32 %v3313_v31  ;;  %v3489_v46 = vpop.eup %3488  ;;  %v794_v3 = vand.u32 2147483647, %v711_v34 }
  0xf8   : > { %1321 = vst.msk [vmem:[#allocation2 + $0x170] sm:$0xff] %vm7522_vm0, %v1241_v32  ;;  %3494 = vrcp.f32 %v4297_v35  ;;  %v1082_v45 = vor.u32 1.1754944e-38, %v1081_v0  ;;  %v4315_v56 = vadd.f32 1.0, %v3489_v46  ;;  %vm1090_vm12 = vweird.f32 %v4297_v35 }
  0xf9   : > { %v778_v55 = vsel %vm777_vm6, %v4246_v7, %v774_v36  ;;  %v1074_v42 = vadd.f32 %v3483_v24, %v1073_v39  ;;  %vm790_vm14 = vweird.f32 %v711_v34  ;;  %v1094_v4 = vand.u32 2147483647, %v4297_v35 }
  0xfa   : > { %v783_v44 = vsel %vm780_vm1, %v782_v41, %v778_v55  ;;  %3496 = vrcp.f32 %v4315_v56  ;;  %v797_v7 = vor.u32 1.1754944e-38, %v796_v58  ;;  %vm795_vm3 = vcmp.eq.f32.partialorder %v794_v3, 8.507059e+37  ;;  %v1565_v55 = vld [vmem:[#allocation2 + $0x8] sm:$0xff] }
  0xfb   : > { %v1222_v47 = vmul.f32 %v783_v44, %v4150_v11  ;;  %v1078_v49 = vsel %vm1077_vm9, %v3483_v24, %v1074_v42  ;;  %v544_v11 = vpop.f32.mrf.mxu0  ;;  %vm1095_vm4 = vcmp.eq.f32.partialorder %v1094_v4, 8.507059e+37  ;;  %v4349_v24 = vperm.slane %v4336_v10, 0 }
  0xfc   : > { %v3491_v48 = vpop.eup %3490  ;;  %v1083_v54 = vsel %vm1080_vm10, %v1082_v45, %v1078_v49  ;;  %v4344_v21 = vadd.f32 %v4087_v52, %v544_v11  ;;  %v4358_v29 = vperm.slane %v4336_v10, 6  ;;  %v1436_v37 = vmul.f32 %v4352_v63, %v4354_v27  ;;  %v4407_v58 = vld [vmem:[#allocation2 + $0x2f] sm:$0xff] }
  0xfd   : > { %v3493_v50 = vpop.eup %3492  ;;  %1302 = vst.msk [vmem:[#allocation2 + $0x48] sm:$0xff] %vm7522_vm0, %v1222_v47  ;;  %v786_v51 = vmul.f32 %v3491_v48, %v711_v34  ;;  %v1242_v59 = vmul.f32 %v1083_v54, %v4155_v13  ;;  %vm791_vm11 = vweird.f32 %v3491_v48  ;;  %v1096_v13 = vand.u32 2147483648, %v4297_v35 }
  0xfe   : > { %v3495_v53 = vpop.eup %3494  ;;  %v4319_v57 = vadd.f32 1.0, %v3493_v50  ;;  %vm792_vm15 = vmor %vm790_vm14, %vm791_vm11  ;;  %v3294_v34 = vmul.f32 -1.442695, %v4344_v21  ;;  %v1371_v36 = vmul.f32 %v4349_v24, %v1334_v26  ;;  %v4380_v39 = vperm.slane %v4336_v10, 1 }
  0xff   : > { %v787_v60 = vsub.f32 1.0, %v786_v51  ;;  %v1086_v61 = vmul.f32 %v3495_v53, %v4297_v35  ;;  %1322 = vst.msk [vmem:[#allocation2 + $0x188] sm:$0xff] %vm7522_vm0, %v1242_v59  ;;  %vm1091_vm13 = vweird.f32 %v3495_v53  ;;  %v1097_v15 = vor.u32 1.1754944e-38, %v1096_v13 }
 0x100   : > { %3498 = vrcp.f32 %v4319_v57  ;;  %vm4327_vm2 = vmor %vm1090_vm12, %vm1091_vm13  ;;  %v4331_v9 = vpop.eup %3496  ;;  %v4367_v35 = vadd.f32 %v4087_v52, %v594_v25  ;;  %v1468_v44 = vadd.f32 %v1436_v37, %v1371_v36  ;;  %v1602_v46 = vmul.f32 %v4380_v39, %v1565_v55 }
 0x101   : > { %v788_v1 = vmul.f32 %v3491_v48, %v787_v60  ;;  %v1087_v2 = vsub.f32 1.0, %v1086_v61  ;;  %v801_v18 = vmul.f32 %v4331_v9, %v4315_v56  ;;  %3500 = vpow2.f32 %v3294_v34  ;;  %v4405_v61 = vld [vmem:[#allocation2 + $0x28] sm:$0xff] }
 0x102   : > { %v3314_v41 = vmul.f32 -1.442695, %v4367_v35  ;;  %vm806_vm5 = vweird.f32 %v4331_v9  ;;  %vm805_vm6 = vweird.f32 %v4315_v56  ;;  %v811_v47 = vand.u32 2147483648, %v4315_v56 }
 0x103   : > { %v789_v5 = vadd.f32 %v3491_v48, %v788_v1  ;;  %v1088_v6 = vmul.f32 %v3495_v53, %v1087_v2  ;;  %v547_v28 = vpop.f32.mrf.mxu0  ;;  %v802_v31 = vsub.f32 1.0, %v801_v18  ;;  %v809_v49 = vand.u32 2147483647, %v4315_v56  ;;  %vm4392_vm8 = vmor %vm805_vm6, %vm806_vm5  ;;  %v1335_v1 = vld [vmem:[#allocation2 + $0xf] sm:$0xff] }
 0x104   : > { %v4361_v32 = vld [vmem:[#allocation2 + $0x47] sm:$0xff]  ;;  %v4375_v38 = vadd.f32 %v4087_v52, %v547_v28  ;;  %vm1105_vm7 = vweird.f32 %v4319_v57  ;;  %v1111_v50 = vand.u32 2147483648, %v4319_v57  ;;  %v1109_v54 = vand.u32 2147483647, %v4319_v57 }
 0x105   : > { %v793_v12 = vsel %vm792_vm15, %v3491_v48, %v789_v5  ;;  %v1089_v14 = vadd.f32 %v3495_v53, %v1088_v6  ;;  %v1501_v0 = vmul.f32 %v4358_v29, %v4361_v32  ;;  %3502 = vpow2.f32 %v3314_v41 }
 0x106   : > { %v798_v16 = vsel %vm795_vm3, %v797_v7, %v793_v12  ;;  %v4346_v22 = vpop.eup %3498  ;;  %v3295_v45 = vmul.f32 -1.442695, %v4375_v38  ;;  %v4400_v59 = vperm.slane %v4336_v10, 4  ;;  %v812_v11 = vor.u32 1.1754944e-38, %v811_v47 }
 0x107   : > { %v1223_v19 = vmul.f32 %v798_v16, %v4208_v43  ;;  %v1093_v20 = vsel %vm4327_vm2, %v3495_v53, %v1089_v14  ;;  %v1101_v33 = vmul.f32 %v4346_v22, %v4319_v57  ;;  %v1533_v48 = vadd.f32 %v1501_v0, %v1468_v44  ;;  %v3501_v60 = vpop.eup %3500  ;;  %v4429_v16 = vld [vmem:[#allocation2 + $0x48] sm:$0xff] }
 0x108   : > { %v1098_v43 = vsel %vm1095_vm4, %v1097_v15, %v1093_v20  ;;  %vm1106_vm1 = vweird.f32 %v4346_v22  ;;  %7545 = vst [vmem:[#allocation14_spill] sm:$0xff] %v4400_v59  ;;  %3504 = vpow2.f32 %v3295_v45  ;;  %vm810_vm9 = vcmp.eq.f32.partialorder %v809_v49, 8.507059e+37 }
 0x109   : > { %1303 = vst.msk [vmem:[#allocation2 + $0x50] sm:$0xff] %vm7522_vm0, %v1223_v19  ;;  %v1243_v30 = vmul.f32 %v1098_v43, %v4232_v62  ;;  %v803_v62 = vmul.f32 %v4331_v9, %v802_v31  ;;  %v1102_v40 = vsub.f32 1.0, %v1101_v33  ;;  %v1634_v2 = vadd.f32 %v1602_v46, %v1533_v48  ;;  %vm4411_vm10 = vmor %vm1105_vm7, %vm1106_vm1  ;;  %v1566_v31 = vld [vmem:[#allocation2 + $0x10] sm:$0xff] }
 0x10a   : > { %v1112_v13 = vor.u32 1.1754944e-38, %v1111_v50  ;;  %vm1110_vm11 = vcmp.eq.f32.partialorder %v1109_v54, 8.507059e+37  ;;  %v1667_v6 = vmul.f32 %v4400_v59, %v4405_v61  ;;  %v4419_v7 = vperm.slane %v4336_v10, 7 }
 0x10b   : > { %1323 = vst.msk [vmem:[#allocation2 + $0x190] sm:$0xff] %vm7522_vm0, %v1243_v30  ;;  %v804_v42 = vadd.f32 %v4331_v9, %v803_v62  ;;  %v1103_v53 = vmul.f32 %v4346_v22, %v1102_v40  ;;  %v4424_v57 = vadd.f32 1.0, %v3501_v60  ;;  %v3503_v12 = vpop.eup %3502  ;;  %v1372_v14 = vmul.f32 %v4349_v24, %v1335_v1  ;;  %v4455_v40 = vld [vmem:[#allocation2 + $0x29] sm:$0xff]  ;;  %v549_v60 = vpop.f32.mrf.mxu0 }
 0x10c   : > { %v1437_v15 = vmul.f32 %v4352_v63, %v4407_v58  ;;  %v1699_v20 = vadd.f32 %v1667_v6, %v1634_v2  ;;  %v4439_v28 = vperm.slane %v4336_v10, 2  ;;  %v1732_v30 = vmul.f32 %v4419_v7, %v4429_v16  ;;  %v1797_v2 = vld [vmem:[#allocation2 + $0x11] sm:$0xff]  ;;  %v1356_v6 = vld [vmem:[#allocation2 + $0x167] sm:$0xff] }
 0x10d   : > { %v808_v56 = vsel %vm4392_vm8, %v4331_v9, %v804_v42  ;;  %v1104_v5 = vadd.f32 %v4346_v22, %v1103_v53  ;;  %3506 = vrcp.f32 %v4424_v57  ;;  %v1603_v0 = vmul.f32 %v4380_v39, %v1566_v31  ;;  %v4461_v42 = vld [vmem:[#allocation2 + $0x30] sm:$0xff] }
 0x10e   : > { %v813_v4 = vsel %vm810_vm9, %v812_v11, %v808_v56  ;;  %v3505_v19 = vpop.eup %3504  ;;  %7548 = vst [vmem:[#allocation15_spill] sm:$0xff] %v4439_v28  ;;  %v1469_v33 = vadd.f32 %v1437_v15, %v1372_v14  ;;  %v1764_v36 = vadd.f32 %v1732_v30, %v1699_v20  ;;  %v4452_v55 = vperm.slane %v4336_v10, 5  ;;  %v4468_v10 = vld [vmem:[%s7481_s3 + $0x8] ss:$0 sm:$0xff] }
 0x10f   : > { %v1224_v9 = vmul.f32 %v813_v4, %v4262_v17  ;;  %v1108_v18 = vsel %vm4411_vm10, %v4346_v22, %v1104_v5  ;;  %v1796_v17 = vld [vmem:[#allocation2 + $0x9] sm:$0xff]  ;;  %v4444_v22 = vadd.f32 1.0, %v3503_v12  ;;  %v4447_v34 = vadd.f32 1.0, %v3505_v19  ;;  %v4503_v19 = vld [vmem:[#allocation2 + $0x31] sm:$0xff] }
 0x110   : > { %v4421_v8 = vld [vmem:[#allocation2 + $0x4f] sm:$0xff]  ;;  %v1113_v25 = vsel %vm1110_vm11, %v1112_v13, %v1108_v18  ;;  %v1833_v37 = vmul.f32 %v4439_v28, %v1796_v17  ;;  %v1898_v47 = vmul.f32 %v4452_v55, %v4455_v40  ;;  %v1668_v48 = vmul.f32 %v4400_v59, %v4461_v42 }
 0x111   : > { %1304 = vst.msk [vmem:[#allocation2 + $0x68] sm:$0xff] %vm7522_vm0, %v1224_v9  ;;  %v1502_v26 = vmul.f32 %v4358_v29, %v4421_v8  ;;  %v1244_v43 = vmul.f32 %v1113_v25, %v4276_v23  ;;  %v597_v23 = vpop.f32.mrf.mxu1  ;;  %3508 = vrcp.f32 %v4444_v22  ;;  %v4472_v49 = vld [vmem:[#allocation2 + $0x50] sm:$0xff]  ;;  %v4484_v3 = vmul.f32 %v4349_v24, %v4354_v27  ;;  %v4508_v25 = vld [vmem:[%s7482_s4] ss:$0 sm:$0xff] }
 0x112   : > { %3510 = vrcp.f32 %v4447_v34  ;;  %v4459_v41 = vadd.f32 %v4087_v52, %v597_v23  ;;  %v1865_v45 = vadd.f32 %v1833_v37, %v1764_v36  ;;  %v4474_v50 = vld [vmem:[#allocation2 + $0x49] sm:$0xff]  ;;  %v4488_v13 = vmul.f32 %v4380_v39, %v4405_v61 }
 0x113   : > { %1324 = vst.msk [vmem:[#allocation2 + $0x1a8] sm:$0xff] %vm7522_vm0, %v1244_v43  ;;  %v1534_v62 = vadd.f32 %v1502_v26, %v1469_v33  ;;  %v3507_v44 = vpop.eup %3506  ;;  %v1733_v4 = vmul.f32 %v4419_v7, %v4472_v49  ;;  %v1963_v5 = vmul.f32 %v4468_v10, %v4474_v50  ;;  %v4497_v14 = vadd.f32 %v4087_v52, %v549_v60  ;;  %v1587_v60 = vld [vmem:[#allocation2 + $0x168] sm:$0xff] }
 0x114   : > { %v816_v51 = vmul.f32 %v3507_v44, %v4424_v57  ;;  %v3315_v53 = vmul.f32 -1.442695, %v4459_v41  ;;  %v1930_v56 = vadd.f32 %v1898_v47, %v1865_v45  ;;  %v1834_v27 = vmul.f32 %v4439_v28, %v1797_v2 }
 0x115   : > { %v1635_v46 = vadd.f32 %v1603_v0, %v1534_v62  ;;  %v826_v61 = vand.u32 2147483648, %v4424_v57  ;;  %vm821_vm12 = vweird.f32 %v3507_v44  ;;  %v824_v26 = vand.u32 2147483647, %v4424_v57 }
 0x116   : > { %v817_v9 = vsub.f32 1.0, %v816_v51  ;;  %3512 = vpow2.f32 %v3315_v53  ;;  %v1995_v15 = vadd.f32 %v1963_v5, %v1930_v56  ;;  %v4512_v43 = vmul.f32 %v4349_v24, %v1356_v6 }
 0x117   : > { %v4478_v54 = vpop.eup %3508  ;;  %v1700_v1 = vadd.f32 %v1668_v48, %v1635_v46  ;;  %vm820_vm13 = vweird.f32 %v4424_v57  ;;  %v1124_v31 = vand.u32 2147483647, %v4444_v22  ;;  %v1126_v36 = vand.u32 2147483648, %v4444_v22 }
 0x118   : > { %v4480_v11 = vpop.eup %3510  ;;  %v1116_v12 = vmul.f32 %v4478_v54, %v4444_v22  ;;  %v818_v17 = vmul.f32 %v3507_v44, %v817_v9  ;;  %v3296_v23 = vmul.f32 -1.442695, %v4497_v14  ;;  %v1899_v62 = vmul.f32 %v4452_v55, %v4503_v19  ;;  %vm822_vm14 = vmor %vm820_vm13, %vm821_vm12 }
 0x119   : > { %v831_v18 = vmul.f32 %v4480_v11, %v4447_v34  ;;  %v1765_v20 = vadd.f32 %v1733_v4, %v1700_v1  ;;  %v827_v0 = vor.u32 1.1754944e-38, %v826_v61  ;;  %vm1120_vm15 = vweird.f32 %v4444_v22  ;;  %v4537_v4 = vld [vmem:[#allocation2 + $0x51] sm:$0xff] }
 0x11a   : > { %v1117_v30 = vsub.f32 1.0, %v1116_v12  ;;  %v819_v33 = vadd.f32 %v3507_v44, %v818_v17  ;;  %vm1121_vm2 = vweird.f32 %v4478_v54  ;;  %v4523_v46 = vadd.f32 %v4508_v25, %v1995_v15 }
 0x11b   : > { %v832_v37 = vsub.f32 1.0, %v831_v18  ;;  %v1866_v57 = vadd.f32 %v1834_v27, %v1765_v20  ;;  %vm825_vm3 = vcmp.eq.f32.partialorder %v824_v26, 8.507059e+37  ;;  %vm4526_vm4 = vcmp.eq.f32.partialorder %v1124_v31, 8.507059e+37  ;;  %vm4532_vm5 = vmor %vm1120_vm15, %vm1121_vm2  ;;  %v599_v26 = vpop.f32.mrf.mxu1 }
 0x11c   : > { %v3513_v45 = vpop.eup %3512  ;;  %v823_v47 = vsel %vm822_vm14, %v3507_v44, %v819_v33  ;;  %v1118_v51 = vmul.f32 %v4478_v54, %v1117_v30  ;;  %v841_v56 = vand.u32 2147483648, %v4447_v34  ;;  %v1127_v2 = vor.u32 1.1754944e-38, %v1126_v36  ;;  %v1357_v36 = vld [vmem:[#allocation2 + $0x16f] sm:$0xff] }
 0x11d   : > { %v828_v48 = vsel %vm825_vm3, %v827_v0, %v823_v47  ;;  %v833_v44 = vmul.f32 %v4480_v11, %v832_v37  ;;  %3514 = vpow2.f32 %v3296_v23  ;;  %vm836_vm6 = vweird.f32 %v4480_v11 }
 0x11e   : > { %v1225_v22 = vmul.f32 %v828_v48, %v4344_v21  ;;  %v1119_v5 = vadd.f32 %v4478_v54, %v1118_v51  ;;  %v839_v9 = vand.u32 2147483647, %v4447_v34  ;;  %v4542_v12 = vadd.f32 1.0, %v3513_v45 }
 0x11f   : > { %v4545_v21 = vmul.f32 %v4352_v63, %v1356_v6  ;;  %v1931_v27 = vadd.f32 %v1899_v62, %v1866_v57  ;;  %v3321_v15 = vmul.f32 -1.442695, %v4523_v46  ;;  %v834_v61 = vadd.f32 %v4480_v11, %v833_v44  ;;  %v4572_v62 = vld [vmem:[#allocation2 + $0x67] sm:$0xff] }
 0x120   : > { %1305 = vst.msk [vmem:[#allocation2 + $0x70] sm:$0xff] %vm7522_vm0, %v1225_v22  ;;  %v4551_v18 = vmul.f32 %v4358_v29, %v1356_v6  ;;  %v4554_v20 = vmul.f32 %v4380_v39, %v1587_v60  ;;  %v1123_v17 = vsel %vm4532_vm5, %v4478_v54, %v1119_v5  ;;  %vm835_vm7 = vweird.f32 %v4447_v34  ;;  %v1819_v22 = vld [vmem:[#allocation2 + $0x171] sm:$0xff] }
 0x121   : > { %7553 = vst [vmem:[#allocation16_spill] sm:$0xff] %v4545_v21  ;;  %v4561_v30 = vmul.f32 %v4400_v59, %v1587_v60  ;;  %v1964_v31 = vmul.f32 %v4468_v10, %v4537_v4  ;;  %v1128_v6 = vsel %vm4526_vm4, %v1127_v2, %v1123_v17  ;;  %vm837_vm8 = vmor %vm835_vm7, %vm836_vm6  ;;  %v842_v33 = vor.u32 1.1754944e-38, %v841_v56 }
 0x122   : > { %7554 = vst [vmem:[#allocation17_spill] sm:$0xff] %v4551_v18  ;;  %v1245_v37 = vmul.f32 %v1128_v6, %v4367_v35  ;;  %v838_v54 = vsel %vm837_vm8, %v4480_v11, %v834_v61  ;;  %vm840_vm1 = vcmp.eq.f32.partialorder %v839_v9, 8.507059e+37  ;;  %3516 = vrcp.f32 %v4542_v12  ;;  %v1588_v11 = vld [vmem:[#allocation2 + $0x170] sm:$0xff] }
 0x123   : > { %7555 = vst [vmem:[#allocation18_spill] sm:$0xff] %v4561_v30  ;;  %v3515_v34 = vpop.eup %3514  ;;  %v1996_v23 = vadd.f32 %v1964_v31, %v1931_v27  ;;  %3518 = vpow2.f32 %v3321_v15  ;;  %v843_v0 = vsel %vm840_vm1, %v842_v33, %v838_v54  ;;  %v4575_v45 = vadd.f32 %v4087_v52, %v599_v26  ;;  %v1590_v30 = vld [vmem:[#allocation2 + $0x190] sm:$0xff] }
 0x124   : > { %v4578_v57 = vmul.f32 %v4419_v7, %v1587_v60  ;;  %v4582_v35 = vmul.f32 %v4349_v24, %v4407_v58  ;;  %v1438_v47 = vmul.f32 %v4352_v63, %v4361_v32  ;;  %1325 = vst.msk [vmem:[#allocation2 + $0x1b0] sm:$0xff] %vm7522_vm0, %v1245_v37  ;;  %v1226_v48 = vmul.f32 %v843_v0, %v4375_v38  ;;  %v1818_v60 = vld [vmem:[#allocation2 + $0x169] sm:$0xff] }
 0x125   : > { %v4590_v51 = vmul.f32 %v4380_v39, %v4461_v42  ;;  %v4594_v53 = vmul.f32 %v4439_v28, %v4455_v40  ;;  %v4598_v58 = vmul.f32 %v4439_v28, %v4503_v19  ;;  %v4601_v56 = vmul.f32 %v4349_v24, %v1357_v36  ;;  %v1358_v42 = vld [vmem:[#allocation2 + $0x187] sm:$0xff] }
 0x126   : > { %7556 = vst [vmem:[#allocation19_spill] sm:$0xff] %v4578_v57  ;;  %v4604_v1 = vmul.f32 %v4352_v63, %v1357_v36  ;;  %v4607_v38 = vmul.f32 %v4358_v29, %v1357_v36  ;;  %v1503_v40 = vmul.f32 %v4358_v29, %v4572_v62  ;;  %v4612_v2 = vadd.f32 1.0, %v3515_v34  ;;  %v1820_v18 = vld [vmem:[#allocation2 + $0x189] sm:$0xff] }
 0x127   : > { %1306 = vst.msk [vmem:[#allocation2 + $0x88] sm:$0xff] %vm7522_vm0, %v1226_v48  ;;  %v4615_v19 = vmul.f32 %v4380_v39, %v1588_v11  ;;  %v4618_v44 = vmul.f32 %v4400_v59, %v1588_v11  ;;  %v4621_v5 = vadd.f32 %v4508_v25, %v1996_v23  ;;  %v3316_v9 = vmul.f32 -1.442695, %v4575_v45 }
 0x128   : > { %7557 = vst [vmem:[#allocation20_spill] sm:$0xff] %v4604_v1  ;;  %v4624_v27 = vpop.eup %3516  ;;  %v4627_v15 = vmul.f32 %v4419_v7, %v1588_v11  ;;  %v4630_v61 = vmul.f32 %v4439_v28, %v1818_v60  ;;  %v4633_v17 = vmul.f32 %v4439_v28, %v1819_v22  ;;  %v1470_v26 = vadd.f32 %v1438_v47, %v4484_v3  ;;  %v1589_v3 = vld [vmem:[#allocation2 + $0x188] sm:$0xff] }
 0x129   : > { %7558 = vst [vmem:[#allocation21_spill] sm:$0xff] %v4607_v38  ;;  %v3519_v31 = vpop.eup %3518  ;;  %v4637_v6 = vmul.f32 %v4452_v55, %v1818_v60  ;;  %v4640_v33 = vmul.f32 %v4452_v55, %v1819_v22  ;;  %v4643_v36 = vmul.f32 %v4468_v10, %v1818_v60  ;;  %v1458_v37 = vmul.f32 %v4352_v63, %v1358_v42 }
 0x12a   : > { %7559 = vst [vmem:[#allocation22_spill] sm:$0xff] %v4615_v19  ;;  %v4647_v54 = vmul.f32 %v4468_v10, %v1819_v22  ;;  %v4651_v34 = vmul.f32 %v4349_v24, %v4361_v32  ;;  %v1535_v23 = vadd.f32 %v1503_v40, %v1470_v26  ;;  %3520 = vrcp.f32 %v4612_v2 }
 0x12b   : > { %7560 = vst [vmem:[#allocation23_spill] sm:$0xff] %v4618_v44  ;;  %v4656_v0 = vmul.f32 %v4380_v39, %v4429_v16  ;;  %v3322_v11 = vmul.f32 -1.442695, %v4621_v5  ;;  %v1131_v47 = vmul.f32 %v4624_v27, %v4542_v12  ;;  %3522 = vpow2.f32 %v3316_v9 }
 0x12c   : > { %7561 = vst [vmem:[#allocation24_spill] sm:$0xff] %v4627_v15  ;;  %v1669_v48 = vmul.f32 %v4400_v59, %v4429_v16  ;;  %v4664_v32 = vmul.f32 %v4349_v24, %v1358_v42  ;;  %v4667_v60 = vmul.f32 %v4358_v29, %v1358_v42  ;;  %v4669_v22 = vadd.f32 1.0, %v3519_v31  ;;  %v4683_v16 = vld [vmem:[#allocation2 + $0x6f] sm:$0xff] }
 0x12d   : > { %7562 = vst [vmem:[#allocation25_spill] sm:$0xff] %v4630_v61  ;;  %v4672_v40 = vadd.f32 %v1458_v37, %v4512_v43  ;;  %v4675_v26 = vmul.f32 %v4380_v39, %v1589_v3  ;;  %v4681_v9 = vmul.f32 %v4419_v7, %v1589_v3  ;;  %v4687_v42 = vmul.f32 %v4349_v24, %v4421_v8 }
 0x12e   : > { %7563 = vst [vmem:[#allocation26_spill] sm:$0xff] %v4633_v17  ;;  %v1439_v43 = vmul.f32 %v4352_v63, %v4421_v8  ;;  %v4693_v31 = vmul.f32 %v4380_v39, %v4472_v49  ;;  %v1636_v37 = vadd.f32 %v4488_v13, %v1535_v23  ;;  %3524 = vpow2.f32 %v3322_v11  ;;  %v4707_v8 = vld [vmem:[#allocation2 + $0x68] sm:$0xff] }
 0x12f   : > { %7564 = vst [vmem:[#allocation27_spill] sm:$0xff] %v4637_v6  ;;  %v1132_v6 = vsub.f32 1.0, %v1131_v47  ;;  %3526 = vrcp.f32 %v4669_v22  ;;  %v1504_v61 = vmul.f32 %v4358_v29, %v4683_v16  ;;  %v1141_v13 = vand.u32 2147483648, %v4542_v12 }
 0x130   : > { %7565 = vst [vmem:[#allocation28_spill] sm:$0xff] %v4640_v33  ;;  %v4678_v33 = vmul.f32 %v4400_v59, %v1589_v3  ;;  %v4698_v3 = vmul.f32 %v4400_v59, %v4472_v49  ;;  %v4704_v17 = vpop.eup %3520  ;;  %v4717_v44 = vmul.f32 %v4439_v28, %v4537_v4  ;;  %vm1135_vm9 = vweird.f32 %v4542_v12 }
 0x131   : > { %7566 = vst [vmem:[#allocation29_spill] sm:$0xff] %v4643_v36  ;;  %v4702_v36 = vmul.f32 %v4439_v28, %v4474_v50  ;;  %v3523_v23 = vpop.eup %3522  ;;  %vm1136_vm10 = vweird.f32 %v4624_v27  ;;  %v1139_v11 = vand.u32 2147483647, %v4542_v12  ;;  %v1471_v47 = vadd.f32 %v1439_v43, %v4582_v35 }
 0x132   : > { %7567 = vst [vmem:[#allocation30_spill] sm:$0xff] %v4647_v54  ;;  %v552_v54 = vpop.f32.mrf.mxu0  ;;  %v4725_v15 = vmul.f32 %v4452_v55, %v4474_v50  ;;  %v1734_v1 = vmul.f32 %v4419_v7, %v4707_v8  ;;  %v1133_v12 = vmul.f32 %v4624_v27, %v1132_v6  ;;  %v846_v35 = vmul.f32 %v4704_v17, %v4612_v2  ;;  %vm4739_vm11 = vmor %vm1135_vm9, %vm1136_vm10 }
 0x133   : > { %7568 = vst [vmem:[#allocation31_spill] sm:$0xff] %v4667_v60  ;;  %v4713_v49 = vadd.f32 %v4087_v52, %v552_v54  ;;  %v4729_v52 = vmul.f32 %v4452_v55, %v4537_v4  ;;  %v1359_v54 = vld [vmem:[#allocation2 + $0x18f] sm:$0xff]  ;;  %v1536_v50 = vadd.f32 %v1504_v61, %v1471_v47  ;;  %v1142_v4 = vor.u32 1.1754944e-38, %v1141_v13 }
 0x134   : > { %7569 = vst [vmem:[#allocation32_spill] sm:$0xff] %v4675_v26  ;;  %v4732_v57 = vmul.f32 %v4349_v24, %v1359_v54  ;;  %v4743_v38 = vadd.f32 1.0, %v3523_v23  ;;  %v1459_v60 = vmul.f32 %v4352_v63, %v1359_v54  ;;  %v1134_v21 = vadd.f32 %v4624_v27, %v1133_v12  ;;  %v602_v26 = vpop.f32.mrf.mxu1 }
 0x135   : > { %7570 = vst [vmem:[#allocation33_spill] sm:$0xff] %v4681_v9  ;;  %v1701_v9 = vadd.f32 %v1669_v48, %v1636_v37  ;;  %v3297_v48 = vmul.f32 -1.442695, %v4713_v49  ;;  %v3525_v37 = vpop.eup %3524  ;;  %vm1140_vm12 = vcmp.eq.f32.partialorder %v1139_v11, 8.507059e+37  ;;  %v847_v6 = vsub.f32 1.0, %v846_v35 }
 0x136   : > { %7571 = vst [vmem:[#allocation34_spill] sm:$0xff] %v4717_v44  ;;  %v4748_v44 = vpop.eup %3526  ;;  %v4751_v61 = vmul.f32 %v4400_v59, %v1590_v30  ;;  %v4754_v13 = vmul.f32 %v4439_v28, %v1820_v18  ;;  %3528 = vrcp.f32 %v4743_v38  ;;  %v1138_v47 = vsel %vm4739_vm11, %v4624_v27, %v1134_v21 }
 0x137   : > { %7572 = vst [vmem:[#allocation35_spill] sm:$0xff] %v4732_v57  ;;  %v1766_v23 = vadd.f32 %v1734_v1, %v1701_v9  ;;  %v848_v12 = vmul.f32 %v4704_v17, %v847_v6  ;;  %v854_v11 = vand.u32 2147483647, %v4612_v2  ;;  %v856_v35 = vand.u32 2147483648, %v4612_v2  ;;  %v1821_v57 = vld [vmem:[#allocation2 + $0x191] sm:$0xff] }
 0x138   : > { %7575 = vst [vmem:[#allocation36_spill] sm:$0xff] %v4751_v61  ;;  %v1637_v19 = vadd.f32 %v4590_v51, %v1536_v50  ;;  %v1143_v61 = vsel %vm1140_vm12, %v1142_v4, %v1138_v47  ;;  %vm851_vm13 = vweird.f32 %v4704_v17  ;;  %3530 = vpow2.f32 %v3297_v48  ;;  %v4788_v48 = vld [vmem:[#allocation2 + $0x70] sm:$0xff] }
 0x139   : > { %7576 = vst [vmem:[#allocation37_spill] sm:$0xff] %v4754_v13  ;;  %v4765_v1 = vadd.f32 1.0, %v3525_v37  ;;  %v2192_v9 = vmul.f32 %v4748_v44, %v4669_v22  ;;  %v1246_v21 = vmul.f32 %v1143_v61, %v4459_v41  ;;  %v849_v27 = vadd.f32 %v4704_v17, %v848_v12  ;;  %v1360_v37 = vld [vmem:[#allocation2 + $0x1a7] sm:$0xff] }
 0x13a   : > { %v4772_v43 = vadd.f32 %v1459_v60, %v4601_v56  ;;  %v4775_v6 = vmul.f32 %v4380_v39, %v1590_v30  ;;  %v4778_v51 = vmul.f32 %v4452_v55, %v1820_v18  ;;  %vm850_vm14 = vweird.f32 %v4612_v2 }
 0x13b   : > { %v4782_v50 = vmul.f32 %v4358_v29, %v1359_v54  ;;  %v4785_v4 = vmul.f32 %v4452_v55, %v1821_v57  ;;  %v1867_v41 = vadd.f32 %v4594_v53, %v1766_v23  ;;  %1326 = vst.msk [vmem:[#allocation2 + $0x1c8] sm:$0xff] %vm7522_vm0, %v1246_v21  ;;  %vm852_vm15 = vmor %vm850_vm14, %vm851_vm13  ;;  %v857_v56 = vor.u32 1.1754944e-38, %v856_v35  ;;  %v4800_v53 = vld [vmem:[%s7480_s2] ss:$0 sm:$0xff] }
 0x13c   : > { %7577 = vst [vmem:[#allocation38_spill] sm:$0xff] %v4775_v6  ;;  %v4793_v60 = vpop.eup %3528  ;;  %v1702_v2 = vadd.f32 %v4698_v3, %v1637_v19  ;;  %v853_v54 = vsel %vm852_vm15, %v4704_v17, %v849_v27  ;;  %vm855_vm2 = vcmp.eq.f32.partialorder %v854_v11, 8.507059e+37  ;;  %v4803_v61 = vadd.f32 %v4800_v53, %v602_v26  ;;  %v554_v11 = vpop.f32.mrf.mxu0 }
 0x13d   : > { %7578 = vst [vmem:[#allocation39_spill] sm:$0xff] %v4778_v51  ;;  %v2193_v23 = vsub.f32 1.0, %v2192_v9  ;;  %3532 = vrcp.f32 %v4765_v1  ;;  %v858_v47 = vsel %vm855_vm2, %v857_v56, %v853_v54  ;;  %v1146_v12 = vmul.f32 %v4793_v60, %v4743_v38  ;;  %v604_v56 = vpop.f32.mrf.mxu1 }
 0x13e   : > { %7579 = vst [vmem:[#allocation40_spill] sm:$0xff] %v4782_v50  ;;  %v3531_v35 = vpop.eup %3530  ;;  %v4809_v19 = vmul.f32 %v4419_v7, %v1590_v30  ;;  %v4812_v17 = vmul.f32 %v4468_v10, %v1820_v18  ;;  %v1735_v3 = vmul.f32 %v4419_v7, %v4788_v48  ;;  %v1227_v26 = vmul.f32 %v858_v47, %v4497_v14  ;;  %v4827_v18 = vld [vmem:[#allocation2 + $0x69] sm:$0xff] }
 0x13f   : > { %7580 = vst [vmem:[#allocation41_spill] sm:$0xff] %v4785_v4  ;;  %v4818_v9 = vmul.f32 %v4468_v10, %v1821_v57  ;;  %v4822_v21 = vmul.f32 %v4349_v24, %v4572_v62  ;;  %v1440_v30 = vmul.f32 %v4352_v63, %v4572_v62  ;;  %v1523_v27 = vmul.f32 %v4358_v29, %v1360_v37 }
 0x140   : > { %7581 = vst [vmem:[#allocation42_spill] sm:$0xff] %v4809_v19  ;;  %v4831_v54 = vmul.f32 %v4380_v39, %v4707_v8  ;;  %v1767_v14 = vadd.f32 %v1735_v3, %v1702_v2  ;;  %v1932_v57 = vadd.f32 %v4725_v15, %v1867_v41  ;;  %v3317_v47 = vmul.f32 -1.442695, %v4803_v61 }
 0x141   : > { %7582 = vst [vmem:[#allocation43_spill] sm:$0xff] %v4812_v17  ;;  %v1147_v17 = vsub.f32 1.0, %v1146_v12  ;;  %v4837_v62 = vadd.f32 1.0, %v3531_v35  ;;  %v4840_v4 = vadd.f32 %v4800_v53, %v554_v11  ;;  %vm2196_vm3 = vweird.f32 %v4669_v22 }
 0x142   : > { %7583 = vst [vmem:[#allocation44_spill] sm:$0xff] %v4818_v9  ;;  %v2194_v9 = vmul.f32 %v4748_v44, %v2193_v23  ;;  %v4845_v51 = vmul.f32 %v4400_v59, %v4707_v8  ;;  %v1965_v15 = vmul.f32 %v4468_v10, %v4827_v18  ;;  %v4850_v41 = vadd.f32 %v4800_v53, %v604_v56 }
 0x143   : > { %7584 = vst [vmem:[#allocation45_spill] sm:$0xff] %v4831_v54  ;;  %v4852_v2 = vpop.eup %3532  ;;  %v2200_v23 = vand.u32 2147483647, %v4669_v22  ;;  %v2202_v12 = vand.u32 2147483648, %v4669_v22  ;;  %v4857_v35 = vadd.f32 %v1440_v30, %v4651_v34  ;;  %v1555_v3 = vadd.f32 %v1523_v27, %v4672_v40 }
 0x144   : > { %1307 = vst.msk [vmem:[#allocation2 + $0x90] sm:$0xff] %vm7522_vm0, %v1227_v26  ;;  %vm2197_vm4 = vweird.f32 %v4748_v44  ;;  %v1868_v8 = vadd.f32 %v4598_v58, %v1767_v14  ;;  %v1997_v26 = vadd.f32 %v1965_v15, %v1932_v57  ;;  %3534 = vpow2.f32 %v3317_v47  ;;  %v4874_v14 = vld [vmem:[#allocation2 + $0x71] sm:$0xff]  ;;  %v1591_v47 = vld [vmem:[#allocation2 + $0x1a8] sm:$0xff] }
 0x145   : > { %v2195_v11 = vadd.f32 %v4748_v44, %v2194_v9  ;;  %v1148_v56 = vmul.f32 %v4793_v60, %v1147_v17  ;;  %3536 = vrcp.f32 %v4837_v62  ;;  %v3298_v13 = vmul.f32 -1.442695, %v4840_v4  ;;  %vm4883_vm7 = vmor %vm2196_vm3, %vm2197_vm4 }
 0x146   : > { %v2207_v34 = vmul.f32 %v4852_v2, %v4765_v1  ;;  %v4869_v30 = vmul.f32 %v4349_v24, %v1360_v37  ;;  %v1156_v40 = vand.u32 2147483648, %v4743_v38  ;;  %v3318_v58 = vmul.f32 -1.442695, %v4850_v41 }
 0x147   : > { %v1656_v27 = vadd.f32 %v4554_v20, %v1555_v3  ;;  %vm1150_vm5 = vweird.f32 %v4743_v38  ;;  %vm1151_vm6 = vweird.f32 %v4793_v60  ;;  %v1154_v17 = vand.u32 2147483647, %v4743_v38 }
 0x148   : > { %vm4887_vm8 = vcmp.eq.f32.partialorder %v2200_v23, 8.507059e+37  ;;  %v1460_v20 = vmul.f32 %v4352_v63, %v1360_v37  ;;  %v1933_v15 = vadd.f32 %v4729_v52, %v1868_v8  ;;  %v4894_v3 = vadd.f32 %v4508_v25, %v1997_v26  ;;  %v4902_v37 = vld [vmem:[#allocation2 + $0x87] sm:$0xff]  ;;  %vm4908_vm1 = vmor %vm1150_vm5, %vm1151_vm6 }
 0x149   : > { %v2199_v22 = vsel %vm4883_vm7, %v4748_v44, %v2195_v11  ;;  %v2203_v19 = vor.u32 1.1754944e-38, %v2202_v12  ;;  %v1149_v50 = vadd.f32 %v4793_v60, %v1148_v56  ;;  %3538 = vpow2.f32 %v3298_v13 }
 0x14a   : > { %v3535_v23 = vpop.eup %3534  ;;  %v2208_v6 = vsub.f32 1.0, %v2207_v34  ;;  %v1966_v54 = vmul.f32 %v4468_v10, %v4874_v14  ;;  %v1157_v44 = vor.u32 1.1754944e-38, %v1156_v40  ;;  %3540 = vpow2.f32 %v3318_v58 }
 0x14b   : > { %v3537_v12 = vpop.eup %3536  ;;  %v4913_v13 = vmul.f32 %v4380_v39, %v1591_v47  ;;  %v1721_v8 = vadd.f32 %v4678_v33, %v1656_v27  ;;  %v1754_v26 = vmul.f32 %v4419_v7, %v1591_v47  ;;  %vm1155_vm9 = vcmp.eq.f32.partialorder %v1154_v17, 8.507059e+37 }
 0x14c   : > { %v4918_v11 = vadd.f32 %v1460_v20, %v4664_v32  ;;  %v4921_v38 = vmul.f32 %v4400_v59, %v1591_v47  ;;  %v1998_v56 = vadd.f32 %v1966_v54, %v1933_v15  ;;  %v3323_v34 = vmul.f32 -1.442695, %v4894_v3 }
 0x14d   : > { %7591 = vst [vmem:[#allocation46_spill] sm:$0xff] %v4913_v13  ;;  %v2204_v40 = vsel %vm4887_vm8, %v2203_v19, %v2199_v22  ;;  %v1505_v58 = vmul.f32 %v4358_v29, %v4902_v37  ;;  %v1153_v33 = vsel %vm4908_vm1, %v4793_v60, %v1149_v50  ;;  %v4931_v27 = vadd.f32 1.0, %v3535_v23 }
 0x14e   : > { %7592 = vst [vmem:[#allocation47_spill] sm:$0xff] %v4921_v38  ;;  %v2209_v32 = vmul.f32 %v4852_v2, %v2208_v6  ;;  %vm2211_vm10 = vweird.f32 %v4765_v1  ;;  %v1158_v17 = vsel %vm1155_vm9, %v1157_v44, %v1153_v33  ;;  %v861_v54 = vmul.f32 %v3537_v12, %v4837_v62 }
 0x14f   : > { %v3539_v9 = vpop.eup %3538  ;;  %v2215_v57 = vand.u32 2147483647, %v4765_v1  ;;  %v2217_v19 = vand.u32 2147483648, %v4765_v1  ;;  %v4938_v20 = vadd.f32 %v1754_v26, %v1721_v8  ;;  %v1247_v47 = vmul.f32 %v1158_v17, %v4575_v45 }
 0x150   : > { %v3541_v15 = vpop.eup %3540  ;;  %v4942_v50 = vmul.f32 %v2204_v40, %v4523_v46  ;;  %v4945_v6 = vadd.f32 %v4508_v25, %v1998_v56  ;;  %3542 = vpow2.f32 %v3323_v34  ;;  %v862_v60 = vsub.f32 1.0, %v861_v54 }
 0x151   : > { %7593 = vst [vmem:[#allocation48_spill] sm:$0xff] %v4938_v20  ;;  %vm2212_vm11 = vweird.f32 %v4852_v2  ;;  %v1537_v22 = vadd.f32 %v1505_v58, %v4857_v35  ;;  %v871_v23 = vand.u32 2147483648, %v4837_v62  ;;  %3544 = vrcp.f32 %v4931_v27 }
 0x152   : > { %7594 = vst [vmem:[#allocation49_spill] sm:$0xff] %v4942_v50  ;;  %v2210_v45 = vadd.f32 %v4852_v2, %v2209_v32  ;;  %v863_v52 = vmul.f32 %v3537_v12, %v862_v60  ;;  %vm866_vm12 = vweird.f32 %v3537_v12  ;;  %v869_v46 = vand.u32 2147483647, %v4837_v62  ;;  %vm4964_vm14 = vmor %vm2211_vm10, %vm2212_vm11 }
 0x153   : > { %1327 = vst.msk [vmem:[#allocation2 + $0x1d0] sm:$0xff] %vm7522_vm0, %v1247_v47  ;;  %vm4954_vm13 = vcmp.eq.f32.partialorder %v2215_v57, 8.507059e+37  ;;  %v2218_v8 = vor.u32 1.1754944e-38, %v2217_v19  ;;  %v4958_v26 = vadd.f32 1.0, %v3539_v9  ;;  %v4960_v35 = vadd.f32 1.0, %v3541_v15 }
 0x154   : > { %v4970_v34 = vsel %vm7522_vm0, %v4942_v50, 0.0  ;;  %v3324_v40 = vmul.f32 -1.442695, %v4945_v6  ;;  %v864_v58 = vadd.f32 %v3537_v12, %v863_v52  ;;  %vm865_vm15 = vweird.f32 %v4837_v62 }
 0x155   : > { %v4976_v33 = vmul.f32 %v4349_v24, %v4683_v16  ;;  %v1638_v32 = vadd.f32 %v4656_v0, %v1537_v22  ;;  %vm867_vm2 = vmor %vm865_vm15, %vm866_vm12  ;;  %v872_v1 = vor.u32 1.1754944e-38, %v871_v23  ;;  %3546 = vrcp.f32 %v4958_v26 }
 0x156   : > { %v3543_v17 = vpop.eup %3542  ;;  %v2214_v54 = vsel %vm4964_vm14, %v4852_v2, %v2210_v45  ;;  %v1441_v9 = vmul.f32 %v4352_v63, %v4683_v16  ;;  %v868_v57 = vsel %vm867_vm2, %v3537_v12, %v864_v58  ;;  %vm870_vm3 = vcmp.eq.f32.partialorder %v869_v46, 8.507059e+37  ;;  %v4998_v16 = vld [vmem:[#allocation2 + $0x88] sm:$0xff] }
 0x157   : > { %v3545_v62 = vpop.eup %3544  ;;  %v4987_v19 = vmul.f32 %v4380_v39, %v4788_v48  ;;  %v4991_v0 = vmul.f32 %v4400_v59, %v4788_v48  ;;  %v873_v47 = vsel %vm870_vm3, %v872_v1, %v868_v57  ;;  %3548 = vrcp.f32 %v4960_v35  ;;  %v5008_v45 = vld [vmem:[#allocation2 + $0x8f] sm:$0xff] }
 0x158   : > { %v4996_v2 = vmul.f32 %v4439_v28, %v4827_v18  ;;  %3550 = vpow2.f32 %v3324_v40  ;;  %v1228_v12 = vmul.f32 %v873_v47, %v4713_v49  ;;  %v1161_v15 = vmul.f32 %v3545_v62, %v4931_v27  ;;  %v557_v40 = vpop.f32.mrf.mxu0  ;;  %v1361_v1 = vld [vmem:[#allocation2 + $0x1af] sm:$0xff]  ;;  %v607_v47 = vpop.f32.mrf.mxu1 }
 0x159   : > { %v2219_v60 = vsel %vm4954_vm13, %v2218_v8, %v2214_v54  ;;  %v5004_v22 = vadd.f32 1.0, %v3543_v17  ;;  %v1703_v48 = vadd.f32 %v4845_v51, %v1638_v32  ;;  %v1171_v23 = vand.u32 2147483648, %v4931_v27 }
 0x15a   : > { %1308 = vst.msk [vmem:[#allocation2 + $0xa8] sm:$0xff] %vm7522_vm0, %v1228_v12  ;;  %v1162_v52 = vsub.f32 1.0, %v1161_v15  ;;  %vm1165_vm4 = vweird.f32 %v4931_v27  ;;  %vm1166_vm5 = vweird.f32 %v3545_v62  ;;  %v1169_v49 = vand.u32 2147483647, %v4931_v27 }
 0x15b   : > { %v5013_v46 = vpop.eup %3546  ;;  %v1473_v44 = vadd.f32 %v1441_v9, %v4687_v42  ;;  %v5018_v8 = vmul.f32 %v4439_v28, %v4874_v14  ;;  %v1902_v51 = vmul.f32 %v4452_v55, %v4827_v18  ;;  %v1736_v56 = vmul.f32 %v4419_v7, %v4998_v16  ;;  %v5036_v18 = vld [vmem:[#allocation2 + $0x1b0] sm:$0xff]  ;;  %vm5043_vm6 = vmor %vm1165_vm4, %vm1166_vm5 }
 0x15c   : > { %v5025_v58 = vmul.f32 %v2219_v60, %v4621_v5  ;;  %v5029_v32 = vmul.f32 %v4452_v55, %v4874_v14  ;;  %v1163_v42 = vmul.f32 %v3545_v62, %v1162_v52  ;;  %v876_v17 = vmul.f32 %v5013_v46, %v4958_v26 }
 0x15d   : > { %v5033_v54 = vpop.eup %3548  ;;  %3552 = vrcp.f32 %v5004_v22  ;;  %v1768_v9 = vadd.f32 %v1736_v56, %v1703_v48  ;;  %v1506_v5 = vmul.f32 %v4358_v29, %v5008_v45  ;;  %v1172_v57 = vor.u32 1.1754944e-38, %v1171_v23 }
 0x15e   : > { %7599 = vst [vmem:[#allocation50_spill] sm:$0xff] %v5025_v58  ;;  %v3551_v12 = vpop.eup %3550  ;;  %v1164_v15 = vadd.f32 %v3545_v62, %v1163_v42  ;;  %vm1170_vm7 = vcmp.eq.f32.partialorder %v1169_v49, 8.507059e+37  ;;  %v877_v60 = vsub.f32 1.0, %v876_v17  ;;  %v1176_v52 = vmul.f32 %v5033_v54, %v4960_v35 }
 0x15f   : > { %v5050_v48 = vmul.f32 %v4349_v24, %v1361_v1  ;;  %v5053_v56 = vmul.f32 %v4352_v63, %v1361_v1  ;;  %v1524_v27 = vmul.f32 %v4358_v29, %v1361_v1  ;;  %v5057_v50 = vadd.f32 %v4800_v53, %v557_v40 }
 0x160   : > { %v2704_v23 = vsel %vm7522_vm0, %v5025_v58, 0.0  ;;  %v5063_v49 = vmul.f32 %v4400_v59, %v5036_v18  ;;  %v5067_v42 = vmul.f32 %v4419_v7, %v5036_v18  ;;  %v1168_v17 = vsel %vm5043_vm6, %v3545_v62, %v1164_v15 }
 0x161   : > { %7602 = vst [vmem:[#allocation51_spill] sm:$0xff] %v5050_v48  ;;  %v5071_v20 = vadd.f32 1.0, %v3551_v12  ;;  %v1869_v1 = vadd.f32 %v4702_v36, %v1768_v9  ;;  %v1538_v40 = vadd.f32 %v1506_v5, %v1473_v44  ;;  %v1173_v38 = vsel %vm1170_vm7, %v1172_v57, %v1168_v17 }
 0x162   : > { %7603 = vst [vmem:[#allocation52_spill] sm:$0xff] %v5063_v49  ;;  %v878_v13 = vmul.f32 %v5013_v46, %v877_v60  ;;  %vm881_vm8 = vweird.f32 %v5013_v46  ;;  %v886_v58 = vand.u32 2147483648, %v4958_v26  ;;  %v1177_v49 = vsub.f32 1.0, %v1176_v52  ;;  %v5111_v60 = vld [vmem:[#allocation2 + $0x90] sm:$0xff] }
 0x163   : > { %v5077_v48 = vpop.eup %3552  ;;  %v1248_v28 = vmul.f32 %v1173_v38, %v4803_v61  ;;  %v1186_v14 = vand.u32 2147483648, %v4960_v35  ;;  %v3299_v62 = vmul.f32 -1.442695, %v5057_v50  ;;  %v5083_v12 = vadd.f32 %v4800_v53, %v607_v47  ;;  %v559_v38 = vpop.f32.mrf.mxu0  ;;  %v5113_v52 = vld [vmem:[#allocation2 + $0x89] sm:$0xff] }
 0x164   : > { %v884_v36 = vand.u32 2147483647, %v4958_v26  ;;  %vm1180_vm1 = vweird.f32 %v4960_v35  ;;  %vm1181_vm9 = vweird.f32 %v5033_v54  ;;  %v1184_v44 = vand.u32 2147483647, %v4960_v35 }
 0x165   : > { %v1556_v9 = vadd.f32 %v1524_v27, %v4772_v43  ;;  %v1639_v5 = vadd.f32 %v4693_v31, %v1538_v40  ;;  %v1934_v61 = vadd.f32 %v1902_v51, %v1869_v1  ;;  %1328 = vst.msk [vmem:[#allocation2 + $0x1e8] sm:$0xff] %vm7522_vm0, %v1248_v28  ;;  %vm880_vm10 = vweird.f32 %v4958_v26  ;;  %vm5106_vm12 = vmor %vm1180_vm1, %vm1181_vm9  ;;  %v7608_v1 = vld [vmem:[#allocation22_spill] sm:$0xff] }
 0x166   : > { %v2222_v57 = vmul.f32 %v5077_v48, %v5004_v22  ;;  %3554 = vrcp.f32 %v5071_v20  ;;  %v879_v47 = vadd.f32 %v5013_v46, %v878_v13  ;;  %vm5099_vm11 = vmor %vm880_vm10, %vm881_vm8  ;;  %v1178_v31 = vmul.f32 %v5033_v54, %v1177_v49  ;;  %v609_v13 = vpop.f32.mrf.mxu1 }
 0x167   : > { %v887_v43 = vor.u32 1.1754944e-38, %v886_v58  ;;  %v1187_v26 = vor.u32 1.1754944e-38, %v1186_v14  ;;  %3556 = vpow2.f32 %v3299_v62  ;;  %v3319_v51 = vmul.f32 -1.442695, %v5083_v12 }
 0x168   : > { %v883_v27 = vsel %vm5099_vm11, %v5013_v46, %v879_v47  ;;  %vm885_vm13 = vcmp.eq.f32.partialorder %v884_v36, 8.507059e+37  ;;  %v1179_v35 = vadd.f32 %v5033_v54, %v1178_v31  ;;  %vm1185_vm14 = vcmp.eq.f32.partialorder %v1184_v44, 8.507059e+37  ;;  %v1822_v36 = vld [vmem:[#allocation2 + $0x1a9] sm:$0xff] }
 0x169   : > { %v1704_v58 = vadd.f32 %v4991_v0, %v1639_v5  ;;  %v888_v49 = vsel %vm885_vm13, %v887_v43, %v883_v27  ;;  %3558 = vpow2.f32 %v3319_v51  ;;  %v5121_v17 = vadd.f32 %v4800_v53, %v559_v38  ;;  %v7609_v47 = vld [vmem:[#allocation35_spill] sm:$0xff] }
 0x16a   : > { %v1657_v40 = vadd.f32 %v7608_v1, %v1556_v9  ;;  %v1229_v14 = vmul.f32 %v888_v49, %v4840_v4  ;;  %v1183_v62 = vsel %vm5106_vm12, %v5033_v54, %v1179_v35  ;;  %v5129_v46 = vadd.f32 %v4800_v53, %v609_v13  ;;  %v5173_v49 = vld [vmem:[#allocation2 + $0xa7] sm:$0xff] }
 0x16b   : > { %v1442_v0 = vmul.f32 %v4352_v63, %v4902_v37  ;;  %v1737_v44 = vmul.f32 %v4419_v7, %v5111_v60  ;;  %v1967_v5 = vmul.f32 %v4468_v10, %v5113_v52  ;;  %v1188_v9 = vsel %vm1185_vm14, %v1187_v26, %v1183_v62  ;;  %v562_v1 = vpop.f32.mrf.mxu0  ;;  %v7614_v62 = vld [vmem:[#allocation34_spill] sm:$0xff] }
 0x16c   : > { %v5137_v38 = vpop.eup %3554  ;;  %v5140_v4 = vadd.f32 %v2704_v23, %v4970_v34  ;;  %v2223_v54 = vsub.f32 1.0, %v2222_v57  ;;  %v5144_v15 = vadd.f32 %v5053_v56, %v7609_v47  ;;  %v5148_v31 = vmul.f32 %v4380_v39, %v5036_v18  ;;  %1309 = vst.msk [vmem:[#allocation2 + $0xb0] sm:$0xff] %vm7522_vm0, %v1229_v14  ;;  %v7612_v34 = vld [vmem:[#allocation36_spill] sm:$0xff]  ;;  %v1362_v14 = vld [vmem:[#allocation2 + $0x1c7] sm:$0xff] }
 0x16d   : > { %v3557_v43 = vpop.eup %3556  ;;  %v1769_v28 = vadd.f32 %v1737_v44, %v1704_v58  ;;  %v1999_v51 = vadd.f32 %v1967_v5, %v1934_v61  ;;  %v1249_v26 = vmul.f32 %v1188_v9, %v4850_v41  ;;  %v3300_v13 = vmul.f32 -1.442695, %v5121_v17 }
 0x16e   : > { %7610 = vst [vmem:[#allocation22_spill] sm:$0xff] %v5144_v15  ;;  %v1722_v23 = vadd.f32 %v7612_v34, %v1657_v40  ;;  %v5155_v57 = vmul.f32 %v4468_v10, %v1822_v36  ;;  %v5157_v56 = vadd.f32 1.0, %v3557_v43  ;;  %v3320_v27 = vmul.f32 -1.442695, %v5129_v46 }
 0x16f   : > { %7611 = vst [vmem:[#allocation35_spill] sm:$0xff] %v5148_v31  ;;  %v3559_v18 = vpop.eup %3558  ;;  %v5162_v35 = vmul.f32 %v4349_v24, %v4902_v37  ;;  %v1474_v61 = vadd.f32 %v1442_v0, %v4822_v21  ;;  %v5167_v41 = vmul.f32 %v4380_v39, %v4998_v16  ;;  %v5171_v58 = vmul.f32 %v4400_v59, %v4998_v16 }
 0x170   : > { %7613 = vst [vmem:[#allocation36_spill] sm:$0xff] %v5155_v57  ;;  %v2224_v40 = vmul.f32 %v5077_v48, %v2223_v54  ;;  %v2232_v37 = vand.u32 2147483648, %v5004_v22  ;;  %v2237_v21 = vmul.f32 %v5137_v38, %v5071_v20  ;;  %3560 = vrcp.f32 %v5157_v56 }
 0x171   : > { %1329 = vst.msk [vmem:[#allocation2 + $0x1f0] sm:$0xff] %vm7522_vm0, %v1249_v26  ;;  %v1870_v36 = vadd.f32 %v7614_v62, %v1769_v28  ;;  %v5183_v16 = vadd.f32 %v4508_v25, %v1999_v51  ;;  %v5185_v0 = vadd.f32 1.0, %v3559_v18  ;;  %3562 = vpow2.f32 %v3300_v13  ;;  %v1593_v28 = vld [vmem:[#allocation2 + $0x1c8] sm:$0xff]  ;;  %v5203_v26 = vld [vmem:[#allocation2 + $0x91] sm:$0xff] }
 0x172   : > { %v5188_v44 = vadd.f32 %v5067_v42, %v1722_v23  ;;  %v1462_v5 = vmul.f32 %v4352_v63, %v1362_v14  ;;  %v1507_v9 = vmul.f32 %v4358_v29, %v5173_v49  ;;  %3564 = vpow2.f32 %v3320_v27 }
 0x173   : > { %7615 = vst [vmem:[#allocation34_spill] sm:$0xff] %v5183_v16  ;;  %vm2226_vm15 = vweird.f32 %v5004_v22  ;;  %v2230_v54 = vand.u32 2147483647, %v5004_v22  ;;  %v2247_v47 = vand.u32 2147483648, %v5071_v20  ;;  %3566 = vrcp.f32 %v5185_v0 }
 0x174   : > { %7616 = vst [vmem:[#allocation53_spill] sm:$0xff] %v5188_v44  ;;  %v5198_v43 = vadd.f32 %v5077_v48, %v2224_v40  ;;  %vm2227_vm2 = vweird.f32 %v5077_v48  ;;  %v2238_v42 = vsub.f32 1.0, %v2237_v21  ;;  %v1443_v51 = vmul.f32 %v4352_v63, %v5008_v45 }
 0x175   : > { %v5205_v13 = vor.u32 1.1754944e-38, %v2232_v37  ;;  %v5208_v34 = vmul.f32 %v4349_v24, %v1362_v14  ;;  %v1935_v23 = vadd.f32 %v5029_v32, %v1870_v36  ;;  %v3325_v27 = vmul.f32 -1.442695, %v5183_v16  ;;  %v5221_v37 = vld [vmem:[#allocation2 + $0xaf] sm:$0xff]  ;;  %vm5227_vm3 = vmor %vm2226_vm15, %vm2227_vm2 }
 0x176   : > { %v5212_v18 = vpop.eup %3560  ;;  %v2245_v40 = vand.u32 2147483647, %v5071_v20  ;;  %v5216_v21 = vadd.f32 %v1462_v5, %v4869_v30  ;;  %v5219_v62 = vmul.f32 %v4358_v29, %v1362_v14  ;;  %v1539_v57 = vadd.f32 %v1507_v9, %v1474_v61 }
 0x177   : > { %7617 = vst [vmem:[#allocation54_spill] sm:$0xff] %v5208_v34  ;;  %v3563_v44 = vpop.eup %3562  ;;  %v5231_v36 = vor.u32 1.1754944e-38, %v2247_v47  ;;  %v5234_v30 = vmul.f32 %v4400_v59, %v1593_v28  ;;  %v5237_v14 = vmul.f32 %v4419_v7, %v1593_v28  ;;  %v1968_v61 = vmul.f32 %v4468_v10, %v5203_v26  ;;  %v5326_v28 = vld [vmem:[#allocation2 + $0xb0] sm:$0xff] }
 0x178   : > { %7618 = vst [vmem:[#allocation55_spill] sm:$0xff] %v5216_v21  ;;  %v3565_v5 = vpop.eup %3564  ;;  %v2229_v22 = vsel %vm5227_vm3, %v5077_v48, %v5198_v43  ;;  %v2239_v9 = vmul.f32 %v5137_v38, %v2238_v42  ;;  %v1475_v47 = vadd.f32 %v1443_v51, %v4976_v33  ;;  %v5249_v31 = vmul.f32 %v4400_v59, %v5111_v60  ;;  %v564_v33 = vpop.f32.mrf.mxu0  ;;  %v7625_v42 = vld [vmem:[#allocation45_spill] sm:$0xff] }
 0x179   : > { %7621 = vst [vmem:[#allocation56_spill] sm:$0xff] %v5234_v30  ;;  %v3567_v30 = vpop.eup %3566  ;;  %vm5251_vm4 = vcmp.eq.f32.partialorder %v2230_v54, 8.507059e+37  ;;  %vm2242_vm5 = vweird.f32 %v5137_v38  ;;  %v2000_v10 = vadd.f32 %v1968_v61, %v1935_v23  ;;  %3568 = vpow2.f32 %v3325_v27 }
 0x17a   : > { %7622 = vst [vmem:[#allocation57_spill] sm:$0xff] %v5237_v14  ;;  %v1508_v48 = vmul.f32 %v4358_v29, %v5221_v37  ;;  %v891_v43 = vmul.f32 %v5212_v18, %v5157_v56  ;;  %v1640_v51 = vadd.f32 %v7625_v42, %v1539_v57  ;;  %v901_v32 = vand.u32 2147483648, %v5157_v56 }
 0x17b   : > { %v1191_v54 = vmul.f32 %v3567_v30, %v5185_v0  ;;  %v5264_v14 = vadd.f32 %v4800_v53, %v562_v1  ;;  %vm2241_vm6 = vweird.f32 %v5071_v20  ;;  %vm1195_vm7 = vweird.f32 %v5185_v0 }
 0x17c   : > { %v892_v23 = vsub.f32 1.0, %v891_v43  ;;  %vm1196_vm8 = vweird.f32 %v3567_v30  ;;  %v1201_v27 = vand.u32 2147483648, %v5185_v0  ;;  %v1199_v34 = vand.u32 2147483647, %v5185_v0  ;;  %vm5319_vm15 = vmor %vm2241_vm6, %vm2242_vm5 }
 0x17d   : > { %v1192_v61 = vsub.f32 1.0, %v1191_v54  ;;  %v5270_v21 = vadd.f32 1.0, %v3563_v44  ;;  %v5272_v57 = vadd.f32 1.0, %v3565_v5  ;;  %v1540_v42 = vadd.f32 %v1508_v48, %v1475_v47  ;;  %v5286_v5 = vld [vmem:[#allocation2 + $0xa8] sm:$0xff]  ;;  %vm5293_vm11 = vmor %vm1195_vm7, %vm1196_vm8 }
 0x17e   : > { %v893_v16 = vmul.f32 %v5212_v18, %v892_v23  ;;  %vm896_vm1 = vweird.f32 %v5212_v18  ;;  %v899_v1 = vand.u32 2147483647, %v5157_v56  ;;  %v5278_v43 = vadd.f32 %v4508_v25, %v2000_v10  ;;  %v5376_v44 = vld [vmem:[#allocation2 + $0xa9] sm:$0xff] }
 0x17f   : > { %v1705_v59 = vadd.f32 %v5171_v58, %v1640_v51  ;;  %v1193_v15 = vmul.f32 %v3567_v30, %v1192_v61  ;;  %3570 = vrcp.f32 %v5270_v21  ;;  %v3569_v54 = vpop.eup %3568  ;;  %vm5282_vm9 = vcmp.eq.f32.partialorder %v2245_v40, 8.507059e+37 }
 0x180   : > { %v894_v47 = vadd.f32 %v5212_v18, %v893_v16  ;;  %vm895_vm10 = vweird.f32 %v5157_v56  ;;  %v1202_v58 = vor.u32 1.1754944e-38, %v1201_v27  ;;  %v3301_v10 = vmul.f32 -1.442695, %v5264_v14 }
 0x181   : > { %vm897_vm12 = vmor %vm895_vm10, %vm896_vm1  ;;  %v902_v40 = vor.u32 1.1754944e-38, %v901_v32  ;;  %v1194_v48 = vadd.f32 %v3567_v30, %v1193_v15  ;;  %vm1200_vm13 = vcmp.eq.f32.partialorder %v1199_v34, 8.507059e+37  ;;  %3572 = vrcp.f32 %v5272_v57 }
 0x182   : > { %v2240_v16 = vadd.f32 %v5137_v38, %v2239_v9  ;;  %v1641_v56 = vadd.f32 %v4987_v19, %v1540_v42  ;;  %v898_v51 = vsel %vm897_vm12, %v5212_v18, %v894_v47  ;;  %vm900_vm14 = vcmp.eq.f32.partialorder %v899_v1, 8.507059e+37  ;;  %v567_v18 = vpop.f32.mrf.mxu0 }
 0x183   : > { %v2234_v0 = vsel %vm5251_vm4, %v5205_v13, %v2229_v22  ;;  %v1738_v23 = vmul.f32 %v4419_v7, %v5286_v5  ;;  %v903_v27 = vsel %vm900_vm14, %v902_v40, %v898_v51  ;;  %v1198_v15 = vsel %vm5293_vm11, %v3567_v30, %v1194_v48 }
 0x184   : > { %v1230_v34 = vmul.f32 %v903_v27, %v5057_v50  ;;  %v1203_v32 = vsel %vm1200_vm13, %v1202_v58, %v1198_v15  ;;  %3574 = vpow2.f32 %v3301_v10  ;;  %v5311_v19 = vadd.f32 %v4800_v53, %v564_v33  ;;  %v7633_v15 = vld [vmem:[#allocation32_spill] sm:$0xff] }
 0x185   : > { %v5313_v9 = vpop.eup %3570  ;;  %v1557_v30 = vadd.f32 %v5219_v62, %v4918_v11  ;;  %v3326_v50 = vmul.f32 -1.442695, %v5278_v43  ;;  %v1770_v22 = vadd.f32 %v1738_v23, %v1705_v59  ;;  %v1250_v33 = vmul.f32 %v1203_v32, %v5083_v12 }
 0x186   : > { %v2244_v61 = vsel %vm5319_vm15, %v5137_v38, %v2240_v16  ;;  %v5334_v20 = vmul.f32 %v4349_v24, %v5008_v45  ;;  %v1706_v42 = vadd.f32 %v5249_v31, %v1641_v56  ;;  %1310 = vst.msk [vmem:[#allocation2 + $0xc8] sm:$0xff] %vm7522_vm0, %v1230_v34  ;;  %v906_v11 = vmul.f32 %v5313_v9, %v5270_v21 }
 0x187   : > { %v5340_v59 = vpop.eup %3572  ;;  %v5343_v62 = vmul.f32 %v2234_v0, %v4894_v3  ;;  %v5347_v12 = vmul.f32 %v4380_v39, %v5111_v60  ;;  %v1904_v45 = vmul.f32 %v4452_v55, %v5113_v52  ;;  %1330 = vst.msk [vmem:[#allocation2 + $0x208] sm:$0xff] %vm7522_vm0, %v1250_v33  ;;  %v5353_v38 = vadd.f32 %v4800_v53, %v567_v18 }
 0x188   : > { %v1739_v31 = vmul.f32 %v4419_v7, %v5326_v28  ;;  %v907_v1 = vsub.f32 1.0, %v906_v11  ;;  %v1206_v3 = vmul.f32 %v5340_v59, %v5272_v57  ;;  %v3302_v47 = vmul.f32 -1.442695, %v5311_v19 }
 0x189   : > { %7632 = vst [vmem:[#allocation45_spill] sm:$0xff] %v5343_v62  ;;  %v2249_v60 = vsel %vm5282_vm9, %v5231_v36, %v2244_v61  ;;  %3576 = vpow2.f32 %v3326_v50  ;;  %v5363_v25 = vadd.f32 1.0, %v3569_v54  ;;  %v1871_v58 = vadd.f32 %v4996_v2, %v1770_v22 }
 0x18a   : > { %v3575_v10 = vpop.eup %3574  ;;  %v1771_v40 = vadd.f32 %v1739_v31, %v1706_v42  ;;  %v908_v48 = vmul.f32 %v5313_v9, %v907_v1  ;;  %v914_v16 = vand.u32 2147483647, %v5270_v21  ;;  %v1207_v56 = vsub.f32 1.0, %v1206_v3  ;;  %v569_v33 = vpop.f32.mrf.mxu0  ;;  %v7640_v3 = vld [vmem:[#allocation15_spill] sm:$0xff] }
 0x18b   : > { %v916_v51 = vand.u32 2147483648, %v5270_v21  ;;  %vm1210_vm2 = vweird.f32 %v5272_v57  ;;  %v5370_v0 = vadd.f32 1.0, %v3575_v10  ;;  %v3303_v36 = vmul.f32 -1.442695, %v5353_v38 }
 0x18c   : > { %v909_v54 = vadd.f32 %v5313_v9, %v908_v48  ;;  %vm911_vm3 = vweird.f32 %v5313_v9  ;;  %v1216_v2 = vand.u32 2147483648, %v5272_v57  ;;  %3578 = vpow2.f32 %v3302_v47 }
 0x18d   : > { %v1208_v23 = vmul.f32 %v5340_v59, %v1207_v56  ;;  %vm1211_vm4 = vweird.f32 %v5340_v59  ;;  %v1214_v27 = vand.u32 2147483647, %v5272_v57  ;;  %3580 = vrcp.f32 %v5370_v0 }
 0x18e   : > { %v5383_v34 = vadd.f32 %v7633_v15, %v1557_v30  ;;  %3582 = vrcp.f32 %v5363_v25  ;;  %v1936_v32 = vadd.f32 %v1904_v45, %v1871_v58  ;;  %vm910_vm5 = vweird.f32 %v5270_v21  ;;  %v5397_v30 = vld [vmem:[%s7481_s3 + $0x8] ss:$0 sm:$0xff]  ;;  %vm5406_vm8 = vmor %vm1210_vm2, %vm1211_vm4 }
 0x18f   : > { %v3577_v18 = vpop.eup %3576  ;;  %v5388_v13 = vmul.f32 %v2249_v60, %v4945_v6  ;;  %v2706_v50 = vsel %vm7522_vm0, %v5343_v62, 0.0  ;;  %vm912_vm6 = vmor %vm910_vm5, %vm911_vm3  ;;  %v917_v22 = vor.u32 1.1754944e-38, %v916_v51  ;;  %3584 = vpow2.f32 %v3303_v36  ;;  %v5422_v58 = vld [vmem:[#allocation2 + $0xc7] sm:$0xff]  ;;  %v5442_v36 = vld [vmem:[#allocation2 + $0xb1] sm:$0xff] }
 0x190   : > { %7634 = vst [vmem:[#allocation32_spill] sm:$0xff] %v5383_v34  ;;  %v1969_v21 = vmul.f32 %v5397_v30, %v5376_v44  ;;  %v913_v6 = vsel %vm912_vm6, %v5313_v9, %v909_v54  ;;  %vm915_vm7 = vcmp.eq.f32.partialorder %v914_v16, 8.507059e+37  ;;  %v1217_v42 = vor.u32 1.1754944e-38, %v1216_v2  ;;  %v5631_v34 = vld [vmem:[#allocation2 + $0x1e7] sm:$0xff] }
 0x191   : > { %7635 = vst [vmem:[#allocation58_spill] sm:$0xff] %v5388_v13  ;;  %v1872_v11 = vadd.f32 %v5018_v8, %v1771_v40  ;;  %v918_v45 = vsel %vm915_vm7, %v917_v22, %v913_v6  ;;  %v1209_v31 = vadd.f32 %v5340_v59, %v1208_v23  ;;  %vm5412_vm1 = vcmp.eq.f32.partialorder %v1214_v27, 8.507059e+37 }
 0x192   : > { %v3579_v9 = vpop.eup %3578  ;;  %v5418_v47 = vmul.f32 %v7640_v3, %v5113_v52  ;;  %v1905_v57 = vmul.f32 %v4452_v55, %v5203_v26  ;;  %v2001_v60 = vadd.f32 %v1969_v21, %v1936_v32  ;;  %v5425_v8 = vadd.f32 %v4800_v53, %v569_v33  ;;  %v5461_v32 = vld [vmem:[%s7482_s4] ss:$0 sm:$0xff]  ;;  %v1363_v21 = vld [vmem:[#allocation2 + $0x1cf] sm:$0xff] }
 0x193   : > { %v5427_v10 = vpop.eup %3580  ;;  %v2707_v40 = vadd.f32 %v2706_v50, %v5140_v4  ;;  %v1444_v48 = vmul.f32 %v4352_v63, %v5173_v49  ;;  %v1231_v16 = vmul.f32 %v918_v45, %v5121_v17  ;;  %v1213_v52 = vsel %vm5406_vm8, %v5340_v59, %v1209_v31  ;;  %v1594_v31 = vld [vmem:[#allocation2 + $0x1d0] sm:$0xff] }
 0x194   : > { %v5436_v56 = vpop.eup %3582  ;;  %v2708_v51 = vsel %vm7522_vm0, %v5388_v13, 0.0  ;;  %v5440_v53 = vadd.f32 1.0, %v3577_v18  ;;  %v1218_v4 = vsel %vm5412_vm1, %v1217_v42, %v1213_v52  ;;  %v921_v54 = vmul.f32 %v5427_v10, %v5370_v0 }
 0x195   : > { %v3585_v17 = vpop.eup %3584  ;;  %v1937_v2 = vadd.f32 %v1905_v57, %v1872_v11  ;;  %v1509_v59 = vmul.f32 %v4358_v29, %v5422_v58  ;;  %1311 = vst.msk [vmem:[#allocation2 + $0xd0] sm:$0xff] %vm7522_vm0, %v1231_v16  ;;  %v1251_v23 = vmul.f32 %v1218_v4, %v5129_v46  ;;  %v5452_v27 = vadd.f32 1.0, %v3579_v9  ;;  %v7642_v16 = vld [vmem:[#allocation51_spill] sm:$0xff] }
 0x196   : > { %v5456_v15 = vmul.f32 %v7640_v3, %v5203_v26  ;;  %v5464_v18 = vadd.f32 %v5461_v32, %v2001_v60  ;;  %v922_v50 = vsub.f32 1.0, %v921_v54  ;;  %v3304_v22 = vmul.f32 -1.442695, %v5425_v8 }
 0x197   : > { %v5467_v33 = vadd.f32 %v2708_v51, %v2707_v40  ;;  %v2252_v46 = vmul.f32 %v5436_v56, %v5363_v25  ;;  %v1476_v26 = vadd.f32 %v1444_v48, %v5162_v35  ;;  %v1970_v6 = vmul.f32 %v5397_v30, %v5442_v36  ;;  %1331 = vst.msk [vmem:[#allocation2 + $0x210] sm:$0xff] %vm7522_vm0, %v1251_v23 }
 0x198   : > { %3586 = vrcp.f32 %v5440_v53  ;;  %v1463_v61 = vmul.f32 %v4352_v63, %v1363_v21  ;;  %v923_v42 = vmul.f32 %v5427_v10, %v922_v50  ;;  %v5478_v11 = vadd.f32 1.0, %v3585_v17 }
 0x199   : > { %v5481_v45 = vmul.f32 %v4349_v24, %v1363_v21  ;;  %v2002_v1 = vadd.f32 %v1970_v6, %v1937_v2  ;;  %v1541_v9 = vadd.f32 %v1509_v59, %v1476_v26  ;;  %3588 = vrcp.f32 %v5452_v27 }
 0x19a   : > { %v2262_v35 = vand.u32 2147483648, %v5363_v25  ;;  %v1526_v57 = vmul.f32 %v4358_v29, %v1363_v21  ;;  %v3327_v60 = vmul.f32 -1.442695, %v5464_v18  ;;  %3590 = vpow2.f32 %v3304_v22 }
 0x19b   : > { %7641 = vst [vmem:[#allocation15_spill] sm:$0xff] %v5481_v45  ;;  %v2253_v40 = vsub.f32 1.0, %v2252_v46  ;;  %v924_v48 = vadd.f32 %v5427_v10, %v923_v42  ;;  %vm926_vm9 = vweird.f32 %v5427_v10  ;;  %3592 = vrcp.f32 %v5478_v11  ;;  %v7645_v46 = vld [vmem:[#allocation22_spill] sm:$0xff] }
 0x19c   : > { %v5491_v52 = vadd.f32 %v1463_v61, %v7642_v16  ;;  %v5494_v51 = vmul.f32 %v4419_v7, %v1594_v31  ;;  %v1445_v4 = vmul.f32 %v4352_v63, %v5221_v37  ;;  %v5498_v54 = vld [vmem:[#allocation2 + $0xcf] sm:$0xff]  ;;  %v931_v17 = vand.u32 2147483648, %v5370_v0  ;;  %v7649_v42 = vld [vmem:[#allocation14_spill] sm:$0xff] }
 0x19d   : > { %v5502_v2 = vadd.f32 %v5461_v32, %v2002_v1  ;;  %v1642_v59 = vadd.f32 %v5167_v41, %v1541_v9  ;;  %vm925_vm10 = vweird.f32 %v5370_v0  ;;  %v929_v23 = vand.u32 2147483647, %v5370_v0  ;;  %7656 = vst [vmem:[#allocation14_spill] sm:$0xff] %v5631_v34 }
 0x19e   : > { %7643 = vst [vmem:[#allocation51_spill] sm:$0xff] %v5491_v52  ;;  %v5507_v50 = vpop.eup %3586  ;;  %v2260_v22 = vand.u32 2147483647, %v5363_v25  ;;  %v5511_v21 = vadd.f32 %v1526_v57, %v7645_v46  ;;  %3594 = vpow2.f32 %v3327_v60  ;;  %v1510_v26 = vmul.f32 %v4358_v29, %v5498_v54  ;;  %vm5517_vm11 = vmor %vm925_vm10, %vm926_vm9 }
 0x19f   : > { %7644 = vst [vmem:[#allocation59_spill] sm:$0xff] %v5494_v51  ;;  %v5521_v41 = vpop.eup %3588  ;;  %v2254_v0 = vmul.f32 %v5436_v56, %v2253_v40  ;;  %v5524_v61 = vor.u32 1.1754944e-38, %v2262_v35  ;;  %v1675_v31 = vmul.f32 %v7649_v42, %v5286_v5  ;;  %v928_v1 = vsel %vm5517_vm11, %v5427_v10, %v924_v48  ;;  %v5540_v35 = vld [vmem:[#allocation2 + $0xc8] sm:$0xff] }
 0x1a0   : > { %7646 = vst [vmem:[#allocation22_spill] sm:$0xff] %v5511_v21  ;;  %v3591_v9 = vpop.eup %3590  ;;  %v5533_v57 = vmul.f32 %v4349_v24, %v5173_v49  ;;  %v5537_v60 = vmul.f32 %v4380_v39, %v5286_v5  ;;  %v1477_v40 = vadd.f32 %v1445_v4, %v5334_v20  ;;  %v932_v16 = vor.u32 1.1754944e-38, %v931_v17 }
 0x1a1   : > { %v5542_v46 = vpop.eup %3592  ;;  %vm2256_vm12 = vweird.f32 %v5363_v25  ;;  %vm2257_vm13 = vweird.f32 %v5436_v56  ;;  %v3328_v10 = vmul.f32 -1.442695, %v5502_v2  ;;  %v1707_v48 = vadd.f32 %v1675_v31, %v1642_v59 }
 0x1a2   : > { %vm930_vm14 = vcmp.eq.f32.partialorder %v929_v23, 8.507059e+37  ;;  %v1542_v6 = vadd.f32 %v1510_v26, %v1477_v40  ;;  %v936_v20 = vmul.f32 %v5521_v41, %v5452_v27  ;;  %v5551_v4 = vadd.f32 %v5436_v56, %v2254_v0  ;;  %vm5594_vm7 = vmor %vm2256_vm12, %vm2257_vm13 }
 0x1a3   : > { %v933_v5 = vsel %vm930_vm14, %v932_v16, %v928_v1  ;;  %v1740_v17 = vmul.f32 %v4419_v7, %v5540_v35  ;;  %v5556_v62 = vadd.f32 1.0, %v3591_v9  ;;  %v5560_v59 = vmul.f32 %v5507_v50, %v5440_v53 }
 0x1a4   : > { %v1232_v13 = vmul.f32 %v933_v5, %v5264_v14  ;;  %v3595_v51 = vpop.eup %3594  ;;  %v1676_v23 = vmul.f32 %v7649_v42, %v5326_v28  ;;  %v937_v26 = vsub.f32 1.0, %v936_v20  ;;  %v951_v0 = vmul.f32 %v5542_v46, %v5478_v11 }
 0x1a5   : > { %3596 = vpow2.f32 %v3328_v10  ;;  %v1772_v31 = vadd.f32 %v1740_v17, %v1707_v48  ;;  %v944_v14 = vand.u32 2147483647, %v5452_v27  ;;  %v946_v1 = vand.u32 2147483648, %v5452_v27 }
 0x1a6   : > { %1312 = vst.msk [vmem:[#allocation2 + $0xe8] sm:$0xff] %vm7522_vm0, %v1232_v13  ;;  %vm5569_vm15 = vcmp.eq.f32.partialorder %v2260_v22, 8.507059e+37  ;;  %v1643_v40 = vadd.f32 %v5347_v12, %v1542_v6  ;;  %v938_v16 = vmul.f32 %v5521_v41, %v937_v26  ;;  %vm941_vm2 = vweird.f32 %v5521_v41  ;;  %v572_v22 = vpop.f32.mrf.mxu0 }
 0x1a7   : > { %v952_v5 = vsub.f32 1.0, %v951_v0  ;;  %v5576_v20 = vadd.f32 1.0, %v3595_v51  ;;  %v1446_v13 = vmul.f32 %v4352_v63, %v5422_v58  ;;  %vm940_vm3 = vweird.f32 %v5452_v27  ;;  %v5587_v51 = vld [vmem:[#allocation2 + $0xd0] sm:$0xff] }
 0x1a8   : > { %3598 = vrcp.f32 %v5556_v62  ;;  %v939_v10 = vadd.f32 %v5521_v41, %v938_v16  ;;  %vm956_vm4 = vweird.f32 %v5542_v46  ;;  %v961_v12 = vand.u32 2147483648, %v5478_v11  ;;  %vm942_vm5 = vmor %vm940_vm3, %vm941_vm2 }
 0x1a9   : > { %v953_v48 = vmul.f32 %v5542_v46, %v952_v5  ;;  %v1873_v6 = vadd.f32 %v5418_v47, %v1772_v31  ;;  %vm945_vm6 = vcmp.eq.f32.partialorder %v944_v14, 8.507059e+37  ;;  %v947_v17 = vor.u32 1.1754944e-38, %v946_v1 }
 0x1aa   : > { %v959_v27 = vand.u32 2147483647, %v5478_v11  ;;  %v1708_v0 = vadd.f32 %v1676_v23, %v1643_v40  ;;  %v943_v16 = vsel %vm942_vm5, %v5521_v41, %v939_v10  ;;  %vm955_vm8 = vweird.f32 %v5478_v11  ;;  %v5616_v23 = vld [vmem:[#allocation2 + $0xc9] sm:$0xff] }
 0x1ab   : > { %v954_v47 = vadd.f32 %v5542_v46, %v953_v48  ;;  %v3597_v31 = vpop.eup %3596  ;;  %v2259_v14 = vsel %vm5594_vm7, %v5436_v56, %v5551_v4  ;;  %v1906_v25 = vmul.f32 %v4452_v55, %v5376_v44  ;;  %3600 = vrcp.f32 %v5576_v20  ;;  %vm5610_vm1 = vmor %vm955_vm8, %vm956_vm4 }
 0x1ac   : > { %v948_v1 = vsel %vm945_vm6, %v947_v17, %v943_v16  ;;  %v1741_v11 = vmul.f32 %v4419_v7, %v5587_v51  ;;  %v962_v5 = vor.u32 1.1754944e-38, %v961_v12  ;;  %v1478_v48 = vadd.f32 %v1446_v13, %v5533_v57 }
 0x1ad   : > { %v5618_v40 = vld [vmem:[#allocation2 + $0xe7] sm:$0xff]  ;;  %v1233_v56 = vmul.f32 %v948_v1, %v5311_v19  ;;  %v958_v4 = vsel %vm5610_vm1, %v5542_v46, %v954_v47  ;;  %v1938_v17 = vadd.f32 %v1906_v25, %v1873_v6  ;;  %vm960_vm9 = vcmp.eq.f32.partialorder %v959_v27, 8.507059e+37 }
 0x1ae   : > { %v5624_v10 = vpop.eup %3598  ;;  %v1511_v26 = vmul.f32 %v4358_v29, %v5618_v40  ;;  %v2268_v16 = vsub.f32 1.0, %v5560_v59  ;;  %v1773_v19 = vadd.f32 %v1741_v11, %v1708_v0  ;;  %v963_v46 = vsel %vm960_vm9, %v962_v5, %v958_v4  ;;  %v5648_v47 = vld [vmem:[#allocation2 + $0xe8] sm:$0xff] }
 0x1af   : > { %1313 = vst.msk [vmem:[#allocation2 + $0xf0] sm:$0xff] %vm7522_vm0, %v1233_v56  ;;  %v2264_v12 = vsel %vm5569_vm15, %v5524_v61, %v2259_v14  ;;  %v1971_v57 = vmul.f32 %v5397_v30, %v5616_v23  ;;  %v1234_v6 = vmul.f32 %v963_v46, %v5353_v38  ;;  %v7657_v59 = vand.u32 2147483648, %v5440_v53  ;;  %v5655_v61 = vld [vmem:[%s7480_s2] ss:$0 sm:$0xff]  ;;  %v574_v56 = vpop.f32.mrf.mxu0 }
 0x1b0   : > { %v1543_v13 = vadd.f32 %v1511_v26, %v1478_v48  ;;  %v5646_v0 = vmul.f32 %v4352_v63, %v5631_v34  ;;  %v966_v9 = vmul.f32 %v5624_v10, %v5556_v62  ;;  %v5658_v38 = vadd.f32 %v5655_v61, %v572_v22  ;;  %v7659_v22 = vld [vmem:[#allocation34_spill] sm:$0xff] }
 0x1b1   : > { %v5642_v27 = vor.u32 1.1754944e-38, %v7657_v59  ;;  %v5660_v14 = vpop.eup %3600  ;;  %v5664_v25 = vmul.f32 %v4358_v29, %v5631_v34  ;;  %v1677_v1 = vmul.f32 %v7649_v42, %v5540_v35  ;;  %v2003_v41 = vadd.f32 %v1971_v57, %v1938_v17  ;;  %1314 = vst.msk [vmem:[#allocation2 + $0x108] sm:$0xff] %vm7522_vm0, %v1234_v6 }
 0x1b2   : > { %7658 = vst [vmem:[#allocation60_spill] sm:$0xff] %v5646_v0  ;;  %v1644_v11 = vadd.f32 %v5537_v60, %v1543_v13  ;;  %v5671_v4 = vmul.f32 %v5507_v50, %v2268_v16  ;;  %v5674_v5 = vmul.f32 %v2264_v12, %v7659_v22  ;;  %v1447_v48 = vmul.f32 %v4352_v63, %v5498_v54  ;;  %v5687_v13 = vld [vmem:[#allocation2 + $0xd1] sm:$0xff] }
 0x1b3   : > { %v1874_v26 = vadd.f32 %v5456_v15, %v1773_v19  ;;  %v1382_v46 = vmul.f32 %v4349_v24, %v5221_v37  ;;  %v5681_v17 = vadd.f32 1.0, %v3597_v31  ;;  %v1742_v57 = vmul.f32 %v4419_v7, %v5648_v47 }
 0x1b4   : > { %7660 = vst [vmem:[#allocation34_spill] sm:$0xff] %v5674_v5  ;;  %v1709_v60 = vadd.f32 %v1677_v1, %v1644_v11  ;;  %v1907_v16 = vmul.f32 %v4452_v55, %v5442_v36  ;;  %v967_v12 = vsub.f32 1.0, %v966_v9  ;;  %v3305_v6 = vmul.f32 -1.442695, %v5658_v38 }
 0x1b5   : > { %v5691_v59 = vadd.f32 %v5655_v61, %v574_v56  ;;  %v1613_v37 = vmul.f32 %v4380_v39, %v5326_v28  ;;  %v1843_v15 = vmul.f32 %v7640_v3, %v5376_v44  ;;  %v5698_v31 = vadd.f32 %v5461_v32, %v2003_v41 }
 0x1b6   : > { %v1774_v19 = vadd.f32 %v1742_v57, %v1709_v60  ;;  %v5700_v1 = vld [vmem:[#allocation2 + $0xef] sm:$0xff]  ;;  %v2282_v9 = vmul.f32 %v5660_v14, %v5576_v20  ;;  %v1479_v11 = vadd.f32 %v1447_v48, %v1382_v46  ;;  %v1939_v22 = vadd.f32 %v1907_v16, %v1874_v26 }
 0x1b7   : > { %7661 = vst [vmem:[#allocation61_spill] sm:$0xff] %v5698_v31  ;;  %v1512_v56 = vmul.f32 %v4358_v29, %v5700_v1  ;;  %v1844_v28 = vmul.f32 %v7640_v3, %v5442_v36  ;;  %3602 = vrcp.f32 %v5681_v17  ;;  %v1972_v44 = vmul.f32 %v5397_v30, %v5687_v13  ;;  %v5720_v16 = vld [vmem:[#allocation2 + $0xf0] sm:$0xff] }
 0x1b8   : > { %v1875_v41 = vadd.f32 %v1843_v15, %v1774_v19  ;;  %v968_v57 = vmul.f32 %v5624_v10, %v967_v12  ;;  %3604 = vpow2.f32 %v3305_v6  ;;  %v3306_v49 = vmul.f32 -1.442695, %v5691_v59 }
 0x1b9   : > { %v1544_v60 = vadd.f32 %v1512_v56, %v1479_v11  ;;  %v1383_v48 = vmul.f32 %v4349_v24, %v5422_v58  ;;  %v1908_v26 = vmul.f32 %v4452_v55, %v5616_v23  ;;  %v3329_v36 = vmul.f32 -1.442695, %v5698_v31  ;;  %v5724_v11 = vld [vmem:[#allocation2 + $0xe9] sm:$0xff] }
 0x1ba   : > { %v1448_v46 = vmul.f32 %v4352_v63, %v5618_v40  ;;  %v2283_v15 = vsub.f32 1.0, %v2282_v9  ;;  %v1678_v12 = vmul.f32 %v7649_v42, %v5587_v51  ;;  %v2004_v6 = vadd.f32 %v1972_v44, %v1939_v22  ;;  %v5726_v56 = vld [vmem:[#allocation2 + $0x107] sm:$0xff] }
 0x1bb   : > { %v1645_v19 = vadd.f32 %v1613_v37, %v1544_v60  ;;  %vm2272_vm10 = vweird.f32 %v5507_v50  ;;  %v1940_v58 = vadd.f32 %v1908_v26, %v1875_v41  ;;  %vm971_vm11 = vweird.f32 %v5624_v10  ;;  %v577_v26 = vpop.f32.mrf.mxu0 }
 0x1bc   : > { %v974_v21 = vand.u32 2147483647, %v5556_v62  ;;  %v976_v52 = vand.u32 2147483648, %v5556_v62  ;;  %v1743_v9 = vmul.f32 %v4419_v7, %v5720_v16  ;;  %v969_v22 = vadd.f32 %v5624_v10, %v968_v57 }
 0x1bd   : > { %v1710_v45 = vadd.f32 %v1678_v12, %v1645_v19  ;;  %3606 = vpow2.f32 %v3306_v49  ;;  %v5735_v37 = vpop.eup %3602  ;;  %vm2271_vm12 = vweird.f32 %v5440_v53  ;;  %v1480_v44 = vadd.f32 %v1448_v46, %v1383_v48 }
 0x1be   : > { %3608 = vpow2.f32 %v3329_v36  ;;  %v1973_v41 = vmul.f32 %v5397_v30, %v5724_v11  ;;  %v1513_v60 = vmul.f32 %v4358_v29, %v5726_v56  ;;  %v3605_v12 = vpop.eup %3604  ;;  %v1614_v19 = vmul.f32 %v4380_v39, %v5540_v35  ;;  %vm5793_vm5 = vmor %vm2271_vm12, %vm2272_vm10 }
 0x1bf   : > { %v5745_v57 = vadd.f32 %v5461_v32, %v2004_v6  ;;  %v1775_v49 = vadd.f32 %v1743_v9, %v1710_v45  ;;  %vm970_vm13 = vweird.f32 %v5556_v62  ;;  %v2284_v36 = vmul.f32 %v5660_v14, %v2283_v15 }
 0x1c0   : > { %v2005_v48 = vadd.f32 %v1973_v41, %v1940_v58  ;;  %v1545_v46 = vadd.f32 %v1513_v60, %v1480_v44  ;;  %vm972_vm14 = vmor %vm970_vm13, %vm971_vm11  ;;  %v977_v0 = vor.u32 1.1754944e-38, %v976_v52  ;;  %vm975_vm15 = vcmp.eq.f32.partialorder %v974_v21, 8.507059e+37 }
 0x1c1   : > { %v1876_v34 = vadd.f32 %v1844_v28, %v1775_v49  ;;  %v973_v31 = vsel %vm972_vm14, %v5624_v10, %v969_v22  ;;  %v5753_v35 = vadd.f32 %v5655_v61, %v577_v26  ;;  %v7662_v6 = vand.u32 2147483647, %v5440_v53 }
 0x1c2   : > { %v2297_v62 = vmul.f32 %v5735_v37, %v5681_v17  ;;  %v1646_v15 = vadd.f32 %v1614_v19, %v1545_v46  ;;  %v978_v58 = vsel %vm975_vm15, %v977_v0, %v973_v31  ;;  %v5763_v9 = vadd.f32 1.0, %v3605_v12  ;;  %v5774_v0 = vld [vmem:[#allocation2 + $0xf1] sm:$0xff]  ;;  %v5782_v12 = vld [vmem:[#allocation2 + $0x108] sm:$0xff] }
 0x1c3   : > { %vm5757_vm2 = vcmp.eq.f32.partialorder %v7662_v6, 8.507059e+37  ;;  %v3607_v52 = vpop.eup %3606  ;;  %v2270_v21 = vadd.f32 %v5507_v50, %v5671_v4  ;;  %vm2286_vm3 = vweird.f32 %v5576_v20  ;;  %v1909_v10 = vmul.f32 %v4452_v55, %v5687_v13 }
 0x1c4   : > { %v3330_v28 = vmul.f32 -1.442695, %v5745_v57  ;;  %v3609_v22 = vpop.eup %3608  ;;  %v2290_v44 = vand.u32 2147483647, %v5576_v20  ;;  %v1679_v41 = vmul.f32 %v7649_v42, %v5648_v47  ;;  %v5777_v31 = vadd.f32 %v5461_v32, %v2005_v48 }
 0x1c5   : > { %v1235_v4 = vmul.f32 %v978_v58, %v5425_v8  ;;  %v2285_v60 = vadd.f32 %v5660_v14, %v2284_v36  ;;  %vm2287_vm4 = vweird.f32 %v5660_v14  ;;  %v1941_v26 = vadd.f32 %v1909_v10, %v1876_v34 }
 0x1c6   : > { %v3307_v19 = vmul.f32 -1.442695, %v5753_v35  ;;  %v2298_v49 = vsub.f32 1.0, %v2297_v62  ;;  %v1711_v46 = vadd.f32 %v1679_v41, %v1646_v15  ;;  %3610 = vrcp.f32 %v5763_v9  ;;  %v7667_v15 = vld [vmem:[#allocation55_spill] sm:$0xff]  ;;  %vm5813_vm6 = vmor %vm2286_vm3, %vm2287_vm4 }
 0x1c7   : > { %1315 = vst.msk [vmem:[#allocation2 + $0x110] sm:$0xff] %vm7522_vm0, %v1235_v4  ;;  %v5787_v6 = vadd.f32 1.0, %v3607_v52  ;;  %v2292_v34 = vand.u32 2147483648, %v5576_v20  ;;  %3612 = vpow2.f32 %v3330_v28  ;;  %v5798_v36 = vadd.f32 1.0, %v3609_v22 }
 0x1c8   : > { %v1974_v48 = vmul.f32 %v5397_v30, %v5774_v0  ;;  %v2274_v62 = vsel %vm5793_vm5, %v5507_v50, %v2270_v21  ;;  %v5807_v58 = vadd.f32 %v5664_v25, %v7667_v15  ;;  %v3331_v52 = vmul.f32 -1.442695, %v5777_v31 }
 0x1c9   : > { %v1744_v10 = vmul.f32 %v4419_v7, %v5782_v12  ;;  %v2710_v50 = vsel %vm7522_vm0, %v5674_v5, 0.0  ;;  %v2289_v25 = vsel %vm5813_vm6, %v5660_v14, %v2285_v60  ;;  %3614 = vpow2.f32 %v3307_v19 }
 0x1ca   : > { %7668 = vst [vmem:[#allocation55_spill] sm:$0xff] %v5807_v58  ;;  %v2006_v21 = vadd.f32 %v1974_v48, %v1941_v26  ;;  %v2299_v20 = vmul.f32 %v5735_v37, %v2298_v49  ;;  %v1449_v28 = vmul.f32 %v4352_v63, %v5700_v1  ;;  %3616 = vrcp.f32 %v5787_v6 }
 0x1cb   : > { %v1776_v22 = vadd.f32 %v1744_v10, %v1711_v46  ;;  %v2279_v41 = vsel %vm5757_vm2, %v5642_v27, %v2274_v62  ;;  %vm2291_vm7 = vcmp.eq.f32.partialorder %v2290_v44, 8.507059e+37  ;;  %v2293_v4 = vor.u32 1.1754944e-38, %v2292_v34 }
 0x1cc   : > { %3618 = vrcp.f32 %v5798_v36  ;;  %v5833_v8 = vpop.eup %3610  ;;  %v2305_v14 = vand.u32 2147483647, %v5681_v17  ;;  %v1384_v60 = vmul.f32 %v4349_v24, %v5498_v54  ;;  %v1845_v26 = vmul.f32 %v7640_v3, %v5616_v23 }
 0x1cd   : > { %3620 = vpow2.f32 %v3331_v52  ;;  %v3613_v19 = vpop.eup %3612  ;;  %v2294_v49 = vsel %vm2291_vm7, %v2293_v4, %v2289_v25  ;;  %vm2302_vm8 = vweird.f32 %v5735_v37  ;;  %v2307_v27 = vand.u32 2147483648, %v5681_v17 }
 0x1ce   : > { %v5843_v45 = vadd.f32 %v5461_v32, %v2006_v21  ;;  %v5845_v44 = vld [vmem:[#allocation2 + $0x10f] sm:$0xff]  ;;  %v5848_v46 = vadd.f32 %v5735_v37, %v2299_v20  ;;  %v1481_v34 = vadd.f32 %v1449_v28, %v1384_v60  ;;  %v1877_v54 = vadd.f32 %v1845_v26, %v1776_v22 }
 0x1cf   : > { %v1514_v23 = vmul.f32 %v4358_v29, %v5845_v44  ;;  %v3615_v48 = vpop.eup %3614  ;;  %v5853_v62 = vmul.f32 %v2279_v41, %v5278_v43  ;;  %v5856_v15 = vadd.f32 %v2710_v50, %v5467_v33  ;;  %vm2301_vm1 = vweird.f32 %v5681_v17  ;;  %v5883_v22 = vld [vmem:[#allocation2 + $0x109] sm:$0xff] }
 0x1d0   : > { %v981_v53 = vmul.f32 %v5833_v8, %v5763_v9  ;;  %v5861_v52 = vpop.eup %3616  ;;  %v1615_v10 = vmul.f32 %v4380_v39, %v5587_v51  ;;  %v5865_v25 = vadd.f32 1.0, %v3613_v19  ;;  %v1910_v21 = vmul.f32 %v4452_v55, %v5724_v11  ;;  %vm5873_vm9 = vmor %vm2301_vm1, %vm2302_vm8  ;;  %v5895_v26 = vld [vmem:[#allocation2 + $0x110] sm:$0xff] }
 0x1d1   : > { %7671 = vst [vmem:[#allocation62_spill] sm:$0xff] %v5853_v62  ;;  %v1546_v43 = vadd.f32 %v1514_v23, %v1481_v34  ;;  %v2308_v17 = vor.u32 1.1754944e-38, %v2307_v27  ;;  %v5878_v50 = vmul.f32 %v2294_v49, %v5464_v18  ;;  %v1846_v51 = vmul.f32 %v7640_v3, %v5687_v13 }
 0x1d2   : > { %v5869_v20 = vpop.eup %3618  ;;  %v3332_v28 = vmul.f32 -1.442695, %v5843_v45  ;;  %v2304_v4 = vsel %vm5873_vm9, %v5735_v37, %v5848_v46  ;;  %vm5889_vm10 = vcmp.eq.f32.partialorder %v2305_v14, 8.507059e+37  ;;  %v1680_v18 = vmul.f32 %v7649_v42, %v5720_v16 }
 0x1d3   : > { %7674 = vst [vmem:[#allocation63_spill] sm:$0xff] %v5878_v50  ;;  %v3621_v41 = vpop.eup %3620  ;;  %v1647_v13 = vadd.f32 %v1615_v10, %v1546_v43  ;;  %v1942_v19 = vadd.f32 %v1910_v21, %v1877_v54  ;;  %v1911_v49 = vmul.f32 %v4452_v55, %v5774_v0  ;;  %v982_v27 = vsub.f32 1.0, %v981_v53 }
 0x1d4   : > { %v996_v34 = vmul.f32 %v5861_v52, %v5787_v6  ;;  %v5901_v23 = vadd.f32 1.0, %v3615_v48  ;;  %v2312_v37 = vmul.f32 %v5869_v20, %v5798_v36  ;;  %3622 = vrcp.f32 %v5865_v25 }
 0x1d5   : > { %v1975_v14 = vmul.f32 %v5397_v30, %v5883_v22  ;;  %v991_v46 = vand.u32 2147483648, %v5763_v9  ;;  %3624 = vpow2.f32 %v3332_v28  ;;  %v5909_v54 = vadd.f32 1.0, %v3621_v41 }
 0x1d6   : > { %v1712_v10 = vadd.f32 %v1680_v18, %v1647_v13  ;;  %v1745_v53 = vmul.f32 %v4419_v7, %v5895_v26  ;;  %v983_v48 = vmul.f32 %v5833_v8, %v982_v27  ;;  %vm986_vm11 = vweird.f32 %v5833_v8 }
 0x1d7   : > { %v2007_v21 = vadd.f32 %v1975_v14, %v1942_v19  ;;  %v997_v43 = vsub.f32 1.0, %v996_v34  ;;  %vm985_vm12 = vweird.f32 %v5763_v9  ;;  %v989_v5 = vand.u32 2147483647, %v5763_v9 }
 0x1d8   : > { %v1777_v33 = vadd.f32 %v1745_v53, %v1712_v10  ;;  %3626 = vrcp.f32 %v5901_v23  ;;  %v984_v28 = vadd.f32 %v5833_v8, %v983_v48  ;;  %vm1001_vm13 = vweird.f32 %v5861_v52  ;;  %vm5923_vm14 = vmor %vm985_vm12, %vm986_vm11 }
 0x1d9   : > { %v998_v41 = vmul.f32 %v5861_v52, %v997_v43  ;;  %v1006_v18 = vand.u32 2147483648, %v5787_v6  ;;  %3628 = vrcp.f32 %v5909_v54  ;;  %v992_v27 = vor.u32 1.1754944e-38, %v991_v46 }
 0x1da   : > { %v1878_v13 = vadd.f32 %v1846_v51, %v1777_v33  ;;  %v1004_v9 = vand.u32 2147483647, %v5787_v6  ;;  %v5928_v34 = vpop.eup %3622  ;;  %v5931_v14 = vadd.f32 %v5461_v32, %v2007_v21  ;;  %v988_v10 = vsel %vm5923_vm14, %v5833_v8, %v984_v28  ;;  %v5942_v33 = vld [vmem:[#allocation2 + $0x111] sm:$0xff] }
 0x1db   : > { %v999_v53 = vadd.f32 %v5861_v52, %v998_v41  ;;  %vm1000_vm15 = vweird.f32 %v5787_v6  ;;  %v3625_v51 = vpop.eup %3624  ;;  %v2712_v48 = vsel %vm7522_vm0, %v5853_v62, 0.0  ;;  %v2309_v46 = vsel %vm5889_vm10, %v2308_v17, %v2304_v4  ;;  %v5951_v62 = vld [vmem:[#allocation2 + $0x1ef] sm:$0xff] }
 0x1dc   : > { %v2313_v43 = vsub.f32 1.0, %v2312_v37  ;;  %vm990_vm2 = vcmp.eq.f32.partialorder %v989_v5, 8.507059e+37  ;;  %vm1002_vm3 = vmor %vm1000_vm15, %vm1001_vm13  ;;  %v1943_v21 = vadd.f32 %v1911_v49, %v1878_v13  ;;  %v1007_v41 = vor.u32 1.1754944e-38, %v1006_v18  ;;  %v579_v37 = vpop.f32.mrf.mxu0 }
 0x1dd   : > { %v993_v8 = vsel %vm990_vm2, %v992_v27, %v988_v10  ;;  %v1003_v28 = vsel %vm1002_vm3, %v5861_v52, %v999_v53  ;;  %v2714_v19 = vsel %vm7522_vm0, %v5878_v50, 0.0  ;;  %v2327_v17 = vmul.f32 %v5928_v34, %v5865_v25 }
 0x1de   : > { %v5947_v6 = vpop.eup %3626  ;;  %v1236_v5 = vmul.f32 %v993_v8, %v5658_v38  ;;  %vm1005_vm4 = vcmp.eq.f32.partialorder %v1004_v9, 8.507059e+37  ;;  %v5957_v4 = vmul.f32 %v2309_v46, %v5502_v2  ;;  %v1976_v52 = vmul.f32 %v5397_v30, %v5942_v33  ;;  %v5976_v9 = vld [vmem:[#allocation2 + $0x207] sm:$0xff] }
 0x1df   : > { %v3333_v60 = vmul.f32 -1.442695, %v5931_v14  ;;  %v1008_v49 = vsel %vm1005_vm4, %v1007_v41, %v1003_v28  ;;  %v5962_v18 = vpop.eup %3628  ;;  %v2713_v13 = vadd.f32 %v2712_v48, %v5856_v15  ;;  %v5967_v27 = vmul.f32 %v4352_v63, %v5951_v62 }
 0x1e0   : > { %7679 = vst [vmem:[#allocation64_spill] sm:$0xff] %v5957_v4  ;;  %v2314_v38 = vmul.f32 %v5869_v20, %v2313_v43  ;;  %v1237_v2 = vmul.f32 %v1008_v49, %v5691_v59  ;;  %v5974_v30 = vmul.f32 %v4358_v29, %v5951_v62  ;;  %v5978_v10 = vadd.f32 1.0, %v3625_v51 }
 0x1e1   : > { %1316 = vst.msk [vmem:[#allocation2 + $0x128] sm:$0xff] %vm7522_vm0, %v1236_v5  ;;  %v2008_v53 = vadd.f32 %v1976_v52, %v1943_v21  ;;  %v1011_v15 = vmul.f32 %v5947_v6, %v5901_v23  ;;  %v5982_v48 = vadd.f32 %v2714_v19, %v2713_v13  ;;  %v5986_v46 = vmul.f32 %v4352_v63, %v5976_v9 }
 0x1e2   : > { %v2328_v43 = vsub.f32 1.0, %v2327_v17  ;;  %1317 = vst.msk [vmem:[#allocation2 + $0x130] sm:$0xff] %vm7522_vm0, %v1237_v2  ;;  %v5990_v59 = vadd.f32 %v5655_v61, %v579_v37  ;;  %v5994_v51 = vsel %vm7522_vm0, %v5957_v4, 0.0  ;;  %v2320_v21 = vand.u32 2147483647, %v5798_v36 }
 0x1e3   : > { %v2342_v8 = vmul.f32 %v5962_v18, %v5909_v54  ;;  %3630 = vpow2.f32 %v3333_v60  ;;  %v2315_v28 = vadd.f32 %v5869_v20, %v2314_v38  ;;  %vm2317_vm5 = vweird.f32 %v5869_v20 }
 0x1e4   : > { %v2322_v41 = vand.u32 2147483648, %v5798_v36  ;;  %v2335_v19 = vand.u32 2147483647, %v5865_v25  ;;  %3632 = vrcp.f32 %v5978_v10  ;;  %v1450_v61 = vmul.f32 %v4352_v63, %v5726_v56 }
 0x1e5   : > { %v6007_v17 = vadd.f32 %v5461_v32, %v2008_v53  ;;  %v1012_v5 = vsub.f32 1.0, %v1011_v15  ;;  %vm2316_vm6 = vweird.f32 %v5798_v36  ;;  %v2329_v52 = vmul.f32 %v5928_v34, %v2328_v43 }
 0x1e6   : > { %v2337_v60 = vand.u32 2147483648, %v5865_v25  ;;  %v3308_v49 = vmul.f32 -1.442695, %v5990_v59  ;;  %vm6013_vm7 = vmor %vm2316_vm6, %vm2317_vm5  ;;  %vm6017_vm8 = vcmp.eq.f32.partialorder %v2320_v21, 8.507059e+37  ;;  %v1385_v32 = vmul.f32 %v4349_v24, %v5618_v40 }
 0x1e7   : > { %v1616_v36 = vmul.f32 %v4380_v39, %v5648_v47  ;;  %v2343_v38 = vsub.f32 1.0, %v2342_v8  ;;  %v2319_v53 = vsel %vm6013_vm7, %v5869_v20, %v2315_v28  ;;  %v2323_v15 = vor.u32 1.1754944e-38, %v2322_v41 }
 0x1e8   : > { %v6025_v2 = vld [vmem:[#allocation2 + $0x127] sm:$0xff]  ;;  %vm2331_vm1 = vweird.f32 %v5865_v25  ;;  %v1386_v43 = vmul.f32 %v4349_v24, %v5700_v1  ;;  %vm6033_vm9 = vcmp.eq.f32.partialorder %v2335_v19, 8.507059e+37  ;;  %v1482_v40 = vadd.f32 %v1450_v61, %v1385_v32 }
 0x1e9   : > { %v3631_v21 = vpop.eup %3630  ;;  %v3334_v47 = vmul.f32 -1.442695, %v6007_v17  ;;  %v1515_v8 = vmul.f32 %v4358_v29, %v6025_v2  ;;  %v1013_v37 = vmul.f32 %v5947_v6, %v1012_v5  ;;  %v2330_v20 = vadd.f32 %v5928_v34, %v2329_v52  ;;  %v6043_v41 = vld [vmem:[#allocation2 + $0x12f] sm:$0xff] }
 0x1ea   : > { %vm2332_vm10 = vweird.f32 %v5928_v34  ;;  %v2338_v28 = vor.u32 1.1754944e-38, %v2337_v60  ;;  %3634 = vpow2.f32 %v3308_v49  ;;  %v6045_v1 = vpop.eup %3632  ;;  %v2324_v19 = vsel %vm6017_vm8, %v2323_v15, %v2319_v53 }
 0x1eb   : > { %v2344_v61 = vmul.f32 %v5962_v18, %v2343_v38  ;;  %v1451_v32 = vmul.f32 %v4352_v63, %v5845_v44  ;;  %v1547_v50 = vadd.f32 %v1515_v8, %v1482_v40  ;;  %v1681_v5 = vmul.f32 %v7649_v42, %v5782_v12  ;;  %vm6060_vm11 = vmor %vm2331_vm1, %vm2332_vm10 }
 0x1ec   : > { %v6054_v52 = vadd.f32 1.0, %v3631_v21  ;;  %v1019_v60 = vand.u32 2147483647, %v5901_v23  ;;  %v1021_v49 = vand.u32 2147483648, %v5901_v23  ;;  %3636 = vpow2.f32 %v3334_v47  ;;  %v7688_v21 = vld [vmem:[#allocation61_spill] sm:$0xff] }
 0x1ed   : > { %v1516_v38 = vmul.f32 %v4358_v29, %v6043_v41  ;;  %v1014_v53 = vadd.f32 %v5947_v6, %v1013_v37  ;;  %vm1016_vm12 = vweird.f32 %v5947_v6  ;;  %v2334_v15 = vsel %vm6060_vm11, %v5928_v34, %v2330_v20 }
 0x1ee   : > { %v6072_v40 = vmul.f32 %v2324_v19, %v7688_v21  ;;  %v2357_v25 = vmul.f32 %v6045_v1, %v5978_v10  ;;  %v1648_v8 = vadd.f32 %v1616_v36, %v1547_v50  ;;  %v2345_v47 = vadd.f32 %v5962_v18, %v2344_v61  ;;  %v6083_v19 = vld [vmem:[#allocation2 + $0x128] sm:$0xff] }
 0x1ef   : > { %vm2347_vm13 = vweird.f32 %v5962_v18  ;;  %v1483_v58 = vadd.f32 %v1451_v32, %v1386_v43  ;;  %vm1015_vm14 = vweird.f32 %v5901_v23  ;;  %vm2346_vm15 = vweird.f32 %v5909_v54 }
 0x1f0   : > { %7689 = vst [vmem:[#allocation61_spill] sm:$0xff] %v6072_v40  ;;  %v3635_v37 = vpop.eup %3634  ;;  %v2352_v13 = vand.u32 2147483648, %v5909_v54  ;;  %3638 = vrcp.f32 %v6054_v52  ;;  %vm1017_vm2 = vmor %vm1015_vm14, %vm1016_vm12  ;;  %v1022_v34 = vor.u32 1.1754944e-38, %v1021_v49  ;;  %v2350_v20 = vand.u32 2147483647, %v5909_v54 }
 0x1f1   : > { %v1548_v50 = vadd.f32 %v1516_v38, %v1483_v58  ;;  %v1018_v36 = vsel %vm1017_vm2, %v5947_v6, %v1014_v53  ;;  %vm1020_vm3 = vcmp.eq.f32.partialorder %v1019_v60, 8.507059e+37  ;;  %v2339_v23 = vsel %vm6033_vm9, %v2338_v28, %v2334_v15  ;;  %vm6090_vm4 = vmor %vm2346_vm15, %vm2347_vm13 }
 0x1f2   : > { %v2358_v61 = vsub.f32 1.0, %v2357_v25  ;;  %v1713_v32 = vadd.f32 %v1681_v5, %v1648_v8  ;;  %v1023_v49 = vsel %vm1020_vm3, %v1022_v34, %v1018_v36  ;;  %v3637_v21 = vpop.eup %3636  ;;  %v1617_v54 = vmul.f32 %v4380_v39, %v5720_v16  ;;  %v1367_v5 = vld [vmem:[#allocation2 + $0x20f] sm:$0xff] }
 0x1f3   : > { %v2349_v58 = vsel %vm6090_vm4, %v5962_v18, %v2345_v47  ;;  %v1238_v6 = vmul.f32 %v1023_v49, %v5753_v35  ;;  %v6100_v4 = vadd.f32 1.0, %v3635_v37  ;;  %v2717_v28 = vadd.f32 %v5994_v51, %v5982_v48 }
 0x1f4   : > { %v2718_v60 = vsel %vm7522_vm0, %v6072_v40, 0.0  ;;  %v2353_v38 = vor.u32 1.1754944e-38, %v2352_v13  ;;  %v1746_v53 = vmul.f32 %v4419_v7, %v6083_v19  ;;  %v6109_v16 = vmul.f32 %v2339_v23, %v5745_v57 }
 0x1f5   : > { %vm2351_vm5 = vcmp.eq.f32.partialorder %v2350_v20, 8.507059e+37  ;;  %v1649_v18 = vadd.f32 %v1617_v54, %v1548_v50  ;;  %1318 = vst.msk [vmem:[#allocation2 + $0x148] sm:$0xff] %vm7522_vm0, %v1238_v6  ;;  %3640 = vrcp.f32 %v6100_v4  ;;  %v2359_v51 = vmul.f32 %v6045_v1, %v2358_v61  ;;  %v6139_v50 = vld [vmem:[#allocation2 + $0x130] sm:$0xff] }
 0x1f6   : > { %7692 = vst [vmem:[#allocation65_spill] sm:$0xff] %v6109_v16  ;;  %v6113_v35 = vpop.eup %3638  ;;  %v2354_v48 = vsel %vm2351_vm5, %v2353_v38, %v2349_v58  ;;  %v6116_v15 = vadd.f32 1.0, %v3637_v21  ;;  %v1778_v25 = vadd.f32 %v1746_v53, %v1713_v32  ;;  %v6120_v8 = vmul.f32 %v4358_v29, %v5976_v9  ;;  %v6176_v38 = vld [vmem:[#allocation2 + $0x129] sm:$0xff] }
 0x1f7   : > { %v6123_v57 = vmul.f32 %v4358_v29, %v1367_v5  ;;  %v1847_v47 = vmul.f32 %v7640_v3, %v5724_v11  ;;  %v1682_v37 = vmul.f32 %v7649_v42, %v5895_v26  ;;  %v2719_v13 = vadd.f32 %v2718_v60, %v2717_v28 }
 0x1f8   : > { %v1848_v34 = vmul.f32 %v7640_v3, %v5774_v0  ;;  %v6133_v20 = vmul.f32 %v4349_v24, %v5726_v56  ;;  %v6137_v9 = vmul.f32 %v4380_v39, %v5782_v12  ;;  %v2720_v11 = vsel %vm7522_vm0, %v6109_v16, 0.0 }
 0x1f9   : > { %v6144_v36 = vmul.f32 %v2354_v48, %v5777_v31  ;;  %v2372_v23 = vmul.f32 %v6113_v35, %v6054_v52  ;;  %v1714_v0 = vadd.f32 %v1682_v37, %v1649_v18  ;;  %v2360_v43 = vadd.f32 %v6045_v1, %v2359_v51 }
 0x1fa   : > { %vm2362_vm6 = vweird.f32 %v6045_v1  ;;  %3642 = vrcp.f32 %v6116_v15  ;;  %v1879_v56 = vadd.f32 %v1847_v47, %v1778_v25  ;;  %v2365_v61 = vand.u32 2147483647, %v5978_v10  ;;  %v7696_v47 = vld [vmem:[#allocation14_spill] sm:$0xff] }
 0x1fb   : > { %7693 = vst [vmem:[#allocation66_spill] sm:$0xff] %v6144_v36  ;;  %v6151_v12 = vpop.eup %3640  ;;  %v2367_v32 = vand.u32 2147483648, %v5978_v10  ;;  %v6157_v31 = vmul.f32 %v4349_v24, %v5845_v44  ;;  %v1747_v49 = vmul.f32 %v4419_v7, %v6139_v50  ;;  %vm2361_vm7 = vweird.f32 %v5978_v10 }
 0x1fc   : > { %v6164_v21 = vmul.f32 %v4380_v39, %v5895_v26  ;;  %v1912_v54 = vmul.f32 %v4452_v55, %v5883_v22  ;;  %v1026_v58 = vmul.f32 %v6151_v12, %v6100_v4  ;;  %v2721_v6 = vadd.f32 %v2720_v11, %v2719_v13  ;;  %vm6170_vm8 = vmor %vm2361_vm7, %vm2362_vm6 }
 0x1fd   : > { %v2722_v44 = vsel %vm7522_vm0, %v6144_v36, 0.0  ;;  %v2373_v60 = vsub.f32 1.0, %v2372_v23  ;;  %v1779_v10 = vadd.f32 %v1747_v49, %v1714_v0  ;;  %v2364_v26 = vsel %vm6170_vm8, %v6045_v1, %v2360_v43  ;;  %v1369_v36 = vld [vmem:[#allocation2 + $0x22f] sm:$0xff] }
 0x1fe   : > { %v6183_v53 = vmul.f32 %v7640_v3, %v5883_v22  ;;  %v6187_v18 = vmul.f32 %v7640_v3, %v5942_v33  ;;  %v1944_v48 = vadd.f32 %v1912_v54, %v1879_v56  ;;  %vm2366_vm1 = vcmp.eq.f32.partialorder %v2365_v61, 8.507059e+37  ;;  %v6198_v22 = vld [vmem:[%s7481_s3 + $0x8] ss:$0 sm:$0xff] }
 0x1ff   : > { %v2368_v51 = vor.u32 1.1754944e-38, %v2367_v32  ;;  %v1913_v25 = vmul.f32 %v4452_v55, %v5942_v33  ;;  %v1401_v37 = vmul.f32 %v4349_v24, %v7696_v47  ;;  %v2723_v1 = vadd.f32 %v2722_v44, %v2721_v6  ;;  %v7698_v44 = vld [vmem:[#allocation60_spill] sm:$0xff] }
 0x200   : > { %v6193_v13 = vpop.eup %3642  ;;  %v1977_v11 = vmul.f32 %v6198_v22, %v6176_v38  ;;  %v1027_v23 = vsub.f32 1.0, %v1026_v58  ;;  %v1402_v0 = vmul.f32 %v4349_v24, %v5951_v62  ;;  %v2374_v33 = vmul.f32 %v6113_v35, %v2373_v60  ;;  %v1354_v58 = vld [vmem:[#allocation2 + $0x147] sm:$0xff] }
 0x201   : > { %v2369_v43 = vsel %vm2366_vm1, %v2368_v51, %v2364_v26  ;;  %v1880_v56 = vadd.f32 %v1848_v34, %v1779_v10  ;;  %v1467_v61 = vmul.f32 %v4352_v63, %v1367_v5  ;;  %vm1031_vm9 = vweird.f32 %v6151_v12  ;;  %v7697_v62 = vld [vmem:[#allocation54_spill] sm:$0xff]  ;;  %v7699_v34 = vld [vmem:[#allocation15_spill] sm:$0xff] }
 0x202   : > { %v2009_v32 = vadd.f32 %v1977_v11, %v1944_v48  ;;  %v1028_v49 = vmul.f32 %v6151_v12, %v1027_v23  ;;  %v1036_v54 = vand.u32 2147483648, %v6100_v4  ;;  %v2387_v6 = vmul.f32 %v6193_v13, %v6116_v15  ;;  %v6230_v11 = vld [vmem:[#allocation2 + $0x131] sm:$0xff]  ;;  %v6237_v23 = vld [vmem:[%s7482_s4] ss:$0 sm:$0xff] }
 0x203   : > { %v1034_v28 = vand.u32 2147483647, %v6100_v4  ;;  %v6214_v26 = vadd.f32 %v7698_v44, %v7697_v62  ;;  %v6218_v5 = vadd.f32 %v5967_v27, %v7699_v34  ;;  %v2380_v60 = vand.u32 2147483647, %v6054_v52  ;;  %v1368_v34 = vld [vmem:[#allocation2 + $0x227] sm:$0xff] }
 0x204   : > { %v1452_v10 = vmul.f32 %v4352_v63, %v6025_v2  ;;  %v1029_v48 = vadd.f32 %v6151_v12, %v1028_v49  ;;  %vm1030_vm10 = vweird.f32 %v6100_v4  ;;  %v6226_v51 = vmul.f32 %v2369_v43, %v5843_v45 }
 0x205   : > { %v2375_v47 = vadd.f32 %v6113_v35, %v2374_v33  ;;  %vm2377_vm11 = vweird.f32 %v6113_v35  ;;  %v1945_v27 = vadd.f32 %v1913_v25, %v1880_v56  ;;  %vm1032_vm12 = vmor %vm1030_vm10, %vm1031_vm9  ;;  %v6240_v4 = vadd.f32 %v6237_v23, %v2009_v32 }
 0x206   : > { %7700 = vst [vmem:[#allocation14_spill] sm:$0xff] %v6226_v51  ;;  %v1517_v45 = vmul.f32 %v4358_v29, %v1354_v58  ;;  %v1033_v43 = vsel %vm1032_vm12, %v6151_v12, %v1029_v48  ;;  %v1037_v33 = vor.u32 1.1754944e-38, %v1036_v54  ;;  %v2382_v49 = vand.u32 2147483648, %v6054_v52 }
 0x207   : > { %v2388_v62 = vsub.f32 1.0, %v2387_v6  ;;  %vm1035_vm13 = vcmp.eq.f32.partialorder %v1034_v28, 8.507059e+37  ;;  %v6246_v25 = vadd.f32 %v5986_v46, %v1401_v37  ;;  %vm2376_vm14 = vweird.f32 %v6054_v52 }
 0x208   : > { %v1484_v56 = vadd.f32 %v1452_v10, %v6133_v20  ;;  %v1978_v32 = vmul.f32 %v6198_v22, %v6230_v11  ;;  %v1038_v44 = vsel %vm1035_vm13, %v1037_v33, %v1033_v43  ;;  %v2724_v12 = vsel %vm7522_vm0, %v6226_v51, 0.0  ;;  %vm6256_vm15 = vmor %vm2376_vm14, %vm2377_vm11 }
 0x209   : > { %vm6260_vm2 = vcmp.eq.f32.partialorder %v2380_v60, 8.507059e+37  ;;  %v1239_v52 = vmul.f32 %v1038_v44, %v5990_v59  ;;  %v1499_v20 = vadd.f32 %v1467_v61, %v1402_v0  ;;  %v2379_v37 = vsel %vm6256_vm15, %v6113_v35, %v2375_v47  ;;  %v7705_v0 = vld [vmem:[#allocation51_spill] sm:$0xff] }
 0x20a   : > { %v2010_v6 = vadd.f32 %v1978_v32, %v1945_v27  ;;  %v3335_v28 = vmul.f32 -1.442695, %v6240_v4  ;;  %v1549_v10 = vadd.f32 %v1517_v45, %v1484_v56  ;;  %v2383_v48 = vor.u32 1.1754944e-38, %v2382_v49 }
 0x20b   : > { %v2389_v43 = vmul.f32 %v6193_v13, %v2388_v62  ;;  %1319 = vst.msk [vmem:[#allocation2 + $0x150] sm:$0xff] %vm7522_vm0, %v1239_v52  ;;  %v1531_v60 = vmul.f32 %v4358_v29, %v1368_v34  ;;  %v1532_v33 = vmul.f32 %v4358_v29, %v1369_v36  ;;  %v2725_v51 = vadd.f32 %v2724_v12, %v2723_v1 }
 0x20c   : > { %v1389_v59 = vmul.f32 %v4349_v24, %v6025_v2  ;;  %v1453_v35 = vmul.f32 %v4352_v63, %v6043_v41  ;;  %v6279_v61 = vadd.f32 %v5974_v30, %v7705_v0  ;;  %v2384_v47 = vsel %vm6260_vm2, %v2383_v48, %v2379_v37 }
 0x20d   : > { %v2395_v27 = vand.u32 2147483647, %v6116_v15  ;;  %v2397_v45 = vand.u32 2147483648, %v6116_v15  ;;  %v1620_v36 = vmul.f32 %v4380_v39, %v6083_v19  ;;  %v6288_v1 = vadd.f32 %v6237_v23, %v2010_v6 }
 0x20e   : > { %3644 = vpow2.f32 %v3335_v28  ;;  %v1454_v2 = vmul.f32 %v4352_v63, %v1354_v58  ;;  %v1650_v49 = vadd.f32 %v6137_v9, %v1549_v10  ;;  %v2390_v30 = vadd.f32 %v6193_v13, %v2389_v43 }
 0x20f   : > { %vm2392_vm3 = vweird.f32 %v6193_v13  ;;  %v1683_v62 = vmul.f32 %v7649_v42, %v6083_v19  ;;  %v1390_v56 = vmul.f32 %v4349_v24, %v6043_v41  ;;  %v6299_v32 = vmul.f32 %v2384_v47, %v5931_v14  ;;  %v1585_v14 = vld [vmem:[#allocation2 + $0x148] sm:$0xff] }
 0x210   : > { %v1485_v44 = vadd.f32 %v1453_v35, %v6157_v31  ;;  %v6304_v34 = vmul.f32 %v4380_v39, %v6139_v50  ;;  %v1391_v9 = vmul.f32 %v4349_v24, %v1354_v58  ;;  %vm2391_vm4 = vweird.f32 %v6116_v15 }
 0x211   : > { %7706 = vst [vmem:[#allocation54_spill] sm:$0xff] %v6299_v32  ;;  %vm6308_vm5 = vcmp.eq.f32.partialorder %v2395_v27, 8.507059e+37  ;;  %v2398_v19 = vor.u32 1.1754944e-38, %v2397_v45  ;;  %v1684_v41 = vmul.f32 %v7649_v42, %v6139_v50  ;;  %vm6314_vm6 = vmor %vm2391_vm4, %vm2392_vm3  ;;  %v6320_v31 = vmul.f32 %v7640_v3, %v6176_v38  ;;  %v7712_v45 = vld [vmem:[#allocation17_spill] sm:$0xff] }
 0x212   : > { %v3336_v58 = vmul.f32 -1.442695, %v6288_v1  ;;  %v1486_v15 = vadd.f32 %v1454_v2, %v1389_v59  ;;  %v1715_v46 = vadd.f32 %v1683_v62, %v1650_v49  ;;  %v1355_v52 = vld [vmem:[#allocation2 + $0x14f] sm:$0xff]  ;;  %v2394_v37 = vsel %vm6314_vm6, %v6193_v13, %v2390_v30 }
 0x213   : > { %v6328_v50 = vmul.f32 %v7640_v3, %v6230_v11  ;;  %v1914_v6 = vmul.f32 %v4452_v55, %v6176_v38  ;;  %v1518_v28 = vmul.f32 %v4358_v29, %v1355_v52  ;;  %v2726_v48 = vsel %vm7522_vm0, %v6299_v32, 0.0  ;;  %v7711_v59 = vld [vmem:[#allocation16_spill] sm:$0xff] }
 0x214   : > { %v3645_v10 = vpop.eup %3644  ;;  %v6337_v43 = vmul.f32 %v4452_v55, %v6230_v11  ;;  %v1488_v35 = vadd.f32 %v7711_v59, %v1391_v9  ;;  %v1748_v13 = vmul.f32 %v4419_v7, %v1585_v14  ;;  %v1455_v0 = vmul.f32 %v4352_v63, %v1355_v52  ;;  %v6353_v62 = vld [vmem:[#allocation2 + $0x150] sm:$0xff]  ;;  %v3732_v9 = vld [vmem:[#allocation2 + $0x1c8] sm:$0xff] }
 0x215   : > { %v1550_v47 = vadd.f32 %v1518_v28, %v1485_v44  ;;  %v1561_v38 = vadd.f32 %v6120_v8, %v6214_v26  ;;  %v1562_v29 = vadd.f32 %v6123_v57, %v6218_v5  ;;  %v2399_v27 = vsel %vm6308_vm5, %v2398_v19, %v2394_v37  ;;  %v7713_v8 = vld [vmem:[#allocation31_spill] sm:$0xff]  ;;  %v3733_v19 = vld [vmem:[#allocation2 + $0x1d0] sm:$0xff]  ;;  %v7715_v28 = vld [vmem:[#allocation22_spill] sm:$0xff] }
 0x216   : > { %3646 = vpow2.f32 %v3336_v58  ;;  %v1551_v11 = vadd.f32 %v7712_v45, %v1486_v15  ;;  %v1780_v2 = vadd.f32 %v1748_v13, %v1715_v46  ;;  %v6349_v49 = vadd.f32 %v2726_v48, %v2725_v51  ;;  %v6358_v5 = vld [vmem:[#allocation2 + $0x1e8] sm:$0xff]  ;;  %v1596_v46 = vld [vmem:[#allocation2 + $0x1f0] sm:$0xff] }
 0x217   : > { %v6351_v30 = vadd.f32 1.0, %v3645_v10  ;;  %v1563_v63 = vadd.f32 %v1531_v60, %v6246_v25  ;;  %v1564_v44 = vadd.f32 %v1532_v33, %v1499_v20  ;;  %v1553_v26 = vadd.f32 %v7713_v8, %v1488_v35  ;;  %v7716_v10 = vld [vmem:[#allocation38_spill] sm:$0xff]  ;;  %v7720_v45 = vld [vmem:[#allocation35_spill] sm:$0xff] }
 0x218   : > { %v1651_v57 = vadd.f32 %v6164_v21, %v1550_v47  ;;  %v1630_v12 = vmul.f32 %v3732_v9, %v4380_v39  ;;  %v1631_v51 = vmul.f32 %v3733_v19, %v4380_v39  ;;  %v6363_v54 = vmul.f32 %v2399_v27, %v6007_v17  ;;  %v7719_v47 = vld [vmem:[#allocation21_spill] sm:$0xff] }
 0x219   : > { %v1622_v58 = vmul.f32 %v4380_v39, %v1585_v14  ;;  %v1487_v15 = vadd.f32 %v1455_v0, %v1390_v56  ;;  %v1632_v25 = vmul.f32 %v4380_v39, %v6358_v5  ;;  %v1652_v20 = vadd.f32 %v1620_v36, %v1551_v11 }
 0x21a   : > { %7714 = vst [vmem:[#allocation60_spill] sm:$0xff] %v6363_v54  ;;  %v1881_v21 = vadd.f32 %v6183_v53, %v1780_v2  ;;  %v1716_v60 = vadd.f32 %v1684_v41, %v1651_v57  ;;  %v1749_v33 = vmul.f32 %v4419_v7, %v6353_v62  ;;  %3648 = vrcp.f32 %v6351_v30  ;;  %v7717_v53 = vld [vmem:[#allocation55_spill] sm:$0xff]  ;;  %v7718_v41 = vld [vmem:[#allocation46_spill] sm:$0xff] }
 0x21b   : > { %v1392_v37 = vmul.f32 %v4349_v24, %v1355_v52  ;;  %v1633_v17 = vmul.f32 %v4380_v39, %v1596_v46  ;;  %v1659_v56 = vadd.f32 %v7716_v10, %v7715_v28  ;;  %v1654_v59 = vadd.f32 %v1622_v58, %v1553_v26  ;;  %v6384_v24 = vld [vmem:[#allocation2 + $0x149] sm:$0xff]  ;;  %v2783_v52 = vld [vmem:[%s7483_s5 + $0x18] sm:$0xff] }
 0x21c   : > { %v3647_v48 = vpop.eup %3646  ;;  %v1685_v36 = vmul.f32 %v7649_v42, %v1585_v14  ;;  %v1781_v35 = vadd.f32 %v1749_v33, %v1716_v60  ;;  %v1660_v13 = vadd.f32 %v7718_v41, %v7717_v53  ;;  %v6381_v0 = vsel %vm7522_vm0, %v6363_v54, 0.0  ;;  %v2782_v14 = vld [vmem:[%s7483_s5 + $0x10] sm:$0xff]  ;;  %2800 = vmatpush.msrb.mxu1 %v2783_v52  ;;  %v2781_v28 = vld [vmem:[%s7483_s5 + $0x8] sm:$0xff] }
 0x21d   : > { %v1552_v27 = vadd.f32 %v7719_v47, %v1487_v15  ;;  %v1661_v11 = vadd.f32 %v7720_v45, %v6279_v61  ;;  %v1662_v2 = vadd.f32 %v1630_v12, %v1561_v38  ;;  %v1946_v57 = vadd.f32 %v1914_v6, %v1881_v21  ;;  %v7721_v60 = vld [vmem:[#allocation20_spill] sm:$0xff]  ;;  %v7722_v61 = vld [vmem:[#allocation18_spill] sm:$0xff]  ;;  %v1597_v6 = vld [vmem:[#allocation2 + $0x208] sm:$0xff] }
 0x21e   : > { %v1717_v8 = vadd.f32 %v1685_v36, %v1652_v20  ;;  %v1882_v26 = vadd.f32 %v6187_v18, %v1781_v35  ;;  %v6395_v9 = vadd.f32 %v1631_v51, %v1562_v29  ;;  %v6397_v58 = vadd.f32 1.0, %v3647_v48  ;;  %2801 = vmatpush.msrb.mxu1 %v2782_v14  ;;  %v6415_v21 = vld [vmem:[#allocation2 + $0x151] sm:$0xff] }
 0x21f   : > { %v2412_v15 = vand.u32 2147483648, %v6351_v30  ;;  %v1489_v33 = vadd.f32 %v7721_v60, %v1392_v37  ;;  %v6404_v10 = vadd.f32 %v1632_v25, %v1563_v63  ;;  %v1719_v38 = vadd.f32 %v7722_v61, %v1654_v59  ;;  %v2780_v63 = vld [vmem:[%s7483_s5] sm:$0xff]  ;;  %v7724_v35 = vld [vmem:[#allocation40_spill] sm:$0xff] }
 0x220   : > { %v1979_v18 = vmul.f32 %v6198_v22, %v6384_v24  ;;  %v6409_v29 = vadd.f32 %v1633_v17, %v1564_v44  ;;  %v1694_v12 = vmul.f32 %v3733_v19, %v7649_v42  ;;  %v6412_v51 = vpop.eup %3648  ;;  %v1653_v20 = vadd.f32 %v6304_v34, %v1552_v27  ;;  %v7723_v17 = vld [vmem:[#allocation19_spill] sm:$0xff]  ;;  %2802 = vmatpush.msrb.mxu1 %v2781_v28  ;;  %v7725_v52 = vld [vmem:[#allocation32_spill] sm:$0xff] }
 0x221   : > { %v1695_v25 = vmul.f32 %v7649_v42, %v6358_v5  ;;  %v1696_v37 = vmul.f32 %v7649_v42, %v1596_v46  ;;  %v6424_v44 = vmul.f32 %v7649_v42, %v1597_v6  ;;  %v1782_v48 = vadd.f32 %v7723_v17, %v1717_v8  ;;  %v7727_v45 = vld [vmem:[#allocation52_spill] sm:$0xff] }
 0x222   : > { %v1947_v34 = vadd.f32 %v6337_v43, %v1882_v26  ;;  %v2011_v59 = vadd.f32 %v1979_v18, %v1946_v57  ;;  %v6429_v36 = vor.u32 1.1754944e-38, %v2412_v15  ;;  %3650 = vrcp.f32 %v6397_v58  ;;  %2803 = vmatpush.msrb.mxu1 %v2780_v63  ;;  %v7726_v43 = vld [vmem:[#allocation47_spill] sm:$0xff]  ;;  %v1598_v15 = vld [vmem:[#allocation2 + $0x210] sm:$0xff] }
 0x223   : > { %v1554_v53 = vadd.f32 %v7724_v35, %v1489_v33  ;;  %v1686_v41 = vmul.f32 %v7649_v42, %v6353_v62  ;;  %v2402_v47 = vmul.f32 %v6412_v51, %v6351_v30  ;;  %v1980_v27 = vmul.f32 %v6198_v22, %v6415_v21  ;;  %v7728_v60 = vld [vmem:[#allocation56_spill] sm:$0xff] }
 0x224   : > { %v1723_v14 = vadd.f32 %v7726_v43, %v7725_v52  ;;  %v1724_v8 = vadd.f32 %v7727_v45, %v1659_v56  ;;  %v1623_v26 = vmul.f32 %v4380_v39, %v6353_v62  ;;  %v1725_v33 = vadd.f32 %v7728_v60, %v1660_v13  ;;  %v7729_v52 = vld [vmem:[#allocation33_spill] sm:$0xff] }
 0x225   : > { %v1718_v57 = vadd.f32 %v1686_v41, %v1653_v20  ;;  %v1758_v28 = vmul.f32 %v4419_v7, %v6358_v5  ;;  %v2012_v61 = vadd.f32 %v1980_v27, %v1947_v34  ;;  %v6448_v18 = vadd.f32 %v6237_v23, %v2011_v59  ;;  %v7730_v59 = vld [vmem:[#allocation24_spill] sm:$0xff] }
 0x226   : > { %v1726_v63 = vadd.f32 %v1694_v12, %v1661_v11  ;;  %v1759_v17 = vmul.f32 %v4419_v7, %v1596_v46  ;;  %v1655_v35 = vadd.f32 %v1623_v26, %v1554_v53  ;;  %v1784_v56 = vadd.f32 %v7729_v52, %v1719_v38  ;;  %v7731_v11 = vld [vmem:[#allocation57_spill] sm:$0xff]  ;;  %v7732_v46 = vld [vmem:[#allocation59_spill] sm:$0xff] }
 0x227   : > { %v1727_v43 = vadd.f32 %v1695_v25, %v1662_v2  ;;  %v1760_v39 = vmul.f32 %v4419_v7, %v1597_v6  ;;  %v2403_v62 = vsub.f32 1.0, %v2402_v47  ;;  %v1883_v13 = vadd.f32 %v6320_v31, %v1782_v48  ;;  %v6465_v25 = vld [vmem:[#allocation2 + $0x1b1] sm:$0xff]  ;;  %v7733_v48 = vld [vmem:[#allocation23_spill] sm:$0xff] }
 0x228   : > { %v1698_v5 = vmul.f32 %v7649_v42, %v1598_v15  ;;  %v6456_v34 = vpop.eup %3650  ;;  %v1783_v41 = vadd.f32 %v7730_v59, %v1718_v57  ;;  %v1788_v12 = vadd.f32 %v7731_v11, %v1723_v14  ;;  %v1789_v53 = vadd.f32 %v7732_v46, %v1724_v8  ;;  %v3734_v31 = vld [vmem:[#allocation2 + $0x191] sm:$0xff]  ;;  %v6469_v26 = vld [vmem:[#allocation2 + $0x1c9] sm:$0xff]  ;;  %v7737_v11 = vld [vmem:[#allocation26_spill] sm:$0xff] }
 0x229   : > { %v1790_v27 = vadd.f32 %v1758_v28, %v1725_v33  ;;  %v6462_v2 = vadd.f32 %v6237_v23, %v2012_v61  ;;  %v3337_v38 = vmul.f32 -1.442695, %v6448_v18  ;;  %v1791_v6 = vadd.f32 %v1759_v17, %v1726_v63  ;;  %v3735_v14 = vld [vmem:[#allocation2 + $0x1a9] sm:$0xff]  ;;  %v7735_v17 = vld [vmem:[#allocation25_spill] sm:$0xff] }
 0x22a   : > { %v1858_v42 = vmul.f32 %v3734_v31, %v7640_v3  ;;  %v1720_v47 = vadd.f32 %v7733_v48, %v1655_v35  ;;  %v1792_v45 = vadd.f32 %v1760_v39, %v1727_v43  ;;  %v1859_v8 = vmul.f32 %v3735_v14, %v7640_v3  ;;  %v1599_v28 = vld [vmem:[#allocation2 + $0x228] sm:$0xff]  ;;  %v7734_v63 = vld [vmem:[#allocation48_spill] sm:$0xff]  ;;  %v7736_v59 = vld [vmem:[#allocation53_spill] sm:$0xff] }
 0x22b   : > { %v1860_v57 = vmul.f32 %v7640_v3, %v6465_v25  ;;  %v2404_v60 = vmul.f32 %v6412_v51, %v2403_v62  ;;  %v6477_v33 = vmul.f32 %v6456_v34, %v6397_v58  ;;  %v1861_v61 = vmul.f32 %v7640_v3, %v6469_v26  ;;  %v1600_v62 = vld [vmem:[#allocation2 + $0x230] sm:$0xff] }
 0x22c   : > { %v1887_v35 = vadd.f32 %v7735_v17, %v7734_v63  ;;  %v1853_v52 = vmul.f32 %v7640_v3, %v6384_v24  ;;  %v1884_v43 = vadd.f32 %v6328_v50, %v1783_v41  ;;  %v1916_v39 = vmul.f32 %v4452_v55, %v6384_v24  ;;  %v7738_v63 = vld [vmem:[#allocation42_spill] sm:$0xff] }
 0x22d   : > { %v1888_v46 = vadd.f32 %v7737_v11, %v7736_v59  ;;  %3652 = vpow2.f32 %v3337_v38  ;;  %v3338_v31 = vmul.f32 -1.442695, %v6462_v2  ;;  %v1728_v48 = vadd.f32 %v1696_v37, %v6395_v9 }
 0x22e   : > { %v1761_v20 = vmul.f32 %v4419_v7, %v1598_v15  ;;  %v1785_v17 = vadd.f32 %v7738_v63, %v1720_v47  ;;  %v1917_v19 = vmul.f32 %v4452_v55, %v6415_v21  ;;  %v1729_v50 = vadd.f32 %v6424_v44, %v6404_v10  ;;  %v1825_v15 = vld [vmem:[#allocation2 + $0x1d1] sm:$0xff]  ;;  %v1826_v44 = vld [vmem:[#allocation2 + $0x1e9] sm:$0xff] }
 0x22f   : > { %v1762_v24 = vmul.f32 %v4419_v7, %v1599_v28  ;;  %v1885_v41 = vadd.f32 %v1853_v52, %v1784_v56  ;;  %v1948_v54 = vadd.f32 %v1916_v39, %v1883_v13  ;;  %v1730_v38 = vadd.f32 %v1698_v5, %v6409_v29  ;;  %v7739_v47 = vld [vmem:[#allocation37_spill] sm:$0xff]  ;;  %v7740_v28 = vld [vmem:[#allocation27_spill] sm:$0xff] }
 0x230   : > { %v1763_v59 = vmul.f32 %v4419_v7, %v1600_v62  ;;  %v1854_v9 = vmul.f32 %v7640_v3, %v6415_v21  ;;  %v1949_v37 = vadd.f32 %v1917_v19, %v1884_v43  ;;  %v1889_v11 = vadd.f32 %v7739_v47, %v1788_v12  ;;  %v1827_v5 = vld [vmem:[#allocation2 + $0x1f1] sm:$0xff] }
 0x231   : > { %v1890_v63 = vadd.f32 %v1858_v42, %v1789_v53  ;;  %v2418_v32 = vsub.f32 1.0, %v6477_v33  ;;  %3654 = vpow2.f32 %v3338_v31  ;;  %v1793_v10 = vadd.f32 %v1761_v20, %v1728_v48  ;;  %v7741_v12 = vld [vmem:[#allocation29_spill] sm:$0xff]  ;;  %v7742_v20 = vld [vmem:[#allocation30_spill] sm:$0xff] }
 0x232   : > { %v1862_v56 = vmul.f32 %v7640_v3, %v1825_v15  ;;  %v6507_v13 = vadd.f32 %v6412_v51, %v2404_v60  ;;  %v1886_v29 = vadd.f32 %v1854_v9, %v1785_v17  ;;  %v1794_v7 = vadd.f32 %v1762_v24, %v1729_v50 }
 0x233   : > { %v1863_v21 = vmul.f32 %v7640_v3, %v1826_v44  ;;  %v3653_v19 = vpop.eup %3652  ;;  %v1950_v52 = vadd.f32 %v7740_v28, %v1885_v41  ;;  %v2013_v53 = vadd.f32 %v7741_v12, %v1948_v54  ;;  %v1795_v42 = vadd.f32 %v1763_v59, %v1730_v38  ;;  %v1828_v54 = vld [vmem:[#allocation2 + $0x209] sm:$0xff] }
 0x234   : > { %v1864_v43 = vmul.f32 %v7640_v3, %v1827_v5  ;;  %v2014_v39 = vadd.f32 %v7742_v20, %v1949_v37  ;;  %v1891_v62 = vadd.f32 %v1859_v8, %v1790_v27  ;;  %v1892_v31 = vadd.f32 %v1860_v57, %v1791_v6  ;;  %v7743_v59 = vld [vmem:[#allocation28_spill] sm:$0xff]  ;;  %v7744_v8 = vld [vmem:[#allocation39_spill] sm:$0xff] }
 0x235   : > { %v1922_v60 = vmul.f32 %v3735_v14, %v4452_v55  ;;  %v1893_v48 = vadd.f32 %v1861_v61, %v1792_v45  ;;  %v1894_v17 = vadd.f32 %v1862_v56, %v1793_v10  ;;  %v1923_v50 = vmul.f32 %v4452_v55, %v6465_v25  ;;  %v7745_v61 = vld [vmem:[#allocation41_spill] sm:$0xff]  ;;  %v7746_v56 = vld [vmem:[#allocation43_spill] sm:$0xff] }
 0x236   : > { %v1924_v24 = vmul.f32 %v4452_v55, %v6469_v26  ;;  %v6519_v41 = vadd.f32 1.0, %v3653_v19  ;;  %v1895_v38 = vadd.f32 %v1863_v21, %v1794_v7  ;;  %v1925_v3 = vmul.f32 %v4452_v55, %v1825_v15  ;;  %v1829_v20 = vld [vmem:[#allocation2 + $0x211] sm:$0xff] }
 0x237   : > { %v1951_v9 = vadd.f32 %v7743_v59, %v1886_v29  ;;  %v3655_v27 = vpop.eup %3654  ;;  %v1926_v6 = vmul.f32 %v4452_v55, %v1826_v44  ;;  %v1927_v45 = vmul.f32 %v4452_v55, %v1827_v5  ;;  %v1928_v14 = vmul.f32 %v4452_v55, %v1828_v54 }
 0x238   : > { %v1952_v57 = vadd.f32 %v7744_v8, %v1887_v35  ;;  %v1953_v37 = vadd.f32 %v7745_v61, %v1888_v46  ;;  %v1954_v47 = vadd.f32 %v1922_v60, %v1889_v11  ;;  %v1986_v10 = vmul.f32 %v6198_v22, %v6465_v25  ;;  %v7747_v46 = vld [vmem:[#allocation44_spill] sm:$0xff] }
 0x239   : > { %v2015_v7 = vadd.f32 %v7746_v56, %v1950_v52  ;;  %v1955_v21 = vadd.f32 %v1923_v50, %v1890_v63  ;;  %v1956_v19 = vadd.f32 %v1924_v24, %v1891_v62  ;;  %v1987_v29 = vmul.f32 %v6198_v22, %v6469_v26  ;;  %v7748_v63 = vld [vmem:[#allocation36_spill] sm:$0xff] }
 0x23a   : > { %v6534_v28 = vadd.f32 %v6237_v23, %v2013_v53  ;;  %v6536_v12 = vadd.f32 1.0, %v3655_v27  ;;  %3656 = vrcp.f32 %v6519_v41  ;;  %v1988_v35 = vmul.f32 %v6198_v22, %v1825_v15 }
 0x23b   : > { %v2016_v11 = vadd.f32 %v7747_v46, %v1951_v9  ;;  %v1957_v25 = vadd.f32 %v1925_v3, %v1892_v31  ;;  %v1989_v52 = vmul.f32 %v6198_v22, %v1826_v44  ;;  %v2017_v62 = vadd.f32 %v7748_v63, %v1952_v57 }
 0x23c   : > { %v6544_v60 = vadd.f32 %v6237_v23, %v2014_v39  ;;  %v1958_v26 = vadd.f32 %v1926_v6, %v1893_v48  ;;  %v1990_v53 = vmul.f32 %v6198_v22, %v1827_v5  ;;  %v2018_v50 = vadd.f32 %v1986_v10, %v1953_v37  ;;  %v1830_v5 = vld [vmem:[#allocation2 + $0x229] sm:$0xff] }
 0x23d   : > { %v6548_v24 = vadd.f32 %v6237_v23, %v2015_v7  ;;  %vm2407_vm7 = vweird.f32 %v6412_v51  ;;  %v1959_v15 = vadd.f32 %v1927_v45, %v1894_v17  ;;  %v1991_v59 = vmul.f32 %v6198_v22, %v1828_v54 }
 0x23e   : > { %v2019_v31 = vadd.f32 %v1987_v29, %v1954_v47  ;;  %v3339_v44 = vmul.f32 -1.442695, %v6534_v28  ;;  %3658 = vrcp.f32 %v6536_v12  ;;  %v1992_v39 = vmul.f32 %v6198_v22, %v1829_v20 }
 0x23f   : > { %v2020_v3 = vadd.f32 %v1988_v35, %v1955_v21  ;;  %v6556_v48 = vadd.f32 %v6237_v23, %v2016_v11  ;;  %vm2406_vm8 = vweird.f32 %v6351_v30  ;;  %v1896_v9 = vadd.f32 %v1864_v43, %v1795_v42  ;;  %v1831_v43 = vld [vmem:[#allocation2 + $0x231] sm:$0xff] }
 0x240   : > { %v2021_v27 = vadd.f32 %v1989_v52, %v1956_v19  ;;  %v6560_v17 = vadd.f32 %v6237_v23, %v2017_v62  ;;  %v3340_v54 = vmul.f32 -1.442695, %v6544_v60  ;;  %v6563_v6 = vpop.eup %3656  ;;  %v1929_v45 = vmul.f32 %v4452_v55, %v1829_v20  ;;  %vm6616_vm10 = vmor %vm2406_vm8, %vm2407_vm7 }
 0x241   : > { %v2022_v8 = vadd.f32 %v1990_v53, %v1957_v25  ;;  %v6567_v57 = vadd.f32 %v6237_v23, %v2018_v50  ;;  %v3341_v61 = vmul.f32 -1.442695, %v6548_v24  ;;  %v1960_v37 = vadd.f32 %v1928_v14, %v1895_v38 }
 0x242   : > { %v2023_v47 = vadd.f32 %v1991_v59, %v1958_v26  ;;  %v6571_v42 = vadd.f32 %v6237_v23, %v2019_v31  ;;  %3660 = vpow2.f32 %v3339_v44  ;;  %v1993_v10 = vmul.f32 %v6198_v22, %v1830_v5 }
 0x243   : > { %v2024_v56 = vadd.f32 %v1992_v39, %v1959_v15  ;;  %v6575_v7 = vadd.f32 %v6237_v23, %v2020_v3  ;;  %v3342_v55 = vmul.f32 -1.442695, %v6556_v48  ;;  %vm2421_vm1 = vweird.f32 %v6397_v58 }
 0x244   : > { %v2432_v21 = vmul.f32 %v6563_v6, %v6519_v41  ;;  %v6582_v38 = vadd.f32 %v6237_v23, %v2021_v27  ;;  %3662 = vpow2.f32 %v3340_v54  ;;  %v3343_v14 = vmul.f32 -1.442695, %v6560_v17  ;;  %v6585_v19 = vpop.eup %3658 }
 0x245   : > { %v7749_v29 = vand.u32 2147483647, %v6351_v30  ;;  %v2419_v46 = vmul.f32 %v6456_v34, %v2418_v32  ;;  %v6597_v11 = vadd.f32 %v6237_v23, %v2022_v8  ;;  %3664 = vpow2.f32 %v3341_v61 }
 0x246   : > { %v3344_v20 = vmul.f32 -1.442695, %v6567_v57  ;;  %v1961_v25 = vadd.f32 %v1929_v45, %v1896_v9  ;;  %v1994_v52 = vmul.f32 %v6198_v22, %v1831_v43  ;;  %v6602_v63 = vadd.f32 %v6237_v23, %v2023_v47 }
 0x247   : > { %vm6589_vm9 = vcmp.eq.f32.partialorder %v7749_v29, 8.507059e+37  ;;  %7752 = vst [vmem:[#allocation15_spill] sm:$0xff] %v6597_v11  ;;  %v3345_v62 = vmul.f32 -1.442695, %v6571_v42  ;;  %v2025_v26 = vadd.f32 %v1993_v10, %v1960_v37  ;;  %v6606_v53 = vadd.f32 %v6237_v23, %v2024_v56 }
 0x248   : > { %7753 = vst [vmem:[#allocation51_spill] sm:$0xff] %v6602_v63  ;;  %3666 = vpow2.f32 %v3342_v55  ;;  %v3346_v32 = vmul.f32 -1.442695, %v6575_v7  ;;  %v3661_v33 = vpop.eup %3660  ;;  %v2433_v50 = vsub.f32 1.0, %v2432_v21  ;;  %v3347_v15 = vmul.f32 -1.442695, %v6582_v38 }
 0x249   : > { %7754 = vst [vmem:[#allocation16_spill] sm:$0xff] %v6606_v53  ;;  %3668 = vpow2.f32 %v3343_v14  ;;  %v2447_v22 = vmul.f32 %v6585_v19, %v6536_v12  ;;  %vm2422_vm11 = vweird.f32 %v6456_v34  ;;  %v2427_v31 = vand.u32 2147483648, %v6397_v58 }
 0x24a   : > { %3670 = vpow2.f32 %v3344_v20  ;;  %v3348_v44 = vmul.f32 -1.442695, %v6597_v11  ;;  %v3663_v39 = vpop.eup %3662  ;;  %v2409_v3 = vsel %vm6616_vm10, %v6412_v51, %v6507_v13  ;;  %v2420_v5 = vadd.f32 %v6456_v34, %v2419_v46  ;;  %vm6640_vm12 = vmor %vm2421_vm1, %vm2422_vm11 }
 0x24b   : > { %3672 = vpow2.f32 %v3345_v62  ;;  %v3349_v30 = vmul.f32 -1.442695, %v6602_v63  ;;  %v3665_v9 = vpop.eup %3664  ;;  %v2026_v27 = vadd.f32 %v1994_v52, %v1961_v25  ;;  %v6630_v54 = vadd.f32 %v6237_v23, %v2025_v26 }
 0x24c   : > { %3674 = vpow2.f32 %v3346_v32  ;;  %v6632_v45 = vadd.f32 1.0, %v3661_v33  ;;  %v2434_v8 = vmul.f32 %v6563_v6, %v2433_v50  ;;  %v3350_v61 = vmul.f32 -1.442695, %v6606_v53 }
 0x24d   : > { %7757 = vst [vmem:[#allocation17_spill] sm:$0xff] %v6630_v54  ;;  %3676 = vpow2.f32 %v3347_v15  ;;  %v2448_v37 = vsub.f32 1.0, %v2447_v22  ;;  %v7760_v47 = vand.u32 2147483647, %v6397_v58  ;;  %v2428_v10 = vor.u32 1.1754944e-38, %v2427_v31 }
 0x24e   : > { %v3667_v51 = vpop.eup %3666  ;;  %3678 = vpow2.f32 %v3348_v44  ;;  %v6650_v56 = vadd.f32 1.0, %v3663_v39  ;;  %v2414_v21 = vsel %vm6589_vm9, %v6429_v36, %v2409_v3  ;;  %v2424_v14 = vsel %vm6640_vm12, %v6456_v34, %v2420_v5 }
 0x24f   : > { %vm6646_vm13 = vcmp.eq.f32.partialorder %v7760_v47, 8.507059e+37  ;;  %v3669_v55 = vpop.eup %3668  ;;  %3680 = vpow2.f32 %v3349_v30  ;;  %v6658_v29 = vadd.f32 1.0, %v3665_v9  ;;  %vm2437_vm14 = vweird.f32 %v6563_v6 }
 0x250   : > { %v3671_v58 = vpop.eup %3670  ;;  %v6662_v46 = vadd.f32 %v6237_v23, %v2026_v27  ;;  %v3351_v20 = vmul.f32 -1.442695, %v6630_v54  ;;  %3682 = vrcp.f32 %v6632_v45  ;;  %v2435_v36 = vadd.f32 %v6563_v6, %v2434_v8 }
 0x251   : > { %v3673_v25 = vpop.eup %3672  ;;  %3684 = vpow2.f32 %v3350_v61  ;;  %v6667_v35 = vadd.f32 1.0, %v3667_v51  ;;  %v2449_v34 = vmul.f32 %v6585_v19, %v2448_v37  ;;  %v6671_v62 = vmul.f32 %v2414_v21, %v6240_v4 }
 0x252   : > { %7763 = vst [vmem:[#allocation31_spill] sm:$0xff] %v6662_v46  ;;  %v3675_v52 = vpop.eup %3674  ;;  %v2442_v26 = vand.u32 2147483648, %v6519_v41  ;;  %v6674_v23 = vadd.f32 1.0, %v3669_v55  ;;  %3686 = vrcp.f32 %v6650_v56  ;;  %vm2436_vm15 = vweird.f32 %v6519_v41 }
 0x253   : > { %7764 = vst [vmem:[#allocation22_spill] sm:$0xff] %v6671_v62  ;;  %v3677_v32 = vpop.eup %3676  ;;  %v2440_v33 = vand.u32 2147483647, %v6519_v41  ;;  %v6679_v50 = vadd.f32 1.0, %v3671_v58  ;;  %3688 = vrcp.f32 %v6658_v29  ;;  %v2429_v4 = vsel %vm6646_vm13, %v2428_v10, %v2424_v14  ;;  %vm6686_vm2 = vmor %vm2436_vm15, %vm2437_vm14 }
 0x254   : > { %v3679_v15 = vpop.eup %3678  ;;  %3690 = vpow2.f32 %v3351_v20  ;;  %v3352_v59 = vmul.f32 -1.442695, %v6662_v46  ;;  %v6691_v31 = vadd.f32 1.0, %v3673_v25  ;;  %v2439_v44 = vsel %vm6686_vm2, %v6563_v6, %v2435_v36 }
 0x255   : > { %v3681_v41 = vpop.eup %3680  ;;  %v2450_v39 = vadd.f32 %v6585_v19, %v2449_v34  ;;  %vm2452_vm3 = vweird.f32 %v6585_v19  ;;  %3692 = vrcp.f32 %v6667_v35  ;;  %v2443_v5 = vor.u32 1.1754944e-38, %v2442_v26 }
 0x256   : > { %v6699_v3 = vpop.eup %3682  ;;  %v6701_v30 = vadd.f32 1.0, %v3675_v52  ;;  %v2457_v9 = vand.u32 2147483648, %v6536_v12  ;;  %3694 = vrcp.f32 %v6674_v23  ;;  %vm2441_vm4 = vcmp.eq.f32.partialorder %v2440_v33, 8.507059e+37 }
 0x257   : > { %v3685_v27 = vpop.eup %3684  ;;  %vm2451_vm5 = vweird.f32 %v6536_v12  ;;  %v2455_v6 = vand.u32 2147483647, %v6536_v12  ;;  %3696 = vrcp.f32 %v6679_v50  ;;  %v6712_v61 = vadd.f32 %v6381_v0, %v6349_v49 }
 0x258   : > { %v6708_v8 = vpop.eup %3686  ;;  %v2444_v37 = vsel %vm2441_vm4, %v2443_v5, %v2439_v44  ;;  %vm6716_vm6 = vmor %vm2451_vm5, %vm2452_vm3  ;;  %v2472_v13 = vand.u32 2147483648, %v6632_v45  ;;  %3698 = vrcp.f32 %v6691_v31  ;;  %v6726_v47 = vsel %vm7522_vm0, %v6671_v62, 0.0 }
 0x259   : > { %v6722_v12 = vpop.eup %3688  ;;  %3700 = vpow2.f32 %v3352_v59  ;;  %v2454_v49 = vsel %vm6716_vm6, %v6585_v19, %v2450_v39  ;;  %v2462_v0 = vmul.f32 %v6699_v3, %v6632_v45  ;;  %v6734_v10 = vmul.f32 %v2429_v4, %v6288_v1 }
 0x25a   : > { %v3691_v43 = vpop.eup %3690  ;;  %v2458_v55 = vor.u32 1.1754944e-38, %v2457_v9  ;;  %v2487_v21 = vand.u32 2147483648, %v6650_v56  ;;  %3702 = vrcp.f32 %v6701_v30  ;;  %v6741_v58 = vmul.f32 %v2444_v37, %v6448_v18 }
 0x25b   : > { %v6738_v14 = vpop.eup %3692  ;;  %vm2456_vm7 = vcmp.eq.f32.partialorder %v2455_v6, 8.507059e+37  ;;  %v2470_v19 = vand.u32 2147483647, %v6632_v45  ;;  %v2477_v20 = vmul.f32 %v6708_v8, %v6650_v56  ;;  %v6750_v36 = vor.u32 1.1754944e-38, %v2472_v13 }
 0x25c   : > { %v6746_v25 = vpop.eup %3694  ;;  %v6748_v1 = vsel %vm2456_vm7, %v2458_v55, %v2454_v49  ;;  %v2492_v34 = vmul.f32 %v6722_v12, %v6658_v29  ;;  %v2502_v52 = vand.u32 2147483648, %v6658_v29  ;;  %v6757_v18 = vadd.f32 1.0, %v3677_v32 }
 0x25d   : > { %v6755_v26 = vpop.eup %3696  ;;  %v2463_v33 = vsub.f32 1.0, %v2462_v0  ;;  %v2485_v4 = vand.u32 2147483647, %v6650_v56  ;;  %v2500_v22 = vand.u32 2147483647, %v6658_v29  ;;  %v6763_v44 = vadd.f32 1.0, %v3679_v15 }
 0x25e   : > { %v6761_v59 = vpop.eup %3698  ;;  %v6765_v39 = vadd.f32 1.0, %v3681_v41  ;;  %v6767_v5 = vor.u32 1.1754944e-38, %v2487_v21  ;;  %v2507_v9 = vmul.f32 %v6738_v14, %v6667_v35  ;;  %v6771_v37 = vadd.f32 1.0, %v3685_v27 }
 0x25f   : > { %v3701_v6 = vpop.eup %3700  ;;  %vm2466_vm8 = vweird.f32 %v6632_v45  ;;  %v2478_v32 = vsub.f32 1.0, %v2477_v20  ;;  %v2517_v51 = vand.u32 2147483648, %v6667_v35  ;;  %v2522_v13 = vmul.f32 %v6746_v25, %v6674_v23 }
 0x260   : > { %v6777_v15 = vpop.eup %3702  ;;  %vm2481_vm1 = vweird.f32 %v6650_v56  ;;  %v2493_v41 = vsub.f32 1.0, %v2492_v34  ;;  %v6780_v49 = vor.u32 1.1754944e-38, %v2502_v52  ;;  %v2515_v0 = vand.u32 2147483647, %v6667_v35 }
 0x261   : > { %v2537_v27 = vmul.f32 %v6755_v26, %v6679_v50  ;;  %v6785_v55 = vadd.f32 1.0, %v3691_v43  ;;  %v2464_v21 = vmul.f32 %v6699_v3, %v2463_v33  ;;  %vm2496_vm9 = vweird.f32 %v6658_v29 }
 0x262   : > { %vm2526_vm10 = vweird.f32 %v6674_v23  ;;  %v2552_v20 = vmul.f32 %v6761_v59, %v6691_v31  ;;  %v6792_v62 = vadd.f32 1.0, %v3701_v6  ;;  %v2508_v34 = vsub.f32 1.0, %v2507_v9 }
 0x263   : > { %vm2511_vm11 = vweird.f32 %v6667_v35  ;;  %v2530_v52 = vand.u32 2147483647, %v6674_v23  ;;  %v2532_v16 = vand.u32 2147483648, %v6674_v23  ;;  %vm6797_vm12 = vcmp.eq.f32.partialorder %v2470_v19, 8.507059e+37 }
 0x264   : > { %v2479_v33 = vmul.f32 %v6708_v8, %v2478_v32  ;;  %v6802_v40 = vor.u32 1.1754944e-38, %v2517_v51  ;;  %v2523_v46 = vsub.f32 1.0, %v2522_v13  ;;  %v2567_v6 = vmul.f32 %v6777_v15, %v6701_v30 }
 0x265   : > { %vm2467_vm13 = vweird.f32 %v6699_v3  ;;  %vm2482_vm14 = vweird.f32 %v6708_v8  ;;  %v2494_v9 = vmul.f32 %v6722_v12, %v2493_v41  ;;  %v2538_v54 = vsub.f32 1.0, %v2537_v27 }
 0x266   : > { %v2465_v19 = vadd.f32 %v6699_v3, %v2464_v21  ;;  %vm6810_vm15 = vcmp.eq.f32.partialorder %v2485_v4, 8.507059e+37  ;;  %v2545_v32 = vand.u32 2147483647, %v6679_v50  ;;  %v2547_v51 = vand.u32 2147483648, %v6679_v50  ;;  %vm6834_vm6 = vmor %vm2466_vm8, %vm2467_vm13 }
 0x267   : > { %v2553_v13 = vsub.f32 1.0, %v2552_v20  ;;  %vm2497_vm2 = vweird.f32 %v6722_v12  ;;  %v2509_v63 = vmul.f32 %v6738_v14, %v2508_v34  ;;  %v2533_v11 = vor.u32 1.1754944e-38, %v2532_v16  ;;  %vm6849_vm8 = vmor %vm2481_vm1, %vm2482_vm14 }
 0x268   : > { %v2480_v41 = vadd.f32 %v6708_v8, %v2479_v33  ;;  %vm6820_vm4 = vcmp.eq.f32.partialorder %v2500_v22, 8.507059e+37  ;;  %v2524_v4 = vmul.f32 %v6746_v25, %v2523_v46  ;;  %vm6825_vm5 = vcmp.eq.f32.partialorder %v2530_v52, 8.507059e+37  ;;  %vm6867_vm1 = vmor %vm2496_vm9, %vm2497_vm2 }
 0x269   : > { %v2568_v20 = vsub.f32 1.0, %v2567_v6  ;;  %3704 = vrcp.f32 %v6757_v18  ;;  %v2495_v22 = vadd.f32 %v6722_v12, %v2494_v9  ;;  %vm2512_vm7 = vweird.f32 %v6738_v14 }
 0x26a   : > { %v2539_v46 = vmul.f32 %v6755_v26, %v2538_v54  ;;  %3706 = vrcp.f32 %v6763_v44  ;;  %v2469_v34 = vsel %vm6834_vm6, %v6699_v3, %v2465_v19  ;;  %vm6853_vm13 = vcmp.eq.f32.partialorder %v2515_v0, 8.507059e+37  ;;  %vm6882_vm9 = vmor %vm2511_vm11, %vm2512_vm7 }
 0x26b   : > { %vm2527_vm0 = vweird.f32 %v6746_v25  ;;  %vm6858_vm3 = vcmp.eq.f32.partialorder %v2545_v32, 8.507059e+37  ;;  %v2548_v33 = vor.u32 1.1754944e-38, %v2547_v51  ;;  %v2554_v3 = vmul.f32 %v6761_v59, %v2553_v13 }
 0x26c   : > { %v2510_v0 = vadd.f32 %v6738_v14, %v2509_v63  ;;  %vm2542_vm14 = vweird.f32 %v6755_v26  ;;  %vm2556_vm6 = vweird.f32 %v6691_v31  ;;  %v2560_v6 = vand.u32 2147483647, %v6691_v31  ;;  %vm6901_vm11 = vmor %vm2526_vm10, %vm2527_vm0 }
 0x26d   : > { %v2484_v9 = vsel %vm6849_vm8, %v6708_v8, %v2480_v41  ;;  %v2525_v63 = vadd.f32 %v6746_v25, %v2524_v4  ;;  %vm2557_vm2 = vweird.f32 %v6761_v59  ;;  %v2569_v19 = vmul.f32 %v6777_v15, %v2568_v20 }
 0x26e   : > { %v6892_v32 = vsel %vm6797_vm12, %v6750_v36, %v2469_v34  ;;  %v2499_v8 = vsel %vm6867_vm1, %v6722_v12, %v2495_v22  ;;  %v2540_v51 = vadd.f32 %v6755_v26, %v2539_v46  ;;  %v2562_v13 = vand.u32 2147483648, %v6691_v31  ;;  %vm6933_vm10 = vmor %vm2556_vm6, %vm2557_vm2 }
 0x26f   : > { %v6907_v41 = vpop.eup %3704  ;;  %vm7791_vm12 = vweird.f32 %v6679_v50  ;;  %v2555_v12 = vadd.f32 %v6761_v59, %v2554_v3  ;;  %vm2571_vm8 = vweird.f32 %v6701_v30  ;;  %vm2572_vm0 = vweird.f32 %v6777_v15 }
 0x270   : > { %vm6911_vm7 = vmor %vm7791_vm12, %vm2542_vm14  ;;  %3708 = vrcp.f32 %v6765_v39  ;;  %v6919_v23 = vpop.eup %3706  ;;  %v6924_v43 = vsel %vm6810_vm15, %v6767_v5, %v2484_v9  ;;  %v2514_v50 = vsel %vm6882_vm9, %v6738_v14, %v2510_v0  ;;  %vm6937_vm1 = vcmp.eq.f32.partialorder %v2560_v6, 8.507059e+37 }
 0x271   : > { %v2577_v53 = vand.u32 2147483648, %v6701_v30  ;;  %v2529_v5 = vsel %vm6901_vm11, %v6746_v25, %v2525_v63  ;;  %v2570_v14 = vadd.f32 %v6777_v15, %v2569_v19  ;;  %v2575_v16 = vand.u32 2147483647, %v6701_v30  ;;  %vm6958_vm15 = vmor %vm2571_vm8, %vm2572_vm0 }
 0x272   : > { %3710 = vrcp.f32 %v6771_v37  ;;  %v2504_v31 = vsel %vm6820_vm4, %v6780_v49, %v2499_v8  ;;  %v2544_v22 = vsel %vm6911_vm7, %v6755_v26, %v2540_v51  ;;  %v2563_v46 = vor.u32 1.1754944e-38, %v2562_v13 }
 0x273   : > { %v2592_v34 = vand.u32 2147483648, %v6757_v18  ;;  %v2559_v27 = vsel %vm6933_vm10, %v6761_v59, %v2555_v12  ;;  %v2582_v49 = vmul.f32 %v6907_v41, %v6757_v18  ;;  %v2597_v26 = vmul.f32 %v6919_v23, %v6763_v44 }
 0x274   : > { %v2607_v45 = vand.u32 2147483648, %v6763_v44  ;;  %v6974_v30 = vsel %vm6853_vm13, %v6802_v40, %v2514_v50  ;;  %v2534_v3 = vsel %vm6825_vm5, %v2533_v11, %v2529_v5  ;;  %v2578_v56 = vor.u32 1.1754944e-38, %v2577_v53 }
 0x275   : > { %3712 = vrcp.f32 %v6785_v55  ;;  %v2574_v0 = vsel %vm6958_vm15, %v6777_v15, %v2570_v14  ;;  %vm2576_vm4 = vcmp.eq.f32.partialorder %v2575_v16, 8.507059e+37  ;;  %v2590_v6 = vand.u32 2147483647, %v6757_v18 }
 0x276   : > { %v6979_v59 = vpop.eup %3708  ;;  %3714 = vrcp.f32 %v6792_v62  ;;  %v2549_v40 = vsel %vm6858_vm3, %v2548_v33, %v2544_v22  ;;  %v2564_v11 = vsel %vm6937_vm1, %v2563_v46, %v2559_v27  ;;  %vm2586_vm5 = vweird.f32 %v6757_v18  ;;  %v7832_v18 = vld [vmem:[#allocation51_spill] sm:$0xff] }
 0x277   : > { %v6991_v21 = vor.u32 1.1754944e-38, %v2592_v34  ;;  %v2605_v52 = vand.u32 2147483647, %v6763_v44  ;;  %v2583_v15 = vsub.f32 1.0, %v2582_v49  ;;  %v2598_v29 = vsub.f32 1.0, %v2597_v26 }
 0x278   : > { %v6994_v9 = vpop.eup %3710  ;;  %vm2601_vm13 = vweird.f32 %v6763_v44  ;;  %v6997_v63 = vor.u32 1.1754944e-38, %v2607_v45  ;;  %v7001_v54 = vmul.f32 %v6748_v1, %v6462_v2  ;;  %v2579_v33 = vsel %vm2576_vm4, %v2578_v56, %v2574_v0 }
 0x279   : > { %v2612_v19 = vmul.f32 %v6979_v59, %v6765_v39  ;;  %v2731_v8 = vadd.f32 %v6726_v47, %v6712_v61  ;;  %vm7800_vm3 = vcmask 261120   ;;  %vm2587_vm14 = vweird.f32 %v6907_v41 }
 0x27a   : > { %v2732_v35 = vsel %vm7800_vm3, %v6734_v10, 0.0  ;;  %v2620_v51 = vand.u32 2147483647, %v6765_v39  ;;  %v2622_v13 = vand.u32 2147483648, %v6765_v39  ;;  %vm7801_vm6 = vmmov %vm7800_vm3  ;;  %vm2616_vm9 = vweird.f32 %v6765_v39 }
 0x27b   : > { %v2734_v2 = vsel %vm7801_vm6, %v6741_v58, 0.0  ;;  %v7014_v1 = vpop.eup %3712  ;;  %v2627_v36 = vmul.f32 %v6994_v9, %v6771_v37  ;;  %v2635_v61 = vand.u32 2147483647, %v6771_v37  ;;  %v2637_v47 = vand.u32 2147483648, %v6771_v37  ;;  %vm7802_vm2 = vmmov %vm7800_vm3 }
 0x27c   : > { %v2733_v12 = vadd.f32 %v2732_v35, %v2731_v8  ;;  %v7021_v50 = vpop.eup %3714  ;;  %v7025_v4 = vmul.f32 %v6892_v32, %v6534_v28  ;;  %v7028_v20 = vmul.f32 %v2549_v40, %v6567_v57  ;;  %v7031_v53 = vmul.f32 %v2579_v33, %v6575_v7  ;;  %vm7807_vm8 = vmmov %vm7802_vm2 }
 0x27d   : > { %v2736_v5 = vsel %vm7802_vm2, %v7001_v54, 0.0  ;;  %v2584_v14 = vmul.f32 %v6907_v41, %v2583_v15  ;;  %vm7036_vm11 = vcmp.eq.f32.partialorder %v2590_v6, 8.507059e+37  ;;  %v2599_v22 = vmul.f32 %v6919_v23, %v2598_v29  ;;  %vm7076_vm10 = vmor %vm2586_vm5, %vm2587_vm14 }
 0x27e   : > { %v2613_v46 = vsub.f32 1.0, %v2612_v19  ;;  %v2735_v28 = vadd.f32 %v2734_v2, %v2733_v12  ;;  %vm7041_vm12 = vcmp.eq.f32.partialorder %v2605_v52, 8.507059e+37  ;;  %v2642_v57 = vmul.f32 %v7014_v1, %v6785_v55  ;;  %vm7812_vm15 = vmmov %vm7802_vm2 }
 0x27f   : > { %v7049_v7 = vmul.f32 %v6924_v43, %v6544_v60  ;;  %v7052_v25 = vmul.f32 %v2534_v3, %v6560_v17  ;;  %v7055_v34 = vmul.f32 %v2564_v11, %v6571_v42  ;;  %vm2602_vm7 = vweird.f32 %v6919_v23  ;;  %vm7817_vm14 = vmmov %vm7802_vm2 }
 0x280   : > { %v2628_v27 = vsub.f32 1.0, %v2627_v36  ;;  %v2657_v49 = vmul.f32 %v7021_v50, %v6792_v62  ;;  %v2737_v26 = vadd.f32 %v2736_v5, %v2735_v28  ;;  %v7061_v45 = vmul.f32 %v2504_v31, %v6548_v24  ;;  %vm7095_vm4 = vmor %vm2601_vm13, %vm2602_vm7 }
 0x281   : > { %v2738_v60 = vsel %vm7807_vm8, %v7025_v4, 0.0  ;;  %v2925_v17 = vpack.c.bf16 %v7028_v20, %v7052_v25  ;;  %v2926_v42 = vpack.c.bf16 %v7031_v53, %v7055_v34  ;;  %v2585_v43 = vadd.f32 %v6907_v41, %v2584_v14  ;;  %vm7820_vm7 = vmmov %vm7807_vm8 }
 0x282   : > { %v2614_v3 = vmul.f32 %v6979_v59, %v2613_v46  ;;  %vm2631_vm0 = vweird.f32 %v6771_v37  ;;  %v2739_v56 = vadd.f32 %v2738_v60, %v2737_v26  ;;  %v2600_v31 = vadd.f32 %v6919_v23, %v2599_v22  ;;  %v7827_v26 = vld [vmem:[#allocation15_spill] sm:$0xff] }
 0x283   : > { %vm7081_vm1 = vcmp.eq.f32.partialorder %v2620_v51, 8.507059e+37  ;;  %v2643_v6 = vsub.f32 1.0, %v2642_v57  ;;  %v7087_v40 = vmul.f32 %v6974_v30, %v6556_v48  ;;  %v2740_v11 = vsel %vm7812_vm15, %v7049_v7, 0.0  ;;  %vm7824_vm15 = vmmov %vm7820_vm7  ;;  %v7834_v48 = vld [vmem:[#allocation16_spill] sm:$0xff] }
 0x284   : > { %vm2617_vm5 = vweird.f32 %v6979_v59  ;;  %v2623_v52 = vor.u32 1.1754944e-38, %v2622_v13  ;;  %v2629_v15 = vmul.f32 %v6994_v9, %v2628_v27  ;;  %v2741_v29 = vadd.f32 %v2740_v11, %v2739_v56 }
 0x285   : > { %vm7101_vm3 = vcmp.eq.f32.partialorder %v2635_v61, 8.507059e+37  ;;  %v2638_v30 = vor.u32 1.1754944e-38, %v2637_v47  ;;  %v2658_v33 = vsub.f32 1.0, %v2657_v49  ;;  %v2742_v19 = vsel %vm7817_vm14, %v7061_v45, 0.0  ;;  %vm7117_vm6 = vmor %vm2616_vm9, %vm2617_vm5 }
 0x286   : > { %v2589_v44 = vsel %vm7076_vm10, %v6907_v41, %v2585_v43  ;;  %v2615_v8 = vadd.f32 %v6979_v59, %v2614_v3  ;;  %vm2632_vm13 = vweird.f32 %v6994_v9  ;;  %v2743_v35 = vadd.f32 %v2742_v19, %v2741_v29  ;;  %vm7823_vm10 = vmmov %vm7820_vm7 }
 0x287   : > { %v2604_v51 = vsel %vm7095_vm4, %v6919_v23, %v2600_v31  ;;  %v2644_v2 = vmul.f32 %v7014_v1, %v2643_v6  ;;  %vm2646_vm2 = vweird.f32 %v6785_v55  ;;  %v2744_v41 = vsel %vm7820_vm7, %v7087_v40, 0.0  ;;  %vm7133_vm9 = vmor %vm2631_vm0, %vm2632_vm13 }
 0x288   : > { %v2630_v36 = vadd.f32 %v6994_v9, %v2629_v15  ;;  %v2650_v61 = vand.u32 2147483647, %v6785_v55  ;;  %v2652_v47 = vand.u32 2147483648, %v6785_v55  ;;  %v2745_v23 = vadd.f32 %v2744_v41, %v2743_v35  ;;  %vm7828_vm4 = vmmov %vm7820_vm7  ;;  %v7836_v35 = vld [vmem:[#allocation17_spill] sm:$0xff]  ;;  %v7838_v41 = vld [vmem:[#allocation31_spill] sm:$0xff] }
 0x289   : > { %v2594_v39 = vsel %vm7036_vm11, %v6991_v21, %v2589_v44  ;;  %vm2647_vm8 = vweird.f32 %v7014_v1  ;;  %v2659_v5 = vmul.f32 %v7021_v50, %v2658_v33  ;;  %v2746_v14 = vsel %vm7823_vm10, %v7052_v25, 0.0  ;;  %vm7831_vm13 = vmmov %vm7828_vm4  ;;  %v7871_v25 = vld [vmem:[#allocation14_spill] sm:$0xff] }
 0x28a   : > { %v2609_v22 = vsel %vm7041_vm12, %v6997_v63, %v2604_v51  ;;  %v2619_v21 = vsel %vm7117_vm6, %v6979_v59, %v2615_v8  ;;  %vm2661_vm11 = vweird.f32 %v6792_v62  ;;  %v2747_v37 = vadd.f32 %v2746_v14, %v2745_v23  ;;  %vm7157_vm12 = vmor %vm2646_vm2, %vm2647_vm8 }
 0x28b   : > { %v2645_v16 = vadd.f32 %v7014_v1, %v2644_v2  ;;  %vm2662_vm0 = vweird.f32 %v7021_v50  ;;  %v2748_v46 = vsel %vm7824_vm15, %v7028_v20, 0.0  ;;  %v2634_v28 = vsel %vm7133_vm9, %v6994_v9, %v2630_v36  ;;  %vm7833_vm6 = vmmov %vm7828_vm4  ;;  %v7870_v20 = vld [vmem:[#allocation66_spill] sm:$0xff] }
 0x28c   : > { %v2665_v59 = vand.u32 2147483647, %v6792_v62  ;;  %v2667_v32 = vand.u32 2147483648, %v6792_v62  ;;  %v2749_v57 = vadd.f32 %v2748_v46, %v2747_v37  ;;  %v2660_v27 = vadd.f32 %v7021_v50, %v2659_v5  ;;  %vm7176_vm5 = vmor %vm2661_vm11, %vm2662_vm0 }
 0x28d   : > { %v7165_v49 = vmul.f32 %v2594_v39, %v6582_v38  ;;  %v7168_v60 = vmul.f32 %v2609_v22, %v7827_v26  ;;  %v2750_v55 = vsel %vm7828_vm4, %v7055_v34, 0.0  ;;  %v2624_v9 = vsel %vm7081_vm1, %v2623_v52, %v2619_v21  ;;  %v7875_v34 = vld [vmem:[#allocation60_spill] sm:$0xff] }
 0x28e   : > { %v2653_v43 = vor.u32 1.1754944e-38, %v2652_v47  ;;  %v2751_v56 = vadd.f32 %v2750_v55, %v2749_v57  ;;  %v3869_v24 = vmov 256.0   ;;  %v2649_v38 = vsel %vm7157_vm12, %v7014_v1, %v2645_v16 }
 0x28f   : > { %3716 = vrcp.f32 %v3869_v24  ;;  %vm2651_vm14 = vcmp.eq.f32.partialorder %v2650_v61, 8.507059e+37  ;;  %v2752_v31 = vsel %vm7831_vm13, %v7031_v53, 0.0  ;;  %v2639_v0 = vsel %vm7101_vm3, %v2638_v30, %v2634_v28  ;;  %vm7835_vm3 = vmmov %vm7828_vm4  ;;  %v7874_v53 = vld [vmem:[#allocation54_spill] sm:$0xff] }
 0x290   : > { %vm2666_vm1 = vcmp.eq.f32.partialorder %v2665_v59, 8.507059e+37  ;;  %v2668_v62 = vor.u32 1.1754944e-38, %v2667_v32  ;;  %v2753_v6 = vadd.f32 %v2752_v31, %v2751_v56  ;;  %v2664_v11 = vsel %vm7176_vm5, %v7021_v50, %v2660_v27  ;;  %vm7837_vm2 = vmmov %vm7835_vm3 }
 0x291   : > { %v7191_v52 = vmul.f32 %v2624_v9, %v7832_v18  ;;  %v2754_v1 = vsel %vm7833_vm6, %v7165_v49, 0.0  ;;  %v2927_v15 = vpack.c.bf16 %v7168_v60, %v7165_v49  ;;  %v2654_v29 = vsel %vm2651_vm14, %v2653_v43, %v2649_v38  ;;  %vm7839_vm7 = vmmov %vm7837_vm2  ;;  %v2784_v9 = vld [vmem:[%s7484_s6] sm:$0x1] }
 0x292   : > { %v2755_v33 = vadd.f32 %v2754_v1, %v2753_v6  ;;  %v7198_v30 = vmul.f32 %v2639_v0, %v7834_v48  ;;  %v2756_v19 = vsel %vm7835_vm3, %v7168_v60, 0.0  ;;  %v2669_v8 = vsel %vm2666_vm1, %v2668_v62, %v2664_v11  ;;  %vm7840_vm9 = vmmov %vm7837_vm2  ;;  %v2828_v43 = vld [vmem:[%s7485_s7] sm:$0xff] }
 0x293   : > { %v7203_v51 = vmul.f32 %v2654_v29, %v7836_v35  ;;  %v2758_v13 = vsel %vm7837_vm2, %v7191_v52, 0.0  ;;  %v7208_v36 = vmul.f32 %v2669_v8, %v7838_v41  ;;  %vm7841_vm8 = vmmov %vm7837_vm2  ;;  %2849 = vmatpush.msra.mxu1 %v2828_v43  ;;  %vm2830_vm5 = vcmask 64512   ;;  %v2829_v8 = vld [vmem:[%s7486_s8] sm:$0x1] }
 0x294   : > { %v2757_v50 = vadd.f32 %v2756_v19, %v2755_v33  ;;  %v2760_v61 = vsel %vm7839_vm7, %v7198_v30, 0.0  ;;  %v2928_v46 = vpack.c.bf16 %v7198_v30, %v7191_v52  ;;  %vm7842_vm11 = vmmov %vm7837_vm2  ;;  %v7878_v49 = vld [vmem:[#allocation22_spill] sm:$0xff]  ;;  %v2922_v52 = vpack.c.bf16 %v7001_v54, %v6741_v58 }
 0x295   : > { %v3717_v44 = vpop.eup %3716  ;;  %v2762_v39 = vsel %vm7840_vm9, %v7203_v51, 0.0  ;;  %v2764_v5 = vsel %vm7841_vm8, %v7208_v36, 0.0  ;;  %v2929_v63 = vpack.c.bf16 %v7208_v36, %v7203_v51  ;;  %vm7843_vm3 = vmmov %vm7837_vm2  ;;  %v2921_v60 = vpack.c.bf16 %v6734_v10, %v7878_v49  ;;  %v3750_v49 = vld [vmem:[%s4024_s13 + $0x38] sm:$0xff] }
 0x296   : > { %v2759_v2 = vadd.f32 %v2758_v13, %v2757_v50  ;;  %v2773_v47 = vmul.f32 256.0, %v3717_v44  ;;  %vm2777_vm10 = vweird.f32 %v3717_v44  ;;  %vm7844_vm7 = vmmov %vm7837_vm2 }
 0x297   : > { %vm7845_vm9 = vmmov %vm7837_vm2 }
 0x298   : > { %v2761_v23 = vadd.f32 %v2760_v61, %v2759_v2  ;;  %v2774_v14 = vsub.f32 1.0, %v2773_v47  ;;  %vm7846_vm8 = vmmov %vm7837_vm2 }
 0x29a   : > { %v2763_v12 = vadd.f32 %v2762_v39, %v2761_v23  ;;  %v2775_v37 = vmul.f32 %v3717_v44, %v2774_v14 }
 0x29c   : > { %v2765_v22 = vadd.f32 %v2764_v5, %v2763_v12  ;;  %v2776_v59 = vadd.f32 %v3717_v44, %v2775_v37 }
 0x29e   : > { %v2766_v21 = vrot.slane %v2765_v22, 4  ;;  %v2778_v27 = vsel %vm2777_vm10, %v3717_v44, %v2776_v59  ;;  %vm7847_vm10 = vmmov %vm7837_vm2 }
 0x2a0   : > { %v2767_v16 = vadd.f32 %v2766_v21, %v2765_v22 }
 0x2a2   : > { %v2768_v28 = vrot.slane %v2767_v16, 2 }
 0x2a4   : > { %v2769_v32 = vadd.f32 %v2768_v28, %v2767_v16  ;;  %v2887_v16 = vld [vmem:[%s7487_s9 + $0x70] sm:$0xff]  ;;  %v2888_v28 = vld [vmem:[%s7487_s9 + $0x78] sm:$0xff] }
 0x2a6   : > { %v2770_v57 = vrot.slane %v2769_v32, 1 }
 0x2a8   : > { %v2771_v26 = vadd.f32 %v2770_v57, %v2769_v32 }
 0x2aa   : > { %v2779_v55 = vmul.f32 %v2778_v27, %v2771_v26  ;;  %v2885_v27 = vld [vmem:[%s7487_s9 + $0x60] sm:$0xff]  ;;  %v2886_v26 = vld [vmem:[%s7487_s9 + $0x68] sm:$0xff] }
 0x2ac   : > { %3353 = vmatmul.msk.f32.vlgmr.msrb.gmra.mxu1 %vm7842_vm11, %v2779_v55  ;;  %vm7848_vm11 = vmmov %vm7837_vm2 }
 0x329   : > { %v2805_v3 = vpop.f32.mrf.mxu1 }
 0x32a   : > { %v2806_v56 = vadd.f32 %v2805_v3, %v2784_v9 }
 0x32c   : > { %v3354_v24 = vmul.f32 -1.442695, %v2806_v56 }
 0x32e   : > { %3718 = vpow2.f32 %v3354_v24  ;;  %v2883_v24 = vld [vmem:[%s7487_s9 + $0x50] sm:$0xff] }
 0x334   : > { %v3719_v38 = vpop.eup %3718 }
 0x335   : > { %v2811_v31 = vadd.f32 1.0, %v3719_v38  ;;  %v2884_v38 = vld [vmem:[%s7487_s9 + $0x58] sm:$0xff] }
 0x337   : > { %3720 = vrcp.f32 %v2811_v31  ;;  %v2823_v11 = vand.u32 2147483648, %v2811_v31  ;;  %v2821_v1 = vand.u32 2147483647, %v2811_v31  ;;  %vm2817_vm15 = vweird.f32 %v2811_v31 }
 0x339   : > { %v2824_v33 = vor.u32 1.1754944e-38, %v2823_v11  ;;  %vm2822_vm4 = vcmp.eq.f32.partialorder %v2821_v1, 8.507059e+37  ;;  %v2881_v11 = vld [vmem:[%s7487_s9 + $0x40] sm:$0xff] }
 0x33d   : > { %v3721_v0 = vpop.eup %3720 }
 0x33e   : > { %v2813_v62 = vmul.f32 %v3721_v0, %v2811_v31  ;;  %vm2818_vm0 = vweird.f32 %v3721_v0 }
 0x33f   : > { %vm2819_vm12 = vmor %vm2817_vm15, %vm2818_vm0 }
 0x340   : > { %v2814_v6 = vsub.f32 1.0, %v2813_v62  ;;  %vm7849_vm0 = vmmov %vm7837_vm2 }
 0x341   : > { %vm7852_vm15 = vmmov %vm7849_vm0 }
 0x342   : > { %v2815_v18 = vmul.f32 %v3721_v0, %v2814_v6 }
 0x344   : > { %v2816_v29 = vadd.f32 %v3721_v0, %v2815_v18  ;;  %v2882_v18 = vld [vmem:[%s7487_s9 + $0x48] sm:$0xff] }
 0x346   : > { %v2820_v48 = vsel %vm2819_vm12, %v3721_v0, %v2816_v29  ;;  %vm7853_vm12 = vmmov %vm7849_vm0 }
 0x347   : > { %v2825_v19 = vsel %vm2822_vm4, %v2824_v33, %v2820_v48  ;;  %vm7856_vm4 = vmmov %vm7849_vm0 }
 0x348   : > { %v2827_v44 = vmul.f32 %v2825_v19, %v2806_v56  ;;  %v2879_v19 = vld [vmem:[%s7487_s9 + $0x30] sm:$0xff] }
 0x34a   : > { %3355 = vmatmul.msk.f32.vlgmr.msra.gmra.mxu1 %vm2830_vm5, %v2827_v44  ;;  %v2880_v44 = vld [vmem:[%s7487_s9 + $0x38] sm:$0xff]  ;;  %vm7857_vm5 = vmmov %vm7849_vm0 }
 0x3c7   : > { %v2851_v50 = vpop.f32.mrf.mxu1 }
 0x3c8   : > { %v2852_v35 = vadd.f32 %v2851_v50, %v2829_v8 }
 0x3ca   : > { %v3356_v13 = vmul.f32 -1.442695, %v2852_v35 }
 0x3cc   : > { %3722 = vpow2.f32 %v3356_v13 }
 0x3d2   : > { %v3723_v2 = vpop.eup %3722 }
 0x3d3   : > { %v2857_v41 = vadd.f32 1.0, %v3723_v2  ;;  %v2877_v2 = vld [vmem:[%s7487_s9 + $0x20] sm:$0xff] }
 0x3d5   : > { %3724 = vrcp.f32 %v2857_v41  ;;  %v2869_v39 = vand.u32 2147483648, %v2857_v41  ;;  %v2867_v5 = vand.u32 2147483647, %v2857_v41  ;;  %vm2863_vm13 = vweird.f32 %v2857_v41 }
 0x3d7   : > { %v2870_v22 = vor.u32 1.1754944e-38, %v2869_v39  ;;  %vm2868_vm6 = vcmp.eq.f32.partialorder %v2867_v5, 8.507059e+37  ;;  %v2876_v5 = vld [vmem:[%s7487_s9 + $0x18] sm:$0xff] }
 0x3db   : > { %v3725_v61 = vpop.eup %3724 }
 0x3dc   : > { %v2859_v47 = vmul.f32 %v3725_v61, %v2857_v41  ;;  %vm2864_vm14 = vweird.f32 %v3725_v61  ;;  %v2878_v41 = vld [vmem:[%s7487_s9 + $0x28] sm:$0xff] }
 0x3dd   : > { %vm2865_vm1 = vmor %vm2863_vm13, %vm2864_vm14 }
 0x3de   : > { %v2860_v23 = vsub.f32 1.0, %v2859_v47  ;;  %vm7860_vm14 = vmmov %vm7849_vm0 }
 0x3df   : > { %vm7861_vm13 = vmmov %vm7849_vm0 }
 0x3e0   : > { %v2861_v12 = vmul.f32 %v3725_v61, %v2860_v23 }
 0x3e2   : > { %v2862_v14 = vadd.f32 %v3725_v61, %v2861_v12  ;;  %v2875_v12 = vld [vmem:[%s7487_s9 + $0x10] sm:$0xff] }
 0x3e4   : > { %v2866_v21 = vsel %vm2865_vm1, %v3725_v61, %v2862_v14  ;;  %vm7864_vm1 = vmmov %vm7849_vm0 }
 0x3e5   : > { %v2871_v37 = vsel %vm2868_vm6, %v2870_v22, %v2866_v21  ;;  %vm7865_vm6 = vmmov %vm7849_vm0 }
 0x3e6   : > { %v2889_v59 = vperm.slane %v2871_v37, 0 }
 0x3e8   : > { %v2904_v32 = vmul.f32 %v2889_v59, %v2887_v16  ;;  %v2905_v57 = vmul.f32 %v2889_v59, %v2888_v28  ;;  %v2902_v43 = vmul.f32 %v2889_v59, %v2885_v27  ;;  %v2903_v3 = vmul.f32 %v2889_v59, %v2886_v26  ;;  %v2873_v16 = vld [vmem:[%s7487_s9] sm:$0xff]  ;;  %v2874_v28 = vld [vmem:[%s7487_s9 + $0x8] sm:$0xff] }
 0x3e9   : > { %v2900_v0 = vmul.f32 %v2889_v59, %v2883_v24  ;;  %v2901_v62 = vmul.f32 %v2889_v59, %v2884_v38  ;;  %v2898_v29 = vmul.f32 %v2889_v59, %v2881_v11  ;;  %v2899_v33 = vmul.f32 %v2889_v59, %v2882_v18  ;;  %v7854_v24 = vld [vmem:[#allocation45_spill] sm:$0xff]  ;;  %v7855_v38 = vld [vmem:[#allocation58_spill] sm:$0xff] }
 0x3ea   : > { %v2913_v55 = vpack.c.bf16 %v2905_v57, %v2904_v32  ;;  %v2912_v56 = vpack.c.bf16 %v2903_v3, %v2902_v43  ;;  %v2896_v50 = vmul.f32 %v2889_v59, %v2879_v19  ;;  %v2897_v35 = vmul.f32 %v2889_v59, %v2880_v44  ;;  %v7851_v43 = vld [vmem:[#allocation50_spill] sm:$0xff]  ;;  %v3738_v19 = vld [vmem:[%s4024_s13 + $0x8] sm:$0xff] }
 0x3eb   : > { %v2911_v6 = vpack.c.bf16 %v2901_v62, %v2900_v0  ;;  %v2910_v48 = vpack.c.bf16 %v2899_v33, %v2898_v29  ;;  %v2894_v47 = vmul.f32 %v2889_v59, %v2877_v2  ;;  %v2895_v23 = vmul.f32 %v2889_v59, %v2878_v41  ;;  %v7858_v0 = vld [vmem:[#allocation34_spill] sm:$0xff] }
 0x3ec   : > { %v3004_v9 = vsel %vm7843_vm3, %v2913_v55, 0  ;;  %v3001_v31 = vsel %vm7837_vm2, %v2912_v56, 0  ;;  %v2909_v13 = vpack.c.bf16 %v2897_v35, %v2896_v50  ;;  %v2892_v22 = vmul.f32 %v2889_v59, %v2875_v12  ;;  %v7859_v62 = vld [vmem:[#allocation62_spill] sm:$0xff]  ;;  %vm7868_vm3 = vmmov %vm7849_vm0 }
 0x3ed   : > { %3006 = vmatpush.bf16.xpose.msra.mxu2 %v3004_v9  ;;  %3396 = vmatpush.bf16.xpose.msra.mxu3 %v3004_v9  ;;  %v2998_v1 = vsel %vm7844_vm7, %v2911_v6, 0  ;;  %v2995_v8 = vsel %vm7845_vm9, %v2910_v48, 0  ;;  %v2908_v39 = vpack.c.bf16 %v2895_v23, %v2894_v47  ;;  %v2893_v21 = vmul.f32 %v2889_v59, %v2876_v5  ;;  %v7850_v9 = vld [vmem:[#allocation49_spill] sm:$0xff]  ;;  %vm7869_vm2 = vmmov %vm7849_vm0  ;;  %v3741_v23 = vld [vmem:[%s4024_s13 + $0xa0] sm:$0xff] }
 0x3ee   : > { %v2992_v61 = vsel %vm7846_vm8, %v2909_v13, 0  ;;  %v2890_v57 = vmul.f32 %v2889_v59, %v2873_v16  ;;  %v2891_v27 = vmul.f32 %v2889_v59, %v2874_v28  ;;  %v2914_v3 = vpack.c.bf16 %v7851_v43, %v7850_v9  ;;  %vm7872_vm7 = vmmov %vm7849_vm0  ;;  %v3743_v16 = vld [vmem:[%s4024_s13 + $0xa8] sm:$0xff]  ;;  %v3745_v43 = vld [vmem:[%s4024_s13 + $0xb0] sm:$0xff] }
 0x3ef   : > { %v2989_v14 = vsel %vm7847_vm10, %v2908_v39, 0  ;;  %v2907_v37 = vpack.c.bf16 %v2893_v21, %v2892_v22  ;;  %v2923_v56 = vpack.c.bf16 %v7049_v7, %v7025_v4  ;;  %v2915_v59 = vpack.c.bf16 %v7855_v38, %v7854_v24  ;;  %v7862_v4 = vld [vmem:[#allocation63_spill] sm:$0xff]  ;;  %v7863_v7 = vld [vmem:[#allocation64_spill] sm:$0xff]  ;;  %vm7873_vm9 = vmmov %vm7849_vm0 }
 0x3f0   : > { %v2906_v26 = vpack.c.bf16 %v2891_v27, %v2890_v57  ;;  %v2916_v6 = vpack.c.bf16 %v7859_v62, %v7858_v0  ;;  %v2917_v11 = vpack.c.bf16 %v7863_v7, %v7862_v4  ;;  %vm7876_vm8 = vmmov %vm7849_vm0  ;;  %v3742_v21 = vld [vmem:[%s4024_s13 + $0x18] sm:$0xff] }
 0x3f1   : > { %v2986_v32 = vsel %vm7848_vm11, %v2907_v37, 0  ;;  %vm7877_vm10 = vmmov %vm7849_vm0  ;;  %v3747_v62 = vld [vmem:[%s4024_s13 + $0xb8] sm:$0xff] }
 0x3f2   : > { %v2983_v55 = vsel %vm7849_vm0, %v2906_v26, 0  ;;  %vm7879_vm11 = vmmov %vm7849_vm0 }
 0x3f5   : > { %3007 = vmatpush.bf16.xpose.msra.mxu2 %v3001_v31  ;;  %3397 = vmatpush.bf16.xpose.msra.mxu3 %v3001_v31  ;;  %v2924_v31 = vpack.c.bf16 %v7087_v40, %v7061_v45  ;;  %v7866_v45 = vld [vmem:[#allocation61_spill] sm:$0xff] }
 0x3f6   : > { %v7867_v40 = vld [vmem:[#allocation65_spill] sm:$0xff] }
 0x3f7   : > { %v2918_v18 = vpack.c.bf16 %v7867_v40, %v7866_v45  ;;  %v3748_v40 = vld [vmem:[%s4024_s13 + $0x30] sm:$0xff] }
 0x3fd   : > { %3008 = vmatpush.bf16.xpose.msra.mxu2 %v2998_v1  ;;  %3398 = vmatpush.bf16.xpose.msra.mxu3 %v2998_v1  ;;  %v3737_v1 = vld [vmem:[%s4024_s13 + $0x90] sm:$0xff] }
 0x405   : > { %3009 = vmatpush.bf16.xpose.msra.mxu2 %v2995_v8  ;;  %3399 = vmatpush.bf16.xpose.msra.mxu3 %v2995_v8  ;;  %v3739_v8 = vld [vmem:[%s4024_s13 + $0x98] sm:$0xff] }
 0x40d   : > { %3010 = vmatpush.bf16.xpose.msra.mxu2 %v2992_v61  ;;  %3400 = vmatpush.bf16.xpose.msra.mxu3 %v2992_v61  ;;  %v3740_v61 = vld [vmem:[%s4024_s13 + $0x10] sm:$0xff] }
 0x415   : > { %3011 = vmatpush.bf16.xpose.msra.mxu2 %v2989_v14  ;;  %3401 = vmatpush.bf16.xpose.msra.mxu3 %v2989_v14 }
 0x41d   : > { %3012 = vmatpush.bf16.xpose.msra.mxu2 %v2986_v32  ;;  %3402 = vmatpush.bf16.xpose.msra.mxu3 %v2986_v32 }
 0x425   : > { %3013 = vmatpush.bf16.xpose.msra.mxu2 %v2983_v55  ;;  %3403 = vmatpush.bf16.xpose.msra.mxu3 %v2983_v55  ;;  %v3744_v55 = vld [vmem:[%s4024_s13 + $0x20] sm:$0xff] }
 0x42c   : > { %3357 = vmatmul.msk.bf16.vlgmr.msra.gmra.mxu2 %vm7852_vm15, %v2914_v3  ;;  %3366 = vmatmul.msk.bf16.vlgmr.msra.gmra.mxu3 %vm7853_vm12, %v2923_v56 }
 0x43c   : > { %3358 = vmatmul.msk.bf16.gmra.mxu2 %vm7856_vm4, %v2915_v59  ;;  %3367 = vmatmul.msk.bf16.gmra.mxu3 %vm7857_vm5, %v2924_v31  ;;  %v3746_v31 = vld [vmem:[%s4024_s13 + $0x28] sm:$0xff] }
 0x44c   : > { %3359 = vmatmul.msk.bf16.gmra.mxu2 %vm7860_vm14, %v2916_v6  ;;  %3368 = vmatmul.msk.bf16.gmra.mxu3 %vm7861_vm13, %v2925_v17  ;;  %v2919_v17 = vpack.c.bf16 %v7871_v25, %v7870_v20  ;;  %v3749_v20 = vld [vmem:[%s4024_s13 + $0xc0] sm:$0xff] }
 0x45c   : > { %3360 = vmatmul.msk.bf16.gmra.mxu2 %vm7864_vm1, %v2917_v11  ;;  %3369 = vmatmul.msk.bf16.gmra.mxu3 %vm7865_vm6, %v2926_v42  ;;  %v2920_v42 = vpack.c.bf16 %v7875_v34, %v7874_v53 }
 0x46c   : > { %3361 = vmatmul.msk.bf16.gmra.mxu2 %vm7868_vm3, %v2918_v18  ;;  %3370 = vmatmul.msk.bf16.gmra.mxu3 %vm7869_vm2, %v2927_v15  ;;  %v7342_v15 = vld [vmem:[%s7488_s10] ss:$0 sm:$0xff] }
 0x47c   : > { %3362 = vmatmul.msk.bf16.gmra.mxu2 %vm7872_vm7, %v2919_v17  ;;  %3371 = vmatmul.msk.bf16.gmra.mxu3 %vm7873_vm9, %v2928_v46  ;;  %v3736_v46 = vld [vmem:[%s4024_s13] sm:$0xff] }
 0x48c   : > { %3363 = vmatmul.msk.bf16.gmra.mxu2 %vm7876_vm8, %v2920_v42  ;;  %3372 = vmatmul.msk.bf16.gmra.mxu3 %vm7877_vm10, %v2929_v63 }
 0x49c   : > { %3364 = vmatmul.msk.bf16.gmra.mxu2 %vm7879_vm11, %v2921_v60 }
 0x4ac   : > { %3365 = vmatmul.msk.bf16.gmra.mxu2 %vm7849_vm0, %v2922_v52  ;;  %v3751_v52 = vld [vmem:[%s4024_s13 + $0xc8] sm:$0xff] }
 0x4af   : > { %v3015_v30 = vpop.f32.mrf.mxu2  ;;  %v3060_v51 = vpop.f32.mrf.mxu3 }
 0x4b0   : > { %v3016_v36 = vadd.f32 %v7342_v15, %v3015_v30  ;;  %v3061_v10 = vadd.f32 %v7342_v15, %v3060_v51 }
 0x4b2   : > { %v3095_v63 = vadd.f32 %v3736_v46, %v3016_v36  ;;  %v3113_v29 = vadd.f32 %v3737_v1, %v3061_v10 }
 0x4b4   : > { %3127 = vst [vmem:[%s7350_s19] sm:$0xff] %v3095_v63  ;;  %v3752_v63 = vld [vmem:[%s4024_s13 + $0x40] sm:$0xff] }
 0x4b5   : > { %3145 = vst [vmem:[%s7350_s19 + $0x90] sm:$0xff] %v3113_v29  ;;  %v3753_v29 = vld [vmem:[%s4024_s13 + $0xd0] sm:$0xff] }
 0x4b7   : > { %v3017_v58 = vpop.f32.mrf.mxu2  ;;  %v3062_v54 = vpop.f32.mrf.mxu3 }
 0x4b8   : > { %v3018_v33 = vadd.f32 %v7342_v15, %v3017_v58  ;;  %v3063_v48 = vadd.f32 %v7342_v15, %v3062_v54 }
 0x4ba   : > { %v3096_v44 = vadd.f32 %v3738_v19, %v3018_v33  ;;  %v3114_v50 = vadd.f32 %v3739_v8, %v3063_v48 }
 0x4bc   : > { %3128 = vst [vmem:[%s7350_s19 + $0x8] sm:$0xff] %v3096_v44  ;;  %v3754_v44 = vld [vmem:[%s4024_s13 + $0x48] sm:$0xff] }
 0x4bd   : > { %3146 = vst [vmem:[%s7350_s19 + $0x98] sm:$0xff] %v3114_v50  ;;  %v3755_v50 = vld [vmem:[%s4024_s13 + $0xd8] sm:$0xff] }
 0x4bf   : > { %v3020_v35 = vpop.f32.mrf.mxu2  ;;  %v3065_v13 = vpop.f32.mrf.mxu3 }
 0x4c0   : > { %v3021_v2 = vadd.f32 %v7342_v15, %v3020_v35  ;;  %v3066_v41 = vadd.f32 %v7342_v15, %v3065_v13 }
 0x4c2   : > { %v3097_v47 = vadd.f32 %v3740_v61, %v3021_v2  ;;  %v3115_v39 = vadd.f32 %v3741_v23, %v3066_v41 }
 0x4c4   : > { %3129 = vst [vmem:[%s7350_s19 + $0x10] sm:$0xff] %v3097_v47  ;;  %v3756_v47 = vld [vmem:[%s4024_s13 + $0x50] sm:$0xff] }
 0x4c5   : > { %3147 = vst [vmem:[%s7350_s19 + $0xa0] sm:$0xff] %v3115_v39  ;;  %v3757_v39 = vld [vmem:[%s4024_s13 + $0xe0] sm:$0xff] }
 0x4c7   : > { %v3022_v12 = vpop.f32.mrf.mxu2  ;;  %v3067_v5 = vpop.f32.mrf.mxu3 }
 0x4c8   : > { %v3023_v14 = vadd.f32 %v7342_v15, %v3022_v12  ;;  %v3068_v22 = vadd.f32 %v7342_v15, %v3067_v5 }
 0x4ca   : > { %v3098_v37 = vadd.f32 %v3742_v21, %v3023_v14  ;;  %v3116_v28 = vadd.f32 %v3743_v16, %v3068_v22 }
 0x4cc   : > { %3130 = vst [vmem:[%s7350_s19 + $0x18] sm:$0xff] %v3098_v37  ;;  %v3758_v37 = vld [vmem:[%s4024_s13 + $0x58] sm:$0xff] }
 0x4cd   : > { %3148 = vst [vmem:[%s7350_s19 + $0xa8] sm:$0xff] %v3116_v28  ;;  %v3759_v28 = vld [vmem:[%s4024_s13 + $0xe8] sm:$0xff] }
 0x4cf   : > { %v3025_v32 = vpop.f32.mrf.mxu2  ;;  %v3070_v57 = vpop.f32.mrf.mxu3 }
 0x4d0   : > { %v3026_v27 = vadd.f32 %v7342_v15, %v3025_v32  ;;  %v3071_v26 = vadd.f32 %v7342_v15, %v3070_v57 }
 0x4d2   : > { %v3099_v9 = vadd.f32 %v3744_v55, %v3026_v27  ;;  %v3117_v3 = vadd.f32 %v3745_v43, %v3071_v26 }
 0x4d4   : > { %3131 = vst [vmem:[%s7350_s19 + $0x20] sm:$0xff] %v3099_v9  ;;  %v3760_v9 = vld [vmem:[%s4024_s13 + $0x60] sm:$0xff] }
 0x4d5   : > { %3149 = vst [vmem:[%s7350_s19 + $0xb0] sm:$0xff] %v3117_v3  ;;  %v3761_v3 = vld [vmem:[%s4024_s13 + $0xf0] sm:$0xff] }
 0x4d7   : > { %v3027_v56 = vpop.f32.mrf.mxu2  ;;  %v3072_v24 = vpop.f32.mrf.mxu3 }
 0x4d8   : > { %v3028_v38 = vadd.f32 %v7342_v15, %v3027_v56  ;;  %v3073_v59 = vadd.f32 %v7342_v15, %v3072_v24 }
 0x4da   : > { %v3100_v0 = vadd.f32 %v3746_v31, %v3028_v38  ;;  %v3118_v6 = vadd.f32 %v3747_v62, %v3073_v59 }
 0x4dc   : > { %3132 = vst [vmem:[%s7350_s19 + $0x28] sm:$0xff] %v3100_v0  ;;  %v3762_v0 = vld [vmem:[%s4024_s13 + $0x68] sm:$0xff] }
 0x4dd   : > { %3150 = vst [vmem:[%s7350_s19 + $0xb8] sm:$0xff] %v3118_v6  ;;  %v3763_v6 = vld [vmem:[%s4024_s13 + $0xf8] sm:$0xff] }
 0x4df   : > { %v3030_v4 = vpop.f32.mrf.mxu2  ;;  %v3075_v7 = vpop.f32.mrf.mxu3 }
 0x4e0   : > { %v3031_v11 = vadd.f32 %v7342_v15, %v3030_v4  ;;  %v3076_v45 = vadd.f32 %v7342_v15, %v3075_v7 }
 0x4e2   : > { %v3101_v18 = vadd.f32 %v3748_v40, %v3031_v11  ;;  %v3119_v25 = vadd.f32 %v3749_v20, %v3076_v45  ;;  %v3764_v45 = vld [vmem:[%s4024_s13 + $0x70] sm:$0xff] }
 0x4e4   : > { %3133 = vst [vmem:[%s7350_s19 + $0x30] sm:$0xff] %v3101_v18 }
 0x4e5   : > { %3151 = vst [vmem:[%s7350_s19 + $0xc0] sm:$0xff] %v3119_v25  ;;  %v3765_v25 = vld [vmem:[%s4024_s13 + $0x78] sm:$0xff] }
 0x4e7   : > { %v3032_v17 = vpop.f32.mrf.mxu2  ;;  %v3077_v53 = vpop.f32.mrf.mxu3 }
 0x4e8   : > { %v3033_v34 = vadd.f32 %v7342_v15, %v3032_v17  ;;  %v3078_v42 = vadd.f32 %v7342_v15, %v3077_v53 }
 0x4ea   : > { %v3102_v60 = vadd.f32 %v3750_v49, %v3033_v34  ;;  %v3120_v30 = vadd.f32 %v3751_v52, %v3078_v42  ;;  %v3766_v42 = vld [vmem:[%s4024_s13 + $0x80] sm:$0xff] }
 0x4ec   : > { %3134 = vst [vmem:[%s7350_s19 + $0x38] sm:$0xff] %v3102_v60 }
 0x4ed   : > { %3152 = vst [vmem:[%s7350_s19 + $0xc8] sm:$0xff] %v3120_v30  ;;  %v3767_v30 = vld [vmem:[%s4024_s13 + $0x88] sm:$0xff] }
 0x4ef   : > { %v3035_v51 = vpop.f32.mrf.mxu2  ;;  %v3080_v36 = vpop.f32.mrf.mxu3 }
 0x4f0   : > { %v3036_v10 = vadd.f32 %v7342_v15, %v3035_v51  ;;  %v3081_v46 = vadd.f32 %v7342_v15, %v3080_v36 }
 0x4f2   : > { %v3103_v1 = vadd.f32 %v3752_v63, %v3036_v10  ;;  %v3121_v58 = vadd.f32 %v3753_v29, %v3081_v46 }
 0x4f4   : > { %3135 = vst [vmem:[%s7350_s19 + $0x40] sm:$0xff] %v3103_v1 }
 0x4f5   : > { %3153 = vst [vmem:[%s7350_s19 + $0xd0] sm:$0xff] %v3121_v58 }
 0x4f7   : > { %v3037_v54 = vpop.f32.mrf.mxu2  ;;  %v3082_v33 = vpop.f32.mrf.mxu3 }
 0x4f8   : > { %v3038_v48 = vadd.f32 %v7342_v15, %v3037_v54  ;;  %v3083_v19 = vadd.f32 %v7342_v15, %v3082_v33 }
 0x4fa   : > { %v3104_v8 = vadd.f32 %v3754_v44, %v3038_v48  ;;  %v3122_v35 = vadd.f32 %v3755_v50, %v3083_v19 }
 0x4fc   : > { %3136 = vst [vmem:[%s7350_s19 + $0x48] sm:$0xff] %v3104_v8 }
 0x4fd   : > { %3154 = vst [vmem:[%s7350_s19 + $0xd8] sm:$0xff] %v3122_v35 }
 0x4ff   : > { %v3040_v13 = vpop.f32.mrf.mxu2  ;;  %v3085_v2 = vpop.f32.mrf.mxu3 }
 0x500   : > { %v3041_v41 = vadd.f32 %v7342_v15, %v3040_v13  ;;  %v3086_v61 = vadd.f32 %v7342_v15, %v3085_v2 }
 0x502   : > { %v3105_v23 = vadd.f32 %v3756_v47, %v3041_v41  ;;  %v3123_v12 = vadd.f32 %v3757_v39, %v3086_v61 }
 0x504   : > { %3137 = vst [vmem:[%s7350_s19 + $0x50] sm:$0xff] %v3105_v23 }
 0x505   : > { %3155 = vst [vmem:[%s7350_s19 + $0xe0] sm:$0xff] %v3123_v12 }
 0x507   : > { %v3042_v5 = vpop.f32.mrf.mxu2  ;;  %v3087_v14 = vpop.f32.mrf.mxu3 }
 0x508   : > { %v3043_v22 = vadd.f32 %v7342_v15, %v3042_v5  ;;  %v3088_v21 = vadd.f32 %v7342_v15, %v3087_v14 }
 0x50a   : > { %v3106_v16 = vadd.f32 %v3758_v37, %v3043_v22  ;;  %v3124_v32 = vadd.f32 %v3759_v28, %v3088_v21 }
 0x50c   : > { %3138 = vst [vmem:[%s7350_s19 + $0x58] sm:$0xff] %v3106_v16 }
 0x50d   : > { %3156 = vst [vmem:[%s7350_s19 + $0xe8] sm:$0xff] %v3124_v32 }
 0x50f   : > { %v3045_v57 = vpop.f32.mrf.mxu2  ;;  %v3090_v27 = vpop.f32.mrf.mxu3 }
 0x510   : > { %v3046_v26 = vadd.f32 %v7342_v15, %v3045_v57  ;;  %v3091_v55 = vadd.f32 %v7342_v15, %v3090_v27 }
 0x512   : > { %v3107_v43 = vadd.f32 %v3760_v9, %v3046_v26  ;;  %v3125_v56 = vadd.f32 %v3761_v3, %v3091_v55 }
 0x514   : > { %3139 = vst [vmem:[%s7350_s19 + $0x60] sm:$0xff] %v3107_v43 }
 0x515   : > { %3157 = vst [vmem:[%s7350_s19 + $0xf0] sm:$0xff] %v3125_v56 }
 0x517   : > { %v3047_v24 = vpop.f32.mrf.mxu2  ;;  %v3092_v38 = vpop.f32.mrf.mxu3 }
 0x518   : > { %v3048_v59 = vadd.f32 %v7342_v15, %v3047_v24  ;;  %v3093_v31 = vadd.f32 %v7342_v15, %v3092_v38 }
 0x51a   : > { %v3108_v62 = vadd.f32 %v3762_v0, %v3048_v59  ;;  %v3126_v4 = vadd.f32 %v3763_v6, %v3093_v31 }
 0x51c   : > { %3140 = vst [vmem:[%s7350_s19 + $0x68] sm:$0xff] %v3108_v62 }
 0x51d   : > { %3158 = vst [vmem:[%s7350_s19 + $0xf8] sm:$0xff] %v3126_v4 }
 0x51f   : > { %v3050_v7 = vpop.f32.mrf.mxu2 }
 0x520   : > { %v3051_v11 = vadd.f32 %v7342_v15, %v3050_v7 }
 0x522   : > { %v3109_v40 = vadd.f32 %v3764_v45, %v3051_v11 }
 0x524   : > { %3141 = vst [vmem:[%s7350_s19 + $0x70] sm:$0xff] %v3109_v40 }
 0x527   : > { %v3052_v18 = vpop.f32.mrf.mxu2 }
 0x528   : > { %v3053_v20 = vadd.f32 %v7342_v15, %v3052_v18 }
 0x52a   : > { %v3110_v17 = vadd.f32 %v3765_v25, %v3053_v20 }
 0x52c   : > { %3142 = vst [vmem:[%s7350_s19 + $0x78] sm:$0xff] %v3110_v17 }
 0x52f   : > { %v3055_v53 = vpop.f32.mrf.mxu2 }
 0x530   : > { %v3056_v34 = vadd.f32 %v7342_v15, %v3055_v53 }
 0x532   : > { %v3111_v49 = vadd.f32 %v3766_v42, %v3056_v34 }
 0x534   : > { %3143 = vst [vmem:[%s7350_s19 + $0x80] sm:$0xff] %v3111_v49 }
 0x537   : > { %v3057_v60 = vpop.f32.mrf.mxu2 }
 0x538   : > { %v3058_v52 = vadd.f32 %v7342_v15, %v3057_v60 }
 0x53a   : > { %v3112_v51 = vadd.f32 %v3767_v30, %v3058_v52 }
 0x53c   : > { %3144 = vst [vmem:[%s7350_s19 + $0x88] sm:$0xff] %v3112_v51 }
 0x53d   : > { %3825 = shalt.err (!%p3822_p4)
}
 0x53e   : > { %s3870_s22 = smov 128   ;;  %s3871_s13 = smov 8  }
 0x53f   : > { %3406 = dma.vmem_to_hbm [thread:$0]  (%p3982_p11), %s3173_s14, 4096, %s3175_s27, %s3160_s28, %s3870_s22, %s3870_s22, %s3871_s13  }
 0x540 PF: > { %s7880_s19 = sld [smem:[#allocation9_spill]]  ;;  %p7882_p7 = scmp.ge.s32.totalorder %s3864_s20, 2 }
 0x542   : > { %p3413_p5 = pnand %p7882_p7, %p3986_p12 }
 0x544   : > { %p3414_p8 = pneg %p3413_p5 }
 0x546   : > { %s3189_s26 = sand.u32 1, %s7880_s19  }
 0x547   : > { %s3190_s25 = scalar_lea.sflag [#allocation5], %s3189_s26 }
 0x548   : > { %3847 = dma.done.wait (%p3414_p8), %s3190_s25, 4096  }
 0x549   : > { %3849 = vsyncadd (%p3414_p8), %s3190_s25, 4294963200  ;;  %s7883_s20 = sld [smem:[#allocation11_spill]]  ;;  %s7886_s17 = smov %s3856_s18 }
 0x54a   : > { %s7884_s21 = sld [smem:[#allocation10_spill]] }
 0x54b   : > { %s7885_s19 = sld [smem:[#allocation12_spill]] }
 0x54f   : > { %p24_p10 = scmp.ge.s32.totalorder %s7883_s20, 4  }
 0x550   : > { %s7887_s18 = smov %s7884_s21 }
 0x551   :  { %26 = sbr.rel (!%p24_p10) target bundleno = 5 (0x5), region = 111 }
 0x556   :  { %3196 = vsyncpa [#allocation4], 1 }
 0x557   :  { %3198 = vsyncpa [#allocation4 + $0x1], 1 }
 0x558   :  { %3199 = vsyncpa [#allocation5], 1 }
 0x559   :  { %3201 = vsyncpa [#allocation5 + $0x1], 1 }

</bundles_post_ra>
